<compile_context>
chip_gen: v7x
topology: tpu7x:2x2x1
jax: 0.10.0
libtpu: 0.0.40
codegen_flags: <defaults>
</compile_context>

<pallas_src>
import functools
import math

import jax
import jax.numpy as jnp
from jax import lax
from jax.experimental import pallas as pl
from jax.experimental.pallas import tpu as pltpu


# ----------------------------------------------------------------------------
# Fused Pallas kernel
# ----------------------------------------------------------------------------
def _lstm_step(gx_t, h, c, whh_ref, H):
    """One LSTM cell update. gx_t already contains x_t @ W_ih + (b_ih + b_hh).

    Gate column order is [i, f, o, g] (permuted at parameter-construction time),
    so one sigmoid covers the contiguous first 3H lanes and one tanh covers the
    last H lanes.
    """
    gates = gx_t + jnp.dot(h, whh_ref[...], preferred_element_type=jnp.float32)  # (1, 4H)
    sig = jax.nn.sigmoid(gates[:, :3 * H])
    i_g = sig[:, 0:H]
    f_g = sig[:, H:2 * H]
    o_g = sig[:, 2 * H:3 * H]
    g_g = jnp.tanh(gates[:, 3 * H:])
    c_new = f_g * c + i_g * g_g
    h_new = o_g * jnp.tanh(c_new)
    return h_new, c_new


def _fused_autoencoder_kernel(x_ref,
                              wih1_ref, whh1_ref, b1_ref,     # enc_rnn1: n_feat -> 2E
                              wih2_ref, whh2_ref, b2_ref,     # enc_rnn2: 2E -> E
                              wih3_ref, whh3_ref, b3_ref,     # dec_rnn1: E -> E
                              wih4_ref, whh4_ref, b4_ref,     # dec_rnn2: E -> 2E
                              wout_ref, bout_ref,             # linear:   2E -> n_feat
                              out_ref, d2_scr,
                              *, seq_len, e_dim):
    T, E = seq_len, e_dim
    H1, H2 = 2 * E, E

    # ------------------ Encoder (wavefront over the two layers) ------------------
    # Hoisted layer-1 input projection + bias: one (T, D) @ (D, 4H1) MXU matmul,
    # off the serial recurrent chain.
    gx1 = (jnp.dot(x_ref[...], wih1_ref[...], preferred_element_type=jnp.float32)
           + b1_ref[...])                                                   # (T, 4H1)

    h1 = jnp.zeros((1, H1), jnp.float32)
    c1 = jnp.zeros((1, H1), jnp.float32)
    h2 = jnp.zeros((1, H2), jnp.float32)
    c2 = jnp.zeros((1, H2), jnp.float32)
    for t in range(T):  # fully unrolled (T static & tiny)
        h1, c1 = _lstm_step(gx1[t:t + 1, :], h1, c1, whh1_ref, H1)
        gx2_t = (jnp.dot(h1, wih2_ref[...], preferred_element_type=jnp.float32)
                 + b2_ref[...])
        h2, c2 = _lstm_step(gx2_t, h2, c2, whh2_ref, H2)

    z = h2  # encoder output == final hidden of enc_rnn2, shape (1, E)

    # ------------------ Decoder (wavefront over the two layers + linear) ---------
    # Decoder input is z repeated T times, so dec_rnn1's input projection is a
    # single row computed once.
    gx3 = (jnp.dot(z, wih3_ref[...], preferred_element_type=jnp.float32)
           + b3_ref[...])                                                   # (1, 4E)

    h3 = jnp.zeros((1, H2), jnp.float32)
    c3 = jnp.zeros((1, H2), jnp.float32)
    h4 = jnp.zeros((1, H1), jnp.float32)
    c4 = jnp.zeros((1, H1), jnp.float32)
    for t in range(T):
        h3, c3 = _lstm_step(gx3, h3, c3, whh3_ref, H2)
        gx4_t = (jnp.dot(h3, wih4_ref[...], preferred_element_type=jnp.float32)
                 + b4_ref[...])
        h4, c4 = _lstm_step(gx4_t, h4, c4, whh4_ref, H1)
        d2_scr[t:t + 1, :] = h4                                             # (1, 2E) row

    # Epilogue: one batched (T, 2E) @ (2E, n_feat) projection, single store.
    out_ref[...] = (jnp.dot(d2_scr[...], wout_ref[...],
                            preferred_element_type=jnp.float32) + bout_ref[...])


# ----------------------------------------------------------------------------
# Wrapper calling pallas_call (single fused launch)
# ----------------------------------------------------------------------------
def recurrent_autoencoder_forward(x, params, seq_len, n_features, embedding_dim):
    assert n_features == 1, "reference module's reshape logic requires n_features == 1"
    E = embedding_dim
    H1 = 2 * E

    x_seq = x.reshape(seq_len, n_features).astype(jnp.float32)

    inputs = (x_seq,
              *params["enc_rnn1"], *params["enc_rnn2"],
              *params["dec_rnn1"], *params["dec_rnn2"],
              *params["out"])

    # Each array is small; present it as a single full-extent block in VMEM.
    in_specs = [pl.BlockSpec(a.shape, lambda i, _nd=a.ndim: (0,) * _nd) for a in inputs]

    return pl.pallas_call(
        functools.partial(_fused_autoencoder_kernel, seq_len=seq_len, e_dim=E),
        out_shape=jax.ShapeDtypeStruct((seq_len, n_features), jnp.float32),
        grid=(1,),
        in_specs=in_specs,
        out_specs=pl.BlockSpec((seq_len, n_features), lambda i: (0, 0)),
        scratch_shapes=[pltpu.VMEM((seq_len, H1), jnp.float32)],
        compiler_params=pltpu.CompilerParams(
            dimension_semantics=("arbitrary",)),
    )(*inputs)


# ----------------------------------------------------------------------------
# Parameter construction (deterministic, PyTorch-style uniform init)
# ----------------------------------------------------------------------------
def _reorder_gate_cols(arr, H):
    """Permute the 4H gate axis from PyTorch [i, f, g, o] to [i, f, o, g].

    Pure column reordering of the same LSTM parameters (semantics unchanged);
    with real PyTorch weights the same permutation would be applied at load time.
    """
    i = arr[..., 0:H]
    f = arr[..., H:2 * H]
    g = arr[..., 2 * H:3 * H]
    o = arr[..., 3 * H:4 * H]
    return jnp.concatenate([i, f, o, g], axis=-1)


def _lstm_params(key, input_dim, hidden_dim):
    k = 1.0 / math.sqrt(hidden_dim)
    k1, k2, k3, k4 = jax.random.split(key, 4)
    w_ih = jax.random.uniform(k1, (4 * hidden_dim, input_dim), jnp.float32, -k, k)
    w_hh = jax.random.uniform(k2, (4 * hidden_dim, hidden_dim), jnp.float32, -k, k)
    b_ih = jax.random.uniform(k3, (4 * hidden_dim,), jnp.float32, -k, k)
    b_hh = jax.random.uniform(k4, (4 * hidden_dim,), jnp.float32, -k, k)
    H = hidden_dim
    # Pre-transpose for (row) @ (D, 4H); combine biases; reorder gates to [i,f,o,g].
    wih_t = _reorder_gate_cols(w_ih.T, H)                              # (D, 4H)
    whh_t = _reorder_gate_cols(w_hh.T, H)                              # (H, 4H)
    bias = _reorder_gate_cols((b_ih + b_hh).reshape(1, 4 * H), H)      # (1, 4H)
    return wih_t, whh_t, bias


def _linear_params(key, in_dim, out_dim):
    k = 1.0 / math.sqrt(in_dim)
    k1, k2 = jax.random.split(key)
    w = jax.random.uniform(k1, (out_dim, in_dim), jnp.float32, -k, k)
    b = jax.random.uniform(k2, (out_dim,), jnp.float32, -k, k)
    return w.T, b.reshape(1, out_dim)


def make_params(seq_len, n_features, embedding_dim, key):
    ks = jax.random.split(key, 5)
    E, H = embedding_dim, 2 * embedding_dim
    return {
        "enc_rnn1": _lstm_params(ks[0], n_features, H),   # n_feat -> 2E
        "enc_rnn2": _lstm_params(ks[1], H, E),            # 2E -> E
        "dec_rnn1": _lstm_params(ks[2], E, E),            # E -> E
        "dec_rnn2": _lstm_params(ks[3], E, H),            # E -> 2E
        "out": _linear_params(ks[4], H, n_features),      # 2E -> n_feat
    }


# ----------------------------------------------------------------------------
# Pure-JAX reference (for correctness checking); uses the same [i,f,o,g] params.
# ----------------------------------------------------------------------------
def _lstm_ref(x_seq, wih_t, whh_t, bias):
    H = whh_t.shape[0]
    gx = x_seq @ wih_t + bias                      # (T, 4H)

    def step(carry, gx_t):
        h, c = carry
        gates = gx_t + h @ whh_t
        i = jax.nn.sigmoid(gates[0:H])
        f = jax.nn.sigmoid(gates[H:2 * H])
        o = jax.nn.sigmoid(gates[2 * H:3 * H])
        g = jnp.tanh(gates[3 * H:4 * H])
        c = f * c + i * g
        h = o * jnp.tanh(c)
        return (h, c), h

    _, hs = lax.scan(step, (jnp.zeros((H,), jnp.float32),
                            jnp.zeros((H,), jnp.float32)), gx)
    return hs


def forward_ref(x, params, seq_len, n_features, embedding_dim):
    x_seq = x.reshape(seq_len, n_features).astype(jnp.float32)
    h1 = _lstm_ref(x_seq, *params["enc_rnn1"])
    h2 = _lstm_ref(h1, *params["enc_rnn2"])
    z = h2[seq_len - 1:seq_len, :]
    xd = jnp.tile(z, (seq_len, n_features)).reshape(seq_len, embedding_dim)
    d1 = _lstm_ref(xd, *params["dec_rnn1"])
    d2 = _lstm_ref(d1, *params["dec_rnn2"])
    w_t, b = params["out"]
    return d2 @ w_t + b


# ----------------------------------------------------------------------------
if __name__ == "__main__":
    seq_len, n_features, embedding_dim = 8, 1, 32

    key = jax.random.PRNGKey(0)
    k_params, k_x = jax.random.split(key)
    params = make_params(seq_len, n_features, embedding_dim, k_params)

    # Same input the PyTorch module takes: a single (seq_len, n_features) series.
    x = jax.random.normal(k_x, (seq_len, n_features), dtype=jnp.float32)

    out = recurrent_autoencoder_forward(x, params, seq_len, n_features, embedding_dim)
    out = jax.block_until_ready(out)

    ref = forward_ref(x, params, seq_len, n_features, embedding_dim)
    assert out.shape == (seq_len, n_features)
    assert jnp.allclose(out, ref, atol=1e-4, rtol=1e-4), "mismatch vs JAX reference"

    print("KERNEL_OK")
</pallas_src>

<mosaic_0001>
module attributes {stable_mosaic.version = 11 : i64} {
  func.func @_fused_autoencoder_kernel(%arg0: i32, %arg1: memref<8x1xf32, #tpu.memory_space<vmem>>, %arg2: memref<1x256xf32, #tpu.memory_space<vmem>>, %arg3: memref<64x256xf32, #tpu.memory_space<vmem>>, %arg4: memref<1x256xf32, #tpu.memory_space<vmem>>, %arg5: memref<64x128xf32, #tpu.memory_space<vmem>>, %arg6: memref<32x128xf32, #tpu.memory_space<vmem>>, %arg7: memref<1x128xf32, #tpu.memory_space<vmem>>, %arg8: memref<32x128xf32, #tpu.memory_space<vmem>>, %arg9: memref<32x128xf32, #tpu.memory_space<vmem>>, %arg10: memref<1x128xf32, #tpu.memory_space<vmem>>, %arg11: memref<32x256xf32, #tpu.memory_space<vmem>>, %arg12: memref<64x256xf32, #tpu.memory_space<vmem>>, %arg13: memref<1x256xf32, #tpu.memory_space<vmem>>, %arg14: memref<64x1xf32, #tpu.memory_space<vmem>>, %arg15: memref<1x1xf32, #tpu.memory_space<vmem>>, %arg16: memref<8x1xf32, #tpu.memory_space<vmem>>, %arg17: memref<8x64xf32, #tpu.memory_space<vmem>>) attributes {dimension_semantics = [#tpu.dimension_semantics<arbitrary>], iteration_bounds = array<i64: 1>, scalar_prefetch = 0 : i64, scratch_operands = 1 : i64, tpu.core_type = #tpu.core_type<tc>, window_params = [{pipeline_mode = #tpu.pipeline_mode<synchronous>, transform_indices = @transform_0, window_bounds = array<i64: 8, 1>}, {pipeline_mode = #tpu.pipeline_mode<synchronous>, transform_indices = @transform_1, window_bounds = array<i64: 1, 256>}, {pipeline_mode = #tpu.pipeline_mode<synchronous>, transform_indices = @transform_2, window_bounds = array<i64: 64, 256>}, {pipeline_mode = #tpu.pipeline_mode<synchronous>, transform_indices = @transform_3, window_bounds = array<i64: 1, 256>}, {pipeline_mode = #tpu.pipeline_mode<synchronous>, transform_indices = @transform_4, window_bounds = array<i64: 64, 128>}, {pipeline_mode = #tpu.pipeline_mode<synchronous>, transform_indices = @transform_5, window_bounds = array<i64: 32, 128>}, {pipeline_mode = #tpu.pipeline_mode<synchronous>, transform_indices = @transform_6, window_bounds = array<i64: 1, 128>}, {pipeline_mode = #tpu.pipeline_mode<synchronous>, transform_indices = @transform_7, window_bounds = array<i64: 32, 128>}, {pipeline_mode = #tpu.pipeline_mode<synchronous>, transform_indices = @transform_8, window_bounds = array<i64: 32, 128>}, {pipeline_mode = #tpu.pipeline_mode<synchronous>, transform_indices = @transform_9, window_bounds = array<i64: 1, 128>}, {pipeline_mode = #tpu.pipeline_mode<synchronous>, transform_indices = @transform_10, window_bounds = array<i64: 32, 256>}, {pipeline_mode = #tpu.pipeline_mode<synchronous>, transform_indices = @transform_11, window_bounds = array<i64: 64, 256>}, {pipeline_mode = #tpu.pipeline_mode<synchronous>, transform_indices = @transform_12, window_bounds = array<i64: 1, 256>}, {pipeline_mode = #tpu.pipeline_mode<synchronous>, transform_indices = @transform_13, window_bounds = array<i64: 64, 1>}, {pipeline_mode = #tpu.pipeline_mode<synchronous>, transform_indices = @transform_14, window_bounds = array<i64: 1, 1>}, {pipeline_mode = #tpu.pipeline_mode<synchronous>, transform_indices = @transform_15, window_bounds = array<i64: 8, 1>}]} {
    %c0 = arith.constant 0 : index
    %c0_0 = arith.constant 0 : index
    %0 = vector.load %arg1[%c0, %c0_0] : memref<8x1xf32, #tpu.memory_space<vmem>>, vector<8x1xf32>
    %c0_1 = arith.constant 0 : index
    %c0_2 = arith.constant 0 : index
    %1 = vector.load %arg2[%c0_1, %c0_2] : memref<1x256xf32, #tpu.memory_space<vmem>>, vector<1x256xf32>
    %cst = arith.constant dense<0.000000e+00> : vector<8x256xf32>
    %2 = tpu.matmul %0, %1, %cst {dimension_numbers = #tpu.dot_dimension_numbers<[1], [0], [0], [1], [0, 0, 1, 1], [], []>} : vector<8x1xf32>, vector<1x256xf32>, vector<8x256xf32> -> vector<8x256xf32>
    %c0_3 = arith.constant 0 : index
    %c0_4 = arith.constant 0 : index
    %3 = vector.load %arg4[%c0_3, %c0_4] : memref<1x256xf32, #tpu.memory_space<vmem>>, vector<1x256xf32>
    %4 = vector.broadcast %3 : vector<1x256xf32> to vector<8x256xf32>
    %5 = arith.addf %2, %4 : vector<8x256xf32>
    %cst_5 = arith.constant 0.000000e+00 : f32
    %6 = vector.broadcast %cst_5 : f32 to vector<1x64xf32>
    %cst_6 = arith.constant 0.000000e+00 : f32
    %7 = vector.broadcast %cst_6 : f32 to vector<1x64xf32>
    %cst_7 = arith.constant 0.000000e+00 : f32
    %8 = vector.broadcast %cst_7 : f32 to vector<1x32xf32>
    %cst_8 = arith.constant 0.000000e+00 : f32
    %9 = vector.broadcast %cst_8 : f32 to vector<1x32xf32>
    %10 = vector.extract_strided_slice %5 {offsets = [0, 0], sizes = [1, 256], strides = [1, 1]} : vector<8x256xf32> to vector<1x256xf32>
    %c0_9 = arith.constant 0 : index
    %c0_10 = arith.constant 0 : index
    %11 = vector.load %arg3[%c0_9, %c0_10] : memref<64x256xf32, #tpu.memory_space<vmem>>, vector<64x256xf32>
    %cst_11 = arith.constant dense<0.000000e+00> : vector<1x256xf32>
    %12 = tpu.matmul %6, %11, %cst_11 {dimension_numbers = #tpu.dot_dimension_numbers<[1], [0], [0], [1], [0, 0, 1, 1], [], []>} : vector<1x64xf32>, vector<64x256xf32>, vector<1x256xf32> -> vector<1x256xf32>
    %13 = arith.addf %10, %12 : vector<1x256xf32>
    %14 = vector.extract_strided_slice %13 {offsets = [0, 0], sizes = [1, 192], strides = [1, 1]} : vector<1x256xf32> to vector<1x192xf32>
    %15 = arith.negf %14 : vector<1x192xf32>
    %16 = math.exp %15 : vector<1x192xf32>
    %cst_12 = arith.constant 1.000000e+00 : f32
    %17 = vector.broadcast %cst_12 : f32 to vector<1x192xf32>
    %18 = arith.addf %17, %16 : vector<1x192xf32>
    %19 = arith.divf %17, %18 : vector<1x192xf32>
    %20 = vector.extract_strided_slice %19 {offsets = [0, 0], sizes = [1, 64], strides = [1, 1]} : vector<1x192xf32> to vector<1x64xf32>
    %21 = vector.extract_strided_slice %19 {offsets = [0, 64], sizes = [1, 64], strides = [1, 1]} : vector<1x192xf32> to vector<1x64xf32>
    %22 = vector.extract_strided_slice %19 {offsets = [0, 128], sizes = [1, 64], strides = [1, 1]} : vector<1x192xf32> to vector<1x64xf32>
    %23 = vector.extract_strided_slice %13 {offsets = [0, 192], sizes = [1, 64], strides = [1, 1]} : vector<1x256xf32> to vector<1x64xf32>
    %24 = math.tanh %23 : vector<1x64xf32>
    %25 = arith.mulf %21, %7 : vector<1x64xf32>
    %26 = arith.mulf %20, %24 : vector<1x64xf32>
    %27 = arith.addf %25, %26 : vector<1x64xf32>
    %28 = math.tanh %27 : vector<1x64xf32>
    %29 = arith.mulf %22, %28 : vector<1x64xf32>
    %c0_13 = arith.constant 0 : index
    %c0_14 = arith.constant 0 : index
    %30 = vector.load %arg5[%c0_13, %c0_14] : memref<64x128xf32, #tpu.memory_space<vmem>>, vector<64x128xf32>
    %cst_15 = arith.constant dense<0.000000e+00> : vector<1x128xf32>
    %31 = tpu.matmul %29, %30, %cst_15 {dimension_numbers = #tpu.dot_dimension_numbers<[1], [0], [0], [1], [0, 0, 1, 1], [], []>} : vector<1x64xf32>, vector<64x128xf32>, vector<1x128xf32> -> vector<1x128xf32>
    %c0_16 = arith.constant 0 : index
    %c0_17 = arith.constant 0 : index
    %32 = vector.load %arg7[%c0_16, %c0_17] : memref<1x128xf32, #tpu.memory_space<vmem>>, vector<1x128xf32>
    %33 = arith.addf %31, %32 : vector<1x128xf32>
    %c0_18 = arith.constant 0 : index
    %c0_19 = arith.constant 0 : index
    %34 = vector.load %arg6[%c0_18, %c0_19] : memref<32x128xf32, #tpu.memory_space<vmem>>, vector<32x128xf32>
    %cst_20 = arith.constant dense<0.000000e+00> : vector<1x128xf32>
    %35 = tpu.matmul %8, %34, %cst_20 {dimension_numbers = #tpu.dot_dimension_numbers<[1], [0], [0], [1], [0, 0, 1, 1], [], []>} : vector<1x32xf32>, vector<32x128xf32>, vector<1x128xf32> -> vector<1x128xf32>
    %36 = arith.addf %33, %35 : vector<1x128xf32>
    %37 = vector.extract_strided_slice %36 {offsets = [0, 0], sizes = [1, 96], strides = [1, 1]} : vector<1x128xf32> to vector<1x96xf32>
    %38 = arith.negf %37 : vector<1x96xf32>
    %39 = math.exp %38 : vector<1x96xf32>
    %cst_21 = arith.constant 1.000000e+00 : f32
    %40 = vector.broadcast %cst_21 : f32 to vector<1x96xf32>
    %41 = arith.addf %40, %39 : vector<1x96xf32>
    %42 = arith.divf %40, %41 : vector<1x96xf32>
    %43 = vector.extract_strided_slice %42 {offsets = [0, 0], sizes = [1, 32], strides = [1, 1]} : vector<1x96xf32> to vector<1x32xf32>
    %44 = vector.extract_strided_slice %42 {offsets = [0, 32], sizes = [1, 32], strides = [1, 1]} : vector<1x96xf32> to vector<1x32xf32>
    %45 = vector.extract_strided_slice %42 {offsets = [0, 64], sizes = [1, 32], strides = [1, 1]} : vector<1x96xf32> to vector<1x32xf32>
    %46 = vector.extract_strided_slice %36 {offsets = [0, 96], sizes = [1, 32], strides = [1, 1]} : vector<1x128xf32> to vector<1x32xf32>
    %47 = math.tanh %46 : vector<1x32xf32>
    %48 = arith.mulf %44, %9 : vector<1x32xf32>
    %49 = arith.mulf %43, %47 : vector<1x32xf32>
    %50 = arith.addf %48, %49 : vector<1x32xf32>
    %51 = math.tanh %50 : vector<1x32xf32>
    %52 = arith.mulf %45, %51 : vector<1x32xf32>
    %53 = vector.extract_strided_slice %5 {offsets = [1, 0], sizes = [1, 256], strides = [1, 1]} : vector<8x256xf32> to vector<1x256xf32>
    %c0_22 = arith.constant 0 : index
    %c0_23 = arith.constant 0 : index
    %54 = vector.load %arg3[%c0_22, %c0_23] : memref<64x256xf32, #tpu.memory_space<vmem>>, vector<64x256xf32>
    %cst_24 = arith.constant dense<0.000000e+00> : vector<1x256xf32>
    %55 = tpu.matmul %29, %54, %cst_24 {dimension_numbers = #tpu.dot_dimension_numbers<[1], [0], [0], [1], [0, 0, 1, 1], [], []>} : vector<1x64xf32>, vector<64x256xf32>, vector<1x256xf32> -> vector<1x256xf32>
    %56 = arith.addf %53, %55 : vector<1x256xf32>
    %57 = vector.extract_strided_slice %56 {offsets = [0, 0], sizes = [1, 192], strides = [1, 1]} : vector<1x256xf32> to vector<1x192xf32>
    %58 = arith.negf %57 : vector<1x192xf32>
    %59 = math.exp %58 : vector<1x192xf32>
    %cst_25 = arith.constant 1.000000e+00 : f32
    %60 = vector.broadcast %cst_25 : f32 to vector<1x192xf32>
    %61 = arith.addf %60, %59 : vector<1x192xf32>
    %62 = arith.divf %60, %61 : vector<1x192xf32>
    %63 = vector.extract_strided_slice %62 {offsets = [0, 0], sizes = [1, 64], strides = [1, 1]} : vector<1x192xf32> to vector<1x64xf32>
    %64 = vector.extract_strided_slice %62 {offsets = [0, 64], sizes = [1, 64], strides = [1, 1]} : vector<1x192xf32> to vector<1x64xf32>
    %65 = vector.extract_strided_slice %62 {offsets = [0, 128], sizes = [1, 64], strides = [1, 1]} : vector<1x192xf32> to vector<1x64xf32>
    %66 = vector.extract_strided_slice %56 {offsets = [0, 192], sizes = [1, 64], strides = [1, 1]} : vector<1x256xf32> to vector<1x64xf32>
    %67 = math.tanh %66 : vector<1x64xf32>
    %68 = arith.mulf %64, %27 : vector<1x64xf32>
    %69 = arith.mulf %63, %67 : vector<1x64xf32>
    %70 = arith.addf %68, %69 : vector<1x64xf32>
    %71 = math.tanh %70 : vector<1x64xf32>
    %72 = arith.mulf %65, %71 : vector<1x64xf32>
    %c0_26 = arith.constant 0 : index
    %c0_27 = arith.constant 0 : index
    %73 = vector.load %arg5[%c0_26, %c0_27] : memref<64x128xf32, #tpu.memory_space<vmem>>, vector<64x128xf32>
    %cst_28 = arith.constant dense<0.000000e+00> : vector<1x128xf32>
    %74 = tpu.matmul %72, %73, %cst_28 {dimension_numbers = #tpu.dot_dimension_numbers<[1], [0], [0], [1], [0, 0, 1, 1], [], []>} : vector<1x64xf32>, vector<64x128xf32>, vector<1x128xf32> -> vector<1x128xf32>
    %c0_29 = arith.constant 0 : index
    %c0_30 = arith.constant 0 : index
    %75 = vector.load %arg7[%c0_29, %c0_30] : memref<1x128xf32, #tpu.memory_space<vmem>>, vector<1x128xf32>
    %76 = arith.addf %74, %75 : vector<1x128xf32>
    %c0_31 = arith.constant 0 : index
    %c0_32 = arith.constant 0 : index
    %77 = vector.load %arg6[%c0_31, %c0_32] : memref<32x128xf32, #tpu.memory_space<vmem>>, vector<32x128xf32>
    %cst_33 = arith.constant dense<0.000000e+00> : vector<1x128xf32>
    %78 = tpu.matmul %52, %77, %cst_33 {dimension_numbers = #tpu.dot_dimension_numbers<[1], [0], [0], [1], [0, 0, 1, 1], [], []>} : vector<1x32xf32>, vector<32x128xf32>, vector<1x128xf32> -> vector<1x128xf32>
    %79 = arith.addf %76, %78 : vector<1x128xf32>
    %80 = vector.extract_strided_slice %79 {offsets = [0, 0], sizes = [1, 96], strides = [1, 1]} : vector<1x128xf32> to vector<1x96xf32>
    %81 = arith.negf %80 : vector<1x96xf32>
    %82 = math.exp %81 : vector<1x96xf32>
    %cst_34 = arith.constant 1.000000e+00 : f32
    %83 = vector.broadcast %cst_34 : f32 to vector<1x96xf32>
    %84 = arith.addf %83, %82 : vector<1x96xf32>
    %85 = arith.divf %83, %84 : vector<1x96xf32>
    %86 = vector.extract_strided_slice %85 {offsets = [0, 0], sizes = [1, 32], strides = [1, 1]} : vector<1x96xf32> to vector<1x32xf32>
    %87 = vector.extract_strided_slice %85 {offsets = [0, 32], sizes = [1, 32], strides = [1, 1]} : vector<1x96xf32> to vector<1x32xf32>
    %88 = vector.extract_strided_slice %85 {offsets = [0, 64], sizes = [1, 32], strides = [1, 1]} : vector<1x96xf32> to vector<1x32xf32>
    %89 = vector.extract_strided_slice %79 {offsets = [0, 96], sizes = [1, 32], strides = [1, 1]} : vector<1x128xf32> to vector<1x32xf32>
    %90 = math.tanh %89 : vector<1x32xf32>
    %91 = arith.mulf %87, %50 : vector<1x32xf32>
    %92 = arith.mulf %86, %90 : vector<1x32xf32>
    %93 = arith.addf %91, %92 : vector<1x32xf32>
    %94 = math.tanh %93 : vector<1x32xf32>
    %95 = arith.mulf %88, %94 : vector<1x32xf32>
    %96 = vector.extract_strided_slice %5 {offsets = [2, 0], sizes = [1, 256], strides = [1, 1]} : vector<8x256xf32> to vector<1x256xf32>
    %c0_35 = arith.constant 0 : index
    %c0_36 = arith.constant 0 : index
    %97 = vector.load %arg3[%c0_35, %c0_36] : memref<64x256xf32, #tpu.memory_space<vmem>>, vector<64x256xf32>
    %cst_37 = arith.constant dense<0.000000e+00> : vector<1x256xf32>
    %98 = tpu.matmul %72, %97, %cst_37 {dimension_numbers = #tpu.dot_dimension_numbers<[1], [0], [0], [1], [0, 0, 1, 1], [], []>} : vector<1x64xf32>, vector<64x256xf32>, vector<1x256xf32> -> vector<1x256xf32>
    %99 = arith.addf %96, %98 : vector<1x256xf32>
    %100 = vector.extract_strided_slice %99 {offsets = [0, 0], sizes = [1, 192], strides = [1, 1]} : vector<1x256xf32> to vector<1x192xf32>
    %101 = arith.negf %100 : vector<1x192xf32>
    %102 = math.exp %101 : vector<1x192xf32>
    %cst_38 = arith.constant 1.000000e+00 : f32
    %103 = vector.broadcast %cst_38 : f32 to vector<1x192xf32>
    %104 = arith.addf %103, %102 : vector<1x192xf32>
    %105 = arith.divf %103, %104 : vector<1x192xf32>
    %106 = vector.extract_strided_slice %105 {offsets = [0, 0], sizes = [1, 64], strides = [1, 1]} : vector<1x192xf32> to vector<1x64xf32>
    %107 = vector.extract_strided_slice %105 {offsets = [0, 64], sizes = [1, 64], strides = [1, 1]} : vector<1x192xf32> to vector<1x64xf32>
    %108 = vector.extract_strided_slice %105 {offsets = [0, 128], sizes = [1, 64], strides = [1, 1]} : vector<1x192xf32> to vector<1x64xf32>
    %109 = vector.extract_strided_slice %99 {offsets = [0, 192], sizes = [1, 64], strides = [1, 1]} : vector<1x256xf32> to vector<1x64xf32>
    %110 = math.tanh %109 : vector<1x64xf32>
    %111 = arith.mulf %107, %70 : vector<1x64xf32>
    %112 = arith.mulf %106, %110 : vector<1x64xf32>
    %113 = arith.addf %111, %112 : vector<1x64xf32>
    %114 = math.tanh %113 : vector<1x64xf32>
    %115 = arith.mulf %108, %114 : vector<1x64xf32>
    %c0_39 = arith.constant 0 : index
    %c0_40 = arith.constant 0 : index
    %116 = vector.load %arg5[%c0_39, %c0_40] : memref<64x128xf32, #tpu.memory_space<vmem>>, vector<64x128xf32>
    %cst_41 = arith.constant dense<0.000000e+00> : vector<1x128xf32>
    %117 = tpu.matmul %115, %116, %cst_41 {dimension_numbers = #tpu.dot_dimension_numbers<[1], [0], [0], [1], [0, 0, 1, 1], [], []>} : vector<1x64xf32>, vector<64x128xf32>, vector<1x128xf32> -> vector<1x128xf32>
    %c0_42 = arith.constant 0 : index
    %c0_43 = arith.constant 0 : index
    %118 = vector.load %arg7[%c0_42, %c0_43] : memref<1x128xf32, #tpu.memory_space<vmem>>, vector<1x128xf32>
    %119 = arith.addf %117, %118 : vector<1x128xf32>
    %c0_44 = arith.constant 0 : index
    %c0_45 = arith.constant 0 : index
    %120 = vector.load %arg6[%c0_44, %c0_45] : memref<32x128xf32, #tpu.memory_space<vmem>>, vector<32x128xf32>
    %cst_46 = arith.constant dense<0.000000e+00> : vector<1x128xf32>
    %121 = tpu.matmul %95, %120, %cst_46 {dimension_numbers = #tpu.dot_dimension_numbers<[1], [0], [0], [1], [0, 0, 1, 1], [], []>} : vector<1x32xf32>, vector<32x128xf32>, vector<1x128xf32> -> vector<1x128xf32>
    %122 = arith.addf %119, %121 : vector<1x128xf32>
    %123 = vector.extract_strided_slice %122 {offsets = [0, 0], sizes = [1, 96], strides = [1, 1]} : vector<1x128xf32> to vector<1x96xf32>
    %124 = arith.negf %123 : vector<1x96xf32>
    %125 = math.exp %124 : vector<1x96xf32>
    %cst_47 = arith.constant 1.000000e+00 : f32
    %126 = vector.broadcast %cst_47 : f32 to vector<1x96xf32>
    %127 = arith.addf %126, %125 : vector<1x96xf32>
    %128 = arith.divf %126, %127 : vector<1x96xf32>
    %129 = vector.extract_strided_slice %128 {offsets = [0, 0], sizes = [1, 32], strides = [1, 1]} : vector<1x96xf32> to vector<1x32xf32>
    %130 = vector.extract_strided_slice %128 {offsets = [0, 32], sizes = [1, 32], strides = [1, 1]} : vector<1x96xf32> to vector<1x32xf32>
    %131 = vector.extract_strided_slice %128 {offsets = [0, 64], sizes = [1, 32], strides = [1, 1]} : vector<1x96xf32> to vector<1x32xf32>
    %132 = vector.extract_strided_slice %122 {offsets = [0, 96], sizes = [1, 32], strides = [1, 1]} : vector<1x128xf32> to vector<1x32xf32>
    %133 = math.tanh %132 : vector<1x32xf32>
    %134 = arith.mulf %130, %93 : vector<1x32xf32>
    %135 = arith.mulf %129, %133 : vector<1x32xf32>
    %136 = arith.addf %134, %135 : vector<1x32xf32>
    %137 = math.tanh %136 : vector<1x32xf32>
    %138 = arith.mulf %131, %137 : vector<1x32xf32>
    %139 = vector.extract_strided_slice %5 {offsets = [3, 0], sizes = [1, 256], strides = [1, 1]} : vector<8x256xf32> to vector<1x256xf32>
    %c0_48 = arith.constant 0 : index
    %c0_49 = arith.constant 0 : index
    %140 = vector.load %arg3[%c0_48, %c0_49] : memref<64x256xf32, #tpu.memory_space<vmem>>, vector<64x256xf32>
    %cst_50 = arith.constant dense<0.000000e+00> : vector<1x256xf32>
    %141 = tpu.matmul %115, %140, %cst_50 {dimension_numbers = #tpu.dot_dimension_numbers<[1], [0], [0], [1], [0, 0, 1, 1], [], []>} : vector<1x64xf32>, vector<64x256xf32>, vector<1x256xf32> -> vector<1x256xf32>
    %142 = arith.addf %139, %141 : vector<1x256xf32>
    %143 = vector.extract_strided_slice %142 {offsets = [0, 0], sizes = [1, 192], strides = [1, 1]} : vector<1x256xf32> to vector<1x192xf32>
    %144 = arith.negf %143 : vector<1x192xf32>
    %145 = math.exp %144 : vector<1x192xf32>
    %cst_51 = arith.constant 1.000000e+00 : f32
    %146 = vector.broadcast %cst_51 : f32 to vector<1x192xf32>
    %147 = arith.addf %146, %145 : vector<1x192xf32>
    %148 = arith.divf %146, %147 : vector<1x192xf32>
    %149 = vector.extract_strided_slice %148 {offsets = [0, 0], sizes = [1, 64], strides = [1, 1]} : vector<1x192xf32> to vector<1x64xf32>
    %150 = vector.extract_strided_slice %148 {offsets = [0, 64], sizes = [1, 64], strides = [1, 1]} : vector<1x192xf32> to vector<1x64xf32>
    %151 = vector.extract_strided_slice %148 {offsets = [0, 128], sizes = [1, 64], strides = [1, 1]} : vector<1x192xf32> to vector<1x64xf32>
    %152 = vector.extract_strided_slice %142 {offsets = [0, 192], sizes = [1, 64], strides = [1, 1]} : vector<1x256xf32> to vector<1x64xf32>
    %153 = math.tanh %152 : vector<1x64xf32>
    %154 = arith.mulf %150, %113 : vector<1x64xf32>
    %155 = arith.mulf %149, %153 : vector<1x64xf32>
    %156 = arith.addf %154, %155 : vector<1x64xf32>
    %157 = math.tanh %156 : vector<1x64xf32>
    %158 = arith.mulf %151, %157 : vector<1x64xf32>
    %c0_52 = arith.constant 0 : index
    %c0_53 = arith.constant 0 : index
    %159 = vector.load %arg5[%c0_52, %c0_53] : memref<64x128xf32, #tpu.memory_space<vmem>>, vector<64x128xf32>
    %cst_54 = arith.constant dense<0.000000e+00> : vector<1x128xf32>
    %160 = tpu.matmul %158, %159, %cst_54 {dimension_numbers = #tpu.dot_dimension_numbers<[1], [0], [0], [1], [0, 0, 1, 1], [], []>} : vector<1x64xf32>, vector<64x128xf32>, vector<1x128xf32> -> vector<1x128xf32>
    %c0_55 = arith.constant 0 : index
    %c0_56 = arith.constant 0 : index
    %161 = vector.load %arg7[%c0_55, %c0_56] : memref<1x128xf32, #tpu.memory_space<vmem>>, vector<1x128xf32>
    %162 = arith.addf %160, %161 : vector<1x128xf32>
    %c0_57 = arith.constant 0 : index
    %c0_58 = arith.constant 0 : index
    %163 = vector.load %arg6[%c0_57, %c0_58] : memref<32x128xf32, #tpu.memory_space<vmem>>, vector<32x128xf32>
    %cst_59 = arith.constant dense<0.000000e+00> : vector<1x128xf32>
    %164 = tpu.matmul %138, %163, %cst_59 {dimension_numbers = #tpu.dot_dimension_numbers<[1], [0], [0], [1], [0, 0, 1, 1], [], []>} : vector<1x32xf32>, vector<32x128xf32>, vector<1x128xf32> -> vector<1x128xf32>
    %165 = arith.addf %162, %164 : vector<1x128xf32>
    %166 = vector.extract_strided_slice %165 {offsets = [0, 0], sizes = [1, 96], strides = [1, 1]} : vector<1x128xf32> to vector<1x96xf32>
    %167 = arith.negf %166 : vector<1x96xf32>
    %168 = math.exp %167 : vector<1x96xf32>
    %cst_60 = arith.constant 1.000000e+00 : f32
    %169 = vector.broadcast %cst_60 : f32 to vector<1x96xf32>
    %170 = arith.addf %169, %168 : vector<1x96xf32>
    %171 = arith.divf %169, %170 : vector<1x96xf32>
    %172 = vector.extract_strided_slice %171 {offsets = [0, 0], sizes = [1, 32], strides = [1, 1]} : vector<1x96xf32> to vector<1x32xf32>
    %173 = vector.extract_strided_slice %171 {offsets = [0, 32], sizes = [1, 32], strides = [1, 1]} : vector<1x96xf32> to vector<1x32xf32>
    %174 = vector.extract_strided_slice %171 {offsets = [0, 64], sizes = [1, 32], strides = [1, 1]} : vector<1x96xf32> to vector<1x32xf32>
    %175 = vector.extract_strided_slice %165 {offsets = [0, 96], sizes = [1, 32], strides = [1, 1]} : vector<1x128xf32> to vector<1x32xf32>
    %176 = math.tanh %175 : vector<1x32xf32>
    %177 = arith.mulf %173, %136 : vector<1x32xf32>
    %178 = arith.mulf %172, %176 : vector<1x32xf32>
    %179 = arith.addf %177, %178 : vector<1x32xf32>
    %180 = math.tanh %179 : vector<1x32xf32>
    %181 = arith.mulf %174, %180 : vector<1x32xf32>
    %182 = vector.extract_strided_slice %5 {offsets = [4, 0], sizes = [1, 256], strides = [1, 1]} : vector<8x256xf32> to vector<1x256xf32>
    %c0_61 = arith.constant 0 : index
    %c0_62 = arith.constant 0 : index
    %183 = vector.load %arg3[%c0_61, %c0_62] : memref<64x256xf32, #tpu.memory_space<vmem>>, vector<64x256xf32>
    %cst_63 = arith.constant dense<0.000000e+00> : vector<1x256xf32>
    %184 = tpu.matmul %158, %183, %cst_63 {dimension_numbers = #tpu.dot_dimension_numbers<[1], [0], [0], [1], [0, 0, 1, 1], [], []>} : vector<1x64xf32>, vector<64x256xf32>, vector<1x256xf32> -> vector<1x256xf32>
    %185 = arith.addf %182, %184 : vector<1x256xf32>
    %186 = vector.extract_strided_slice %185 {offsets = [0, 0], sizes = [1, 192], strides = [1, 1]} : vector<1x256xf32> to vector<1x192xf32>
    %187 = arith.negf %186 : vector<1x192xf32>
    %188 = math.exp %187 : vector<1x192xf32>
    %cst_64 = arith.constant 1.000000e+00 : f32
    %189 = vector.broadcast %cst_64 : f32 to vector<1x192xf32>
    %190 = arith.addf %189, %188 : vector<1x192xf32>
    %191 = arith.divf %189, %190 : vector<1x192xf32>
    %192 = vector.extract_strided_slice %191 {offsets = [0, 0], sizes = [1, 64], strides = [1, 1]} : vector<1x192xf32> to vector<1x64xf32>
    %193 = vector.extract_strided_slice %191 {offsets = [0, 64], sizes = [1, 64], strides = [1, 1]} : vector<1x192xf32> to vector<1x64xf32>
    %194 = vector.extract_strided_slice %191 {offsets = [0, 128], sizes = [1, 64], strides = [1, 1]} : vector<1x192xf32> to vector<1x64xf32>
    %195 = vector.extract_strided_slice %185 {offsets = [0, 192], sizes = [1, 64], strides = [1, 1]} : vector<1x256xf32> to vector<1x64xf32>
    %196 = math.tanh %195 : vector<1x64xf32>
    %197 = arith.mulf %193, %156 : vector<1x64xf32>
    %198 = arith.mulf %192, %196 : vector<1x64xf32>
    %199 = arith.addf %197, %198 : vector<1x64xf32>
    %200 = math.tanh %199 : vector<1x64xf32>
    %201 = arith.mulf %194, %200 : vector<1x64xf32>
    %c0_65 = arith.constant 0 : index
    %c0_66 = arith.constant 0 : index
    %202 = vector.load %arg5[%c0_65, %c0_66] : memref<64x128xf32, #tpu.memory_space<vmem>>, vector<64x128xf32>
    %cst_67 = arith.constant dense<0.000000e+00> : vector<1x128xf32>
    %203 = tpu.matmul %201, %202, %cst_67 {dimension_numbers = #tpu.dot_dimension_numbers<[1], [0], [0], [1], [0, 0, 1, 1], [], []>} : vector<1x64xf32>, vector<64x128xf32>, vector<1x128xf32> -> vector<1x128xf32>
    %c0_68 = arith.constant 0 : index
    %c0_69 = arith.constant 0 : index
    %204 = vector.load %arg7[%c0_68, %c0_69] : memref<1x128xf32, #tpu.memory_space<vmem>>, vector<1x128xf32>
    %205 = arith.addf %203, %204 : vector<1x128xf32>
    %c0_70 = arith.constant 0 : index
    %c0_71 = arith.constant 0 : index
    %206 = vector.load %arg6[%c0_70, %c0_71] : memref<32x128xf32, #tpu.memory_space<vmem>>, vector<32x128xf32>
    %cst_72 = arith.constant dense<0.000000e+00> : vector<1x128xf32>
    %207 = tpu.matmul %181, %206, %cst_72 {dimension_numbers = #tpu.dot_dimension_numbers<[1], [0], [0], [1], [0, 0, 1, 1], [], []>} : vector<1x32xf32>, vector<32x128xf32>, vector<1x128xf32> -> vector<1x128xf32>
    %208 = arith.addf %205, %207 : vector<1x128xf32>
    %209 = vector.extract_strided_slice %208 {offsets = [0, 0], sizes = [1, 96], strides = [1, 1]} : vector<1x128xf32> to vector<1x96xf32>
    %210 = arith.negf %209 : vector<1x96xf32>
    %211 = math.exp %210 : vector<1x96xf32>
    %cst_73 = arith.constant 1.000000e+00 : f32
    %212 = vector.broadcast %cst_73 : f32 to vector<1x96xf32>
    %213 = arith.addf %212, %211 : vector<1x96xf32>
    %214 = arith.divf %212, %213 : vector<1x96xf32>
    %215 = vector.extract_strided_slice %214 {offsets = [0, 0], sizes = [1, 32], strides = [1, 1]} : vector<1x96xf32> to vector<1x32xf32>
    %216 = vector.extract_strided_slice %214 {offsets = [0, 32], sizes = [1, 32], strides = [1, 1]} : vector<1x96xf32> to vector<1x32xf32>
    %217 = vector.extract_strided_slice %214 {offsets = [0, 64], sizes = [1, 32], strides = [1, 1]} : vector<1x96xf32> to vector<1x32xf32>
    %218 = vector.extract_strided_slice %208 {offsets = [0, 96], sizes = [1, 32], strides = [1, 1]} : vector<1x128xf32> to vector<1x32xf32>
    %219 = math.tanh %218 : vector<1x32xf32>
    %220 = arith.mulf %216, %179 : vector<1x32xf32>
    %221 = arith.mulf %215, %219 : vector<1x32xf32>
    %222 = arith.addf %220, %221 : vector<1x32xf32>
    %223 = math.tanh %222 : vector<1x32xf32>
    %224 = arith.mulf %217, %223 : vector<1x32xf32>
    %225 = vector.extract_strided_slice %5 {offsets = [5, 0], sizes = [1, 256], strides = [1, 1]} : vector<8x256xf32> to vector<1x256xf32>
    %c0_74 = arith.constant 0 : index
    %c0_75 = arith.constant 0 : index
    %226 = vector.load %arg3[%c0_74, %c0_75] : memref<64x256xf32, #tpu.memory_space<vmem>>, vector<64x256xf32>
    %cst_76 = arith.constant dense<0.000000e+00> : vector<1x256xf32>
    %227 = tpu.matmul %201, %226, %cst_76 {dimension_numbers = #tpu.dot_dimension_numbers<[1], [0], [0], [1], [0, 0, 1, 1], [], []>} : vector<1x64xf32>, vector<64x256xf32>, vector<1x256xf32> -> vector<1x256xf32>
    %228 = arith.addf %225, %227 : vector<1x256xf32>
    %229 = vector.extract_strided_slice %228 {offsets = [0, 0], sizes = [1, 192], strides = [1, 1]} : vector<1x256xf32> to vector<1x192xf32>
    %230 = arith.negf %229 : vector<1x192xf32>
    %231 = math.exp %230 : vector<1x192xf32>
    %cst_77 = arith.constant 1.000000e+00 : f32
    %232 = vector.broadcast %cst_77 : f32 to vector<1x192xf32>
    %233 = arith.addf %232, %231 : vector<1x192xf32>
    %234 = arith.divf %232, %233 : vector<1x192xf32>
    %235 = vector.extract_strided_slice %234 {offsets = [0, 0], sizes = [1, 64], strides = [1, 1]} : vector<1x192xf32> to vector<1x64xf32>
    %236 = vector.extract_strided_slice %234 {offsets = [0, 64], sizes = [1, 64], strides = [1, 1]} : vector<1x192xf32> to vector<1x64xf32>
    %237 = vector.extract_strided_slice %234 {offsets = [0, 128], sizes = [1, 64], strides = [1, 1]} : vector<1x192xf32> to vector<1x64xf32>
    %238 = vector.extract_strided_slice %228 {offsets = [0, 192], sizes = [1, 64], strides = [1, 1]} : vector<1x256xf32> to vector<1x64xf32>
    %239 = math.tanh %238 : vector<1x64xf32>
    %240 = arith.mulf %236, %199 : vector<1x64xf32>
    %241 = arith.mulf %235, %239 : vector<1x64xf32>
    %242 = arith.addf %240, %241 : vector<1x64xf32>
    %243 = math.tanh %242 : vector<1x64xf32>
    %244 = arith.mulf %237, %243 : vector<1x64xf32>
    %c0_78 = arith.constant 0 : index
    %c0_79 = arith.constant 0 : index
    %245 = vector.load %arg5[%c0_78, %c0_79] : memref<64x128xf32, #tpu.memory_space<vmem>>, vector<64x128xf32>
    %cst_80 = arith.constant dense<0.000000e+00> : vector<1x128xf32>
    %246 = tpu.matmul %244, %245, %cst_80 {dimension_numbers = #tpu.dot_dimension_numbers<[1], [0], [0], [1], [0, 0, 1, 1], [], []>} : vector<1x64xf32>, vector<64x128xf32>, vector<1x128xf32> -> vector<1x128xf32>
    %c0_81 = arith.constant 0 : index
    %c0_82 = arith.constant 0 : index
    %247 = vector.load %arg7[%c0_81, %c0_82] : memref<1x128xf32, #tpu.memory_space<vmem>>, vector<1x128xf32>
    %248 = arith.addf %246, %247 : vector<1x128xf32>
    %c0_83 = arith.constant 0 : index
    %c0_84 = arith.constant 0 : index
    %249 = vector.load %arg6[%c0_83, %c0_84] : memref<32x128xf32, #tpu.memory_space<vmem>>, vector<32x128xf32>
    %cst_85 = arith.constant dense<0.000000e+00> : vector<1x128xf32>
    %250 = tpu.matmul %224, %249, %cst_85 {dimension_numbers = #tpu.dot_dimension_numbers<[1], [0], [0], [1], [0, 0, 1, 1], [], []>} : vector<1x32xf32>, vector<32x128xf32>, vector<1x128xf32> -> vector<1x128xf32>
    %251 = arith.addf %248, %250 : vector<1x128xf32>
    %252 = vector.extract_strided_slice %251 {offsets = [0, 0], sizes = [1, 96], strides = [1, 1]} : vector<1x128xf32> to vector<1x96xf32>
    %253 = arith.negf %252 : vector<1x96xf32>
    %254 = math.exp %253 : vector<1x96xf32>
    %cst_86 = arith.constant 1.000000e+00 : f32
    %255 = vector.broadcast %cst_86 : f32 to vector<1x96xf32>
    %256 = arith.addf %255, %254 : vector<1x96xf32>
    %257 = arith.divf %255, %256 : vector<1x96xf32>
    %258 = vector.extract_strided_slice %257 {offsets = [0, 0], sizes = [1, 32], strides = [1, 1]} : vector<1x96xf32> to vector<1x32xf32>
    %259 = vector.extract_strided_slice %257 {offsets = [0, 32], sizes = [1, 32], strides = [1, 1]} : vector<1x96xf32> to vector<1x32xf32>
    %260 = vector.extract_strided_slice %257 {offsets = [0, 64], sizes = [1, 32], strides = [1, 1]} : vector<1x96xf32> to vector<1x32xf32>
    %261 = vector.extract_strided_slice %251 {offsets = [0, 96], sizes = [1, 32], strides = [1, 1]} : vector<1x128xf32> to vector<1x32xf32>
    %262 = math.tanh %261 : vector<1x32xf32>
    %263 = arith.mulf %259, %222 : vector<1x32xf32>
    %264 = arith.mulf %258, %262 : vector<1x32xf32>
    %265 = arith.addf %263, %264 : vector<1x32xf32>
    %266 = math.tanh %265 : vector<1x32xf32>
    %267 = arith.mulf %260, %266 : vector<1x32xf32>
    %268 = vector.extract_strided_slice %5 {offsets = [6, 0], sizes = [1, 256], strides = [1, 1]} : vector<8x256xf32> to vector<1x256xf32>
    %c0_87 = arith.constant 0 : index
    %c0_88 = arith.constant 0 : index
    %269 = vector.load %arg3[%c0_87, %c0_88] : memref<64x256xf32, #tpu.memory_space<vmem>>, vector<64x256xf32>
    %cst_89 = arith.constant dense<0.000000e+00> : vector<1x256xf32>
    %270 = tpu.matmul %244, %269, %cst_89 {dimension_numbers = #tpu.dot_dimension_numbers<[1], [0], [0], [1], [0, 0, 1, 1], [], []>} : vector<1x64xf32>, vector<64x256xf32>, vector<1x256xf32> -> vector<1x256xf32>
    %271 = arith.addf %268, %270 : vector<1x256xf32>
    %272 = vector.extract_strided_slice %271 {offsets = [0, 0], sizes = [1, 192], strides = [1, 1]} : vector<1x256xf32> to vector<1x192xf32>
    %273 = arith.negf %272 : vector<1x192xf32>
    %274 = math.exp %273 : vector<1x192xf32>
    %cst_90 = arith.constant 1.000000e+00 : f32
    %275 = vector.broadcast %cst_90 : f32 to vector<1x192xf32>
    %276 = arith.addf %275, %274 : vector<1x192xf32>
    %277 = arith.divf %275, %276 : vector<1x192xf32>
    %278 = vector.extract_strided_slice %277 {offsets = [0, 0], sizes = [1, 64], strides = [1, 1]} : vector<1x192xf32> to vector<1x64xf32>
    %279 = vector.extract_strided_slice %277 {offsets = [0, 64], sizes = [1, 64], strides = [1, 1]} : vector<1x192xf32> to vector<1x64xf32>
    %280 = vector.extract_strided_slice %277 {offsets = [0, 128], sizes = [1, 64], strides = [1, 1]} : vector<1x192xf32> to vector<1x64xf32>
    %281 = vector.extract_strided_slice %271 {offsets = [0, 192], sizes = [1, 64], strides = [1, 1]} : vector<1x256xf32> to vector<1x64xf32>
    %282 = math.tanh %281 : vector<1x64xf32>
    %283 = arith.mulf %279, %242 : vector<1x64xf32>
    %284 = arith.mulf %278, %282 : vector<1x64xf32>
    %285 = arith.addf %283, %284 : vector<1x64xf32>
    %286 = math.tanh %285 : vector<1x64xf32>
    %287 = arith.mulf %280, %286 : vector<1x64xf32>
    %c0_91 = arith.constant 0 : index
    %c0_92 = arith.constant 0 : index
    %288 = vector.load %arg5[%c0_91, %c0_92] : memref<64x128xf32, #tpu.memory_space<vmem>>, vector<64x128xf32>
    %cst_93 = arith.constant dense<0.000000e+00> : vector<1x128xf32>
    %289 = tpu.matmul %287, %288, %cst_93 {dimension_numbers = #tpu.dot_dimension_numbers<[1], [0], [0], [1], [0, 0, 1, 1], [], []>} : vector<1x64xf32>, vector<64x128xf32>, vector<1x128xf32> -> vector<1x128xf32>
    %c0_94 = arith.constant 0 : index
    %c0_95 = arith.constant 0 : index
    %290 = vector.load %arg7[%c0_94, %c0_95] : memref<1x128xf32, #tpu.memory_space<vmem>>, vector<1x128xf32>
    %291 = arith.addf %289, %290 : vector<1x128xf32>
    %c0_96 = arith.constant 0 : index
    %c0_97 = arith.constant 0 : index
    %292 = vector.load %arg6[%c0_96, %c0_97] : memref<32x128xf32, #tpu.memory_space<vmem>>, vector<32x128xf32>
    %cst_98 = arith.constant dense<0.000000e+00> : vector<1x128xf32>
    %293 = tpu.matmul %267, %292, %cst_98 {dimension_numbers = #tpu.dot_dimension_numbers<[1], [0], [0], [1], [0, 0, 1, 1], [], []>} : vector<1x32xf32>, vector<32x128xf32>, vector<1x128xf32> -> vector<1x128xf32>
    %294 = arith.addf %291, %293 : vector<1x128xf32>
    %295 = vector.extract_strided_slice %294 {offsets = [0, 0], sizes = [1, 96], strides = [1, 1]} : vector<1x128xf32> to vector<1x96xf32>
    %296 = arith.negf %295 : vector<1x96xf32>
    %297 = math.exp %296 : vector<1x96xf32>
    %cst_99 = arith.constant 1.000000e+00 : f32
    %298 = vector.broadcast %cst_99 : f32 to vector<1x96xf32>
    %299 = arith.addf %298, %297 : vector<1x96xf32>
    %300 = arith.divf %298, %299 : vector<1x96xf32>
    %301 = vector.extract_strided_slice %300 {offsets = [0, 0], sizes = [1, 32], strides = [1, 1]} : vector<1x96xf32> to vector<1x32xf32>
    %302 = vector.extract_strided_slice %300 {offsets = [0, 32], sizes = [1, 32], strides = [1, 1]} : vector<1x96xf32> to vector<1x32xf32>
    %303 = vector.extract_strided_slice %300 {offsets = [0, 64], sizes = [1, 32], strides = [1, 1]} : vector<1x96xf32> to vector<1x32xf32>
    %304 = vector.extract_strided_slice %294 {offsets = [0, 96], sizes = [1, 32], strides = [1, 1]} : vector<1x128xf32> to vector<1x32xf32>
    %305 = math.tanh %304 : vector<1x32xf32>
    %306 = arith.mulf %302, %265 : vector<1x32xf32>
    %307 = arith.mulf %301, %305 : vector<1x32xf32>
    %308 = arith.addf %306, %307 : vector<1x32xf32>
    %309 = math.tanh %308 : vector<1x32xf32>
    %310 = arith.mulf %303, %309 : vector<1x32xf32>
    %311 = vector.extract_strided_slice %5 {offsets = [7, 0], sizes = [1, 256], strides = [1, 1]} : vector<8x256xf32> to vector<1x256xf32>
    %c0_100 = arith.constant 0 : index
    %c0_101 = arith.constant 0 : index
    %312 = vector.load %arg3[%c0_100, %c0_101] : memref<64x256xf32, #tpu.memory_space<vmem>>, vector<64x256xf32>
    %cst_102 = arith.constant dense<0.000000e+00> : vector<1x256xf32>
    %313 = tpu.matmul %287, %312, %cst_102 {dimension_numbers = #tpu.dot_dimension_numbers<[1], [0], [0], [1], [0, 0, 1, 1], [], []>} : vector<1x64xf32>, vector<64x256xf32>, vector<1x256xf32> -> vector<1x256xf32>
    %314 = arith.addf %311, %313 : vector<1x256xf32>
    %315 = vector.extract_strided_slice %314 {offsets = [0, 0], sizes = [1, 192], strides = [1, 1]} : vector<1x256xf32> to vector<1x192xf32>
    %316 = arith.negf %315 : vector<1x192xf32>
    %317 = math.exp %316 : vector<1x192xf32>
    %cst_103 = arith.constant 1.000000e+00 : f32
    %318 = vector.broadcast %cst_103 : f32 to vector<1x192xf32>
    %319 = arith.addf %318, %317 : vector<1x192xf32>
    %320 = arith.divf %318, %319 : vector<1x192xf32>
    %321 = vector.extract_strided_slice %320 {offsets = [0, 0], sizes = [1, 64], strides = [1, 1]} : vector<1x192xf32> to vector<1x64xf32>
    %322 = vector.extract_strided_slice %320 {offsets = [0, 64], sizes = [1, 64], strides = [1, 1]} : vector<1x192xf32> to vector<1x64xf32>
    %323 = vector.extract_strided_slice %320 {offsets = [0, 128], sizes = [1, 64], strides = [1, 1]} : vector<1x192xf32> to vector<1x64xf32>
    %324 = vector.extract_strided_slice %314 {offsets = [0, 192], sizes = [1, 64], strides = [1, 1]} : vector<1x256xf32> to vector<1x64xf32>
    %325 = math.tanh %324 : vector<1x64xf32>
    %326 = arith.mulf %322, %285 : vector<1x64xf32>
    %327 = arith.mulf %321, %325 : vector<1x64xf32>
    %328 = arith.addf %326, %327 : vector<1x64xf32>
    %329 = math.tanh %328 : vector<1x64xf32>
    %330 = arith.mulf %323, %329 : vector<1x64xf32>
    %c0_104 = arith.constant 0 : index
    %c0_105 = arith.constant 0 : index
    %331 = vector.load %arg5[%c0_104, %c0_105] : memref<64x128xf32, #tpu.memory_space<vmem>>, vector<64x128xf32>
    %cst_106 = arith.constant dense<0.000000e+00> : vector<1x128xf32>
    %332 = tpu.matmul %330, %331, %cst_106 {dimension_numbers = #tpu.dot_dimension_numbers<[1], [0], [0], [1], [0, 0, 1, 1], [], []>} : vector<1x64xf32>, vector<64x128xf32>, vector<1x128xf32> -> vector<1x128xf32>
    %c0_107 = arith.constant 0 : index
    %c0_108 = arith.constant 0 : index
    %333 = vector.load %arg7[%c0_107, %c0_108] : memref<1x128xf32, #tpu.memory_space<vmem>>, vector<1x128xf32>
    %334 = arith.addf %332, %333 : vector<1x128xf32>
    %c0_109 = arith.constant 0 : index
    %c0_110 = arith.constant 0 : index
    %335 = vector.load %arg6[%c0_109, %c0_110] : memref<32x128xf32, #tpu.memory_space<vmem>>, vector<32x128xf32>
    %cst_111 = arith.constant dense<0.000000e+00> : vector<1x128xf32>
    %336 = tpu.matmul %310, %335, %cst_111 {dimension_numbers = #tpu.dot_dimension_numbers<[1], [0], [0], [1], [0, 0, 1, 1], [], []>} : vector<1x32xf32>, vector<32x128xf32>, vector<1x128xf32> -> vector<1x128xf32>
    %337 = arith.addf %334, %336 : vector<1x128xf32>
    %338 = vector.extract_strided_slice %337 {offsets = [0, 0], sizes = [1, 96], strides = [1, 1]} : vector<1x128xf32> to vector<1x96xf32>
    %339 = arith.negf %338 : vector<1x96xf32>
    %340 = math.exp %339 : vector<1x96xf32>
    %cst_112 = arith.constant 1.000000e+00 : f32
    %341 = vector.broadcast %cst_112 : f32 to vector<1x96xf32>
    %342 = arith.addf %341, %340 : vector<1x96xf32>
    %343 = arith.divf %341, %342 : vector<1x96xf32>
    %344 = vector.extract_strided_slice %343 {offsets = [0, 0], sizes = [1, 32], strides = [1, 1]} : vector<1x96xf32> to vector<1x32xf32>
    %345 = vector.extract_strided_slice %343 {offsets = [0, 32], sizes = [1, 32], strides = [1, 1]} : vector<1x96xf32> to vector<1x32xf32>
    %346 = vector.extract_strided_slice %343 {offsets = [0, 64], sizes = [1, 32], strides = [1, 1]} : vector<1x96xf32> to vector<1x32xf32>
    %347 = vector.extract_strided_slice %337 {offsets = [0, 96], sizes = [1, 32], strides = [1, 1]} : vector<1x128xf32> to vector<1x32xf32>
    %348 = math.tanh %347 : vector<1x32xf32>
    %349 = arith.mulf %345, %308 : vector<1x32xf32>
    %350 = arith.mulf %344, %348 : vector<1x32xf32>
    %351 = arith.addf %349, %350 : vector<1x32xf32>
    %352 = math.tanh %351 : vector<1x32xf32>
    %353 = arith.mulf %346, %352 : vector<1x32xf32>
    %c0_113 = arith.constant 0 : index
    %c0_114 = arith.constant 0 : index
    %354 = vector.load %arg8[%c0_113, %c0_114] : memref<32x128xf32, #tpu.memory_space<vmem>>, vector<32x128xf32>
    %cst_115 = arith.constant dense<0.000000e+00> : vector<1x128xf32>
    %355 = tpu.matmul %353, %354, %cst_115 {dimension_numbers = #tpu.dot_dimension_numbers<[1], [0], [0], [1], [0, 0, 1, 1], [], []>} : vector<1x32xf32>, vector<32x128xf32>, vector<1x128xf32> -> vector<1x128xf32>
    %c0_116 = arith.constant 0 : index
    %c0_117 = arith.constant 0 : index
    %356 = vector.load %arg10[%c0_116, %c0_117] : memref<1x128xf32, #tpu.memory_space<vmem>>, vector<1x128xf32>
    %357 = arith.addf %355, %356 : vector<1x128xf32>
    %cst_118 = arith.constant 0.000000e+00 : f32
    %358 = vector.broadcast %cst_118 : f32 to vector<1x32xf32>
    %cst_119 = arith.constant 0.000000e+00 : f32
    %359 = vector.broadcast %cst_119 : f32 to vector<1x32xf32>
    %cst_120 = arith.constant 0.000000e+00 : f32
    %360 = vector.broadcast %cst_120 : f32 to vector<1x64xf32>
    %cst_121 = arith.constant 0.000000e+00 : f32
    %361 = vector.broadcast %cst_121 : f32 to vector<1x64xf32>
    %c0_122 = arith.constant 0 : index
    %c0_123 = arith.constant 0 : index
    %362 = vector.load %arg9[%c0_122, %c0_123] : memref<32x128xf32, #tpu.memory_space<vmem>>, vector<32x128xf32>
    %cst_124 = arith.constant dense<0.000000e+00> : vector<1x128xf32>
    %363 = tpu.matmul %358, %362, %cst_124 {dimension_numbers = #tpu.dot_dimension_numbers<[1], [0], [0], [1], [0, 0, 1, 1], [], []>} : vector<1x32xf32>, vector<32x128xf32>, vector<1x128xf32> -> vector<1x128xf32>
    %364 = arith.addf %357, %363 : vector<1x128xf32>
    %365 = vector.extract_strided_slice %364 {offsets = [0, 0], sizes = [1, 96], strides = [1, 1]} : vector<1x128xf32> to vector<1x96xf32>
    %366 = arith.negf %365 : vector<1x96xf32>
    %367 = math.exp %366 : vector<1x96xf32>
    %cst_125 = arith.constant 1.000000e+00 : f32
    %368 = vector.broadcast %cst_125 : f32 to vector<1x96xf32>
    %369 = arith.addf %368, %367 : vector<1x96xf32>
    %370 = arith.divf %368, %369 : vector<1x96xf32>
    %371 = vector.extract_strided_slice %370 {offsets = [0, 0], sizes = [1, 32], strides = [1, 1]} : vector<1x96xf32> to vector<1x32xf32>
    %372 = vector.extract_strided_slice %370 {offsets = [0, 32], sizes = [1, 32], strides = [1, 1]} : vector<1x96xf32> to vector<1x32xf32>
    %373 = vector.extract_strided_slice %370 {offsets = [0, 64], sizes = [1, 32], strides = [1, 1]} : vector<1x96xf32> to vector<1x32xf32>
    %374 = vector.extract_strided_slice %364 {offsets = [0, 96], sizes = [1, 32], strides = [1, 1]} : vector<1x128xf32> to vector<1x32xf32>
    %375 = math.tanh %374 : vector<1x32xf32>
    %376 = arith.mulf %372, %359 : vector<1x32xf32>
    %377 = arith.mulf %371, %375 : vector<1x32xf32>
    %378 = arith.addf %376, %377 : vector<1x32xf32>
    %379 = math.tanh %378 : vector<1x32xf32>
    %380 = arith.mulf %373, %379 : vector<1x32xf32>
    %c0_126 = arith.constant 0 : index
    %c0_127 = arith.constant 0 : index
    %381 = vector.load %arg11[%c0_126, %c0_127] : memref<32x256xf32, #tpu.memory_space<vmem>>, vector<32x256xf32>
    %cst_128 = arith.constant dense<0.000000e+00> : vector<1x256xf32>
    %382 = tpu.matmul %380, %381, %cst_128 {dimension_numbers = #tpu.dot_dimension_numbers<[1], [0], [0], [1], [0, 0, 1, 1], [], []>} : vector<1x32xf32>, vector<32x256xf32>, vector<1x256xf32> -> vector<1x256xf32>
    %c0_129 = arith.constant 0 : index
    %c0_130 = arith.constant 0 : index
    %383 = vector.load %arg13[%c0_129, %c0_130] : memref<1x256xf32, #tpu.memory_space<vmem>>, vector<1x256xf32>
    %384 = arith.addf %382, %383 : vector<1x256xf32>
    %c0_131 = arith.constant 0 : index
    %c0_132 = arith.constant 0 : index
    %385 = vector.load %arg12[%c0_131, %c0_132] : memref<64x256xf32, #tpu.memory_space<vmem>>, vector<64x256xf32>
    %cst_133 = arith.constant dense<0.000000e+00> : vector<1x256xf32>
    %386 = tpu.matmul %360, %385, %cst_133 {dimension_numbers = #tpu.dot_dimension_numbers<[1], [0], [0], [1], [0, 0, 1, 1], [], []>} : vector<1x64xf32>, vector<64x256xf32>, vector<1x256xf32> -> vector<1x256xf32>
    %387 = arith.addf %384, %386 : vector<1x256xf32>
    %388 = vector.extract_strided_slice %387 {offsets = [0, 0], sizes = [1, 192], strides = [1, 1]} : vector<1x256xf32> to vector<1x192xf32>
    %389 = arith.negf %388 : vector<1x192xf32>
    %390 = math.exp %389 : vector<1x192xf32>
    %cst_134 = arith.constant 1.000000e+00 : f32
    %391 = vector.broadcast %cst_134 : f32 to vector<1x192xf32>
    %392 = arith.addf %391, %390 : vector<1x192xf32>
    %393 = arith.divf %391, %392 : vector<1x192xf32>
    %394 = vector.extract_strided_slice %393 {offsets = [0, 0], sizes = [1, 64], strides = [1, 1]} : vector<1x192xf32> to vector<1x64xf32>
    %395 = vector.extract_strided_slice %393 {offsets = [0, 64], sizes = [1, 64], strides = [1, 1]} : vector<1x192xf32> to vector<1x64xf32>
    %396 = vector.extract_strided_slice %393 {offsets = [0, 128], sizes = [1, 64], strides = [1, 1]} : vector<1x192xf32> to vector<1x64xf32>
    %397 = vector.extract_strided_slice %387 {offsets = [0, 192], sizes = [1, 64], strides = [1, 1]} : vector<1x256xf32> to vector<1x64xf32>
    %398 = math.tanh %397 : vector<1x64xf32>
    %399 = arith.mulf %395, %361 : vector<1x64xf32>
    %400 = arith.mulf %394, %398 : vector<1x64xf32>
    %401 = arith.addf %399, %400 : vector<1x64xf32>
    %402 = math.tanh %401 : vector<1x64xf32>
    %403 = arith.mulf %396, %402 : vector<1x64xf32>
    %c0_135 = arith.constant 0 : index
    %c0_136 = arith.constant 0 : index
    %404 = vector.load %arg17[%c0_135, %c0_136] : memref<8x64xf32, #tpu.memory_space<vmem>>, vector<1x64xf32>
    tpu.vector_store %arg17[%c0_135, %c0_136], %403 {strides = array<i32>} : memref<8x64xf32, #tpu.memory_space<vmem>>, vector<1x64xf32>,
    %c0_137 = arith.constant 0 : index
    %c0_138 = arith.constant 0 : index
    %405 = vector.load %arg9[%c0_137, %c0_138] : memref<32x128xf32, #tpu.memory_space<vmem>>, vector<32x128xf32>
    %cst_139 = arith.constant dense<0.000000e+00> : vector<1x128xf32>
    %406 = tpu.matmul %380, %405, %cst_139 {dimension_numbers = #tpu.dot_dimension_numbers<[1], [0], [0], [1], [0, 0, 1, 1], [], []>} : vector<1x32xf32>, vector<32x128xf32>, vector<1x128xf32> -> vector<1x128xf32>
    %407 = arith.addf %357, %406 : vector<1x128xf32>
    %408 = vector.extract_strided_slice %407 {offsets = [0, 0], sizes = [1, 96], strides = [1, 1]} : vector<1x128xf32> to vector<1x96xf32>
    %409 = arith.negf %408 : vector<1x96xf32>
    %410 = math.exp %409 : vector<1x96xf32>
    %cst_140 = arith.constant 1.000000e+00 : f32
    %411 = vector.broadcast %cst_140 : f32 to vector<1x96xf32>
    %412 = arith.addf %411, %410 : vector<1x96xf32>
    %413 = arith.divf %411, %412 : vector<1x96xf32>
    %414 = vector.extract_strided_slice %413 {offsets = [0, 0], sizes = [1, 32], strides = [1, 1]} : vector<1x96xf32> to vector<1x32xf32>
    %415 = vector.extract_strided_slice %413 {offsets = [0, 32], sizes = [1, 32], strides = [1, 1]} : vector<1x96xf32> to vector<1x32xf32>
    %416 = vector.extract_strided_slice %413 {offsets = [0, 64], sizes = [1, 32], strides = [1, 1]} : vector<1x96xf32> to vector<1x32xf32>
    %417 = vector.extract_strided_slice %407 {offsets = [0, 96], sizes = [1, 32], strides = [1, 1]} : vector<1x128xf32> to vector<1x32xf32>
    %418 = math.tanh %417 : vector<1x32xf32>
    %419 = arith.mulf %415, %378 : vector<1x32xf32>
    %420 = arith.mulf %414, %418 : vector<1x32xf32>
    %421 = arith.addf %419, %420 : vector<1x32xf32>
    %422 = math.tanh %421 : vector<1x32xf32>
    %423 = arith.mulf %416, %422 : vector<1x32xf32>
    %c0_141 = arith.constant 0 : index
    %c0_142 = arith.constant 0 : index
    %424 = vector.load %arg11[%c0_141, %c0_142] : memref<32x256xf32, #tpu.memory_space<vmem>>, vector<32x256xf32>
    %cst_143 = arith.constant dense<0.000000e+00> : vector<1x256xf32>
    %425 = tpu.matmul %423, %424, %cst_143 {dimension_numbers = #tpu.dot_dimension_numbers<[1], [0], [0], [1], [0, 0, 1, 1], [], []>} : vector<1x32xf32>, vector<32x256xf32>, vector<1x256xf32> -> vector<1x256xf32>
    %c0_144 = arith.constant 0 : index
    %c0_145 = arith.constant 0 : index
    %426 = vector.load %arg13[%c0_144, %c0_145] : memref<1x256xf32, #tpu.memory_space<vmem>>, vector<1x256xf32>
    %427 = arith.addf %425, %426 : vector<1x256xf32>
    %c0_146 = arith.constant 0 : index
    %c0_147 = arith.constant 0 : index
    %428 = vector.load %arg12[%c0_146, %c0_147] : memref<64x256xf32, #tpu.memory_space<vmem>>, vector<64x256xf32>
    %cst_148 = arith.constant dense<0.000000e+00> : vector<1x256xf32>
    %429 = tpu.matmul %403, %428, %cst_148 {dimension_numbers = #tpu.dot_dimension_numbers<[1], [0], [0], [1], [0, 0, 1, 1], [], []>} : vector<1x64xf32>, vector<64x256xf32>, vector<1x256xf32> -> vector<1x256xf32>
    %430 = arith.addf %427, %429 : vector<1x256xf32>
    %431 = vector.extract_strided_slice %430 {offsets = [0, 0], sizes = [1, 192], strides = [1, 1]} : vector<1x256xf32> to vector<1x192xf32>
    %432 = arith.negf %431 : vector<1x192xf32>
    %433 = math.exp %432 : vector<1x192xf32>
    %cst_149 = arith.constant 1.000000e+00 : f32
    %434 = vector.broadcast %cst_149 : f32 to vector<1x192xf32>
    %435 = arith.addf %434, %433 : vector<1x192xf32>
    %436 = arith.divf %434, %435 : vector<1x192xf32>
    %437 = vector.extract_strided_slice %436 {offsets = [0, 0], sizes = [1, 64], strides = [1, 1]} : vector<1x192xf32> to vector<1x64xf32>
    %438 = vector.extract_strided_slice %436 {offsets = [0, 64], sizes = [1, 64], strides = [1, 1]} : vector<1x192xf32> to vector<1x64xf32>
    %439 = vector.extract_strided_slice %436 {offsets = [0, 128], sizes = [1, 64], strides = [1, 1]} : vector<1x192xf32> to vector<1x64xf32>
    %440 = vector.extract_strided_slice %430 {offsets = [0, 192], sizes = [1, 64], strides = [1, 1]} : vector<1x256xf32> to vector<1x64xf32>
    %441 = math.tanh %440 : vector<1x64xf32>
    %442 = arith.mulf %438, %401 : vector<1x64xf32>
    %443 = arith.mulf %437, %441 : vector<1x64xf32>
    %444 = arith.addf %442, %443 : vector<1x64xf32>
    %445 = math.tanh %444 : vector<1x64xf32>
    %446 = arith.mulf %439, %445 : vector<1x64xf32>
    %c1 = arith.constant 1 : index
    %c0_150 = arith.constant 0 : index
    %447 = vector.load %arg17[%c1, %c0_150] : memref<8x64xf32, #tpu.memory_space<vmem>>, vector<1x64xf32>
    tpu.vector_store %arg17[%c1, %c0_150], %446 {strides = array<i32>} : memref<8x64xf32, #tpu.memory_space<vmem>>, vector<1x64xf32>,
    %c0_151 = arith.constant 0 : index
    %c0_152 = arith.constant 0 : index
    %448 = vector.load %arg9[%c0_151, %c0_152] : memref<32x128xf32, #tpu.memory_space<vmem>>, vector<32x128xf32>
    %cst_153 = arith.constant dense<0.000000e+00> : vector<1x128xf32>
    %449 = tpu.matmul %423, %448, %cst_153 {dimension_numbers = #tpu.dot_dimension_numbers<[1], [0], [0], [1], [0, 0, 1, 1], [], []>} : vector<1x32xf32>, vector<32x128xf32>, vector<1x128xf32> -> vector<1x128xf32>
    %450 = arith.addf %357, %449 : vector<1x128xf32>
    %451 = vector.extract_strided_slice %450 {offsets = [0, 0], sizes = [1, 96], strides = [1, 1]} : vector<1x128xf32> to vector<1x96xf32>
    %452 = arith.negf %451 : vector<1x96xf32>
    %453 = math.exp %452 : vector<1x96xf32>
    %cst_154 = arith.constant 1.000000e+00 : f32
    %454 = vector.broadcast %cst_154 : f32 to vector<1x96xf32>
    %455 = arith.addf %454, %453 : vector<1x96xf32>
    %456 = arith.divf %454, %455 : vector<1x96xf32>
    %457 = vector.extract_strided_slice %456 {offsets = [0, 0], sizes = [1, 32], strides = [1, 1]} : vector<1x96xf32> to vector<1x32xf32>
    %458 = vector.extract_strided_slice %456 {offsets = [0, 32], sizes = [1, 32], strides = [1, 1]} : vector<1x96xf32> to vector<1x32xf32>
    %459 = vector.extract_strided_slice %456 {offsets = [0, 64], sizes = [1, 32], strides = [1, 1]} : vector<1x96xf32> to vector<1x32xf32>
    %460 = vector.extract_strided_slice %450 {offsets = [0, 96], sizes = [1, 32], strides = [1, 1]} : vector<1x128xf32> to vector<1x32xf32>
    %461 = math.tanh %460 : vector<1x32xf32>
    %462 = arith.mulf %458, %421 : vector<1x32xf32>
    %463 = arith.mulf %457, %461 : vector<1x32xf32>
    %464 = arith.addf %462, %463 : vector<1x32xf32>
    %465 = math.tanh %464 : vector<1x32xf32>
    %466 = arith.mulf %459, %465 : vector<1x32xf32>
    %c0_155 = arith.constant 0 : index
    %c0_156 = arith.constant 0 : index
    %467 = vector.load %arg11[%c0_155, %c0_156] : memref<32x256xf32, #tpu.memory_space<vmem>>, vector<32x256xf32>
    %cst_157 = arith.constant dense<0.000000e+00> : vector<1x256xf32>
    %468 = tpu.matmul %466, %467, %cst_157 {dimension_numbers = #tpu.dot_dimension_numbers<[1], [0], [0], [1], [0, 0, 1, 1], [], []>} : vector<1x32xf32>, vector<32x256xf32>, vector<1x256xf32> -> vector<1x256xf32>
    %c0_158 = arith.constant 0 : index
    %c0_159 = arith.constant 0 : index
    %469 = vector.load %arg13[%c0_158, %c0_159] : memref<1x256xf32, #tpu.memory_space<vmem>>, vector<1x256xf32>
    %470 = arith.addf %468, %469 : vector<1x256xf32>
    %c0_160 = arith.constant 0 : index
    %c0_161 = arith.constant 0 : index
    %471 = vector.load %arg12[%c0_160, %c0_161] : memref<64x256xf32, #tpu.memory_space<vmem>>, vector<64x256xf32>
    %cst_162 = arith.constant dense<0.000000e+00> : vector<1x256xf32>
    %472 = tpu.matmul %446, %471, %cst_162 {dimension_numbers = #tpu.dot_dimension_numbers<[1], [0], [0], [1], [0, 0, 1, 1], [], []>} : vector<1x64xf32>, vector<64x256xf32>, vector<1x256xf32> -> vector<1x256xf32>
    %473 = arith.addf %470, %472 : vector<1x256xf32>
    %474 = vector.extract_strided_slice %473 {offsets = [0, 0], sizes = [1, 192], strides = [1, 1]} : vector<1x256xf32> to vector<1x192xf32>
    %475 = arith.negf %474 : vector<1x192xf32>
    %476 = math.exp %475 : vector<1x192xf32>
    %cst_163 = arith.constant 1.000000e+00 : f32
    %477 = vector.broadcast %cst_163 : f32 to vector<1x192xf32>
    %478 = arith.addf %477, %476 : vector<1x192xf32>
    %479 = arith.divf %477, %478 : vector<1x192xf32>
    %480 = vector.extract_strided_slice %479 {offsets = [0, 0], sizes = [1, 64], strides = [1, 1]} : vector<1x192xf32> to vector<1x64xf32>
    %481 = vector.extract_strided_slice %479 {offsets = [0, 64], sizes = [1, 64], strides = [1, 1]} : vector<1x192xf32> to vector<1x64xf32>
    %482 = vector.extract_strided_slice %479 {offsets = [0, 128], sizes = [1, 64], strides = [1, 1]} : vector<1x192xf32> to vector<1x64xf32>
    %483 = vector.extract_strided_slice %473 {offsets = [0, 192], sizes = [1, 64], strides = [1, 1]} : vector<1x256xf32> to vector<1x64xf32>
    %484 = math.tanh %483 : vector<1x64xf32>
    %485 = arith.mulf %481, %444 : vector<1x64xf32>
    %486 = arith.mulf %480, %484 : vector<1x64xf32>
    %487 = arith.addf %485, %486 : vector<1x64xf32>
    %488 = math.tanh %487 : vector<1x64xf32>
    %489 = arith.mulf %482, %488 : vector<1x64xf32>
    %c2 = arith.constant 2 : index
    %c0_164 = arith.constant 0 : index
    %490 = vector.load %arg17[%c2, %c0_164] : memref<8x64xf32, #tpu.memory_space<vmem>>, vector<1x64xf32>
    tpu.vector_store %arg17[%c2, %c0_164], %489 {strides = array<i32>} : memref<8x64xf32, #tpu.memory_space<vmem>>, vector<1x64xf32>,
    %c0_165 = arith.constant 0 : index
    %c0_166 = arith.constant 0 : index
    %491 = vector.load %arg9[%c0_165, %c0_166] : memref<32x128xf32, #tpu.memory_space<vmem>>, vector<32x128xf32>
    %cst_167 = arith.constant dense<0.000000e+00> : vector<1x128xf32>
    %492 = tpu.matmul %466, %491, %cst_167 {dimension_numbers = #tpu.dot_dimension_numbers<[1], [0], [0], [1], [0, 0, 1, 1], [], []>} : vector<1x32xf32>, vector<32x128xf32>, vector<1x128xf32> -> vector<1x128xf32>
    %493 = arith.addf %357, %492 : vector<1x128xf32>
    %494 = vector.extract_strided_slice %493 {offsets = [0, 0], sizes = [1, 96], strides = [1, 1]} : vector<1x128xf32> to vector<1x96xf32>
    %495 = arith.negf %494 : vector<1x96xf32>
    %496 = math.exp %495 : vector<1x96xf32>
    %cst_168 = arith.constant 1.000000e+00 : f32
    %497 = vector.broadcast %cst_168 : f32 to vector<1x96xf32>
    %498 = arith.addf %497, %496 : vector<1x96xf32>
    %499 = arith.divf %497, %498 : vector<1x96xf32>
    %500 = vector.extract_strided_slice %499 {offsets = [0, 0], sizes = [1, 32], strides = [1, 1]} : vector<1x96xf32> to vector<1x32xf32>
    %501 = vector.extract_strided_slice %499 {offsets = [0, 32], sizes = [1, 32], strides = [1, 1]} : vector<1x96xf32> to vector<1x32xf32>
    %502 = vector.extract_strided_slice %499 {offsets = [0, 64], sizes = [1, 32], strides = [1, 1]} : vector<1x96xf32> to vector<1x32xf32>
    %503 = vector.extract_strided_slice %493 {offsets = [0, 96], sizes = [1, 32], strides = [1, 1]} : vector<1x128xf32> to vector<1x32xf32>
    %504 = math.tanh %503 : vector<1x32xf32>
    %505 = arith.mulf %501, %464 : vector<1x32xf32>
    %506 = arith.mulf %500, %504 : vector<1x32xf32>
    %507 = arith.addf %505, %506 : vector<1x32xf32>
    %508 = math.tanh %507 : vector<1x32xf32>
    %509 = arith.mulf %502, %508 : vector<1x32xf32>
    %c0_169 = arith.constant 0 : index
    %c0_170 = arith.constant 0 : index
    %510 = vector.load %arg11[%c0_169, %c0_170] : memref<32x256xf32, #tpu.memory_space<vmem>>, vector<32x256xf32>
    %cst_171 = arith.constant dense<0.000000e+00> : vector<1x256xf32>
    %511 = tpu.matmul %509, %510, %cst_171 {dimension_numbers = #tpu.dot_dimension_numbers<[1], [0], [0], [1], [0, 0, 1, 1], [], []>} : vector<1x32xf32>, vector<32x256xf32>, vector<1x256xf32> -> vector<1x256xf32>
    %c0_172 = arith.constant 0 : index
    %c0_173 = arith.constant 0 : index
    %512 = vector.load %arg13[%c0_172, %c0_173] : memref<1x256xf32, #tpu.memory_space<vmem>>, vector<1x256xf32>
    %513 = arith.addf %511, %512 : vector<1x256xf32>
    %c0_174 = arith.constant 0 : index
    %c0_175 = arith.constant 0 : index
    %514 = vector.load %arg12[%c0_174, %c0_175] : memref<64x256xf32, #tpu.memory_space<vmem>>, vector<64x256xf32>
    %cst_176 = arith.constant dense<0.000000e+00> : vector<1x256xf32>
    %515 = tpu.matmul %489, %514, %cst_176 {dimension_numbers = #tpu.dot_dimension_numbers<[1], [0], [0], [1], [0, 0, 1, 1], [], []>} : vector<1x64xf32>, vector<64x256xf32>, vector<1x256xf32> -> vector<1x256xf32>
    %516 = arith.addf %513, %515 : vector<1x256xf32>
    %517 = vector.extract_strided_slice %516 {offsets = [0, 0], sizes = [1, 192], strides = [1, 1]} : vector<1x256xf32> to vector<1x192xf32>
    %518 = arith.negf %517 : vector<1x192xf32>
    %519 = math.exp %518 : vector<1x192xf32>
    %cst_177 = arith.constant 1.000000e+00 : f32
    %520 = vector.broadcast %cst_177 : f32 to vector<1x192xf32>
    %521 = arith.addf %520, %519 : vector<1x192xf32>
    %522 = arith.divf %520, %521 : vector<1x192xf32>
    %523 = vector.extract_strided_slice %522 {offsets = [0, 0], sizes = [1, 64], strides = [1, 1]} : vector<1x192xf32> to vector<1x64xf32>
    %524 = vector.extract_strided_slice %522 {offsets = [0, 64], sizes = [1, 64], strides = [1, 1]} : vector<1x192xf32> to vector<1x64xf32>
    %525 = vector.extract_strided_slice %522 {offsets = [0, 128], sizes = [1, 64], strides = [1, 1]} : vector<1x192xf32> to vector<1x64xf32>
    %526 = vector.extract_strided_slice %516 {offsets = [0, 192], sizes = [1, 64], strides = [1, 1]} : vector<1x256xf32> to vector<1x64xf32>
    %527 = math.tanh %526 : vector<1x64xf32>
    %528 = arith.mulf %524, %487 : vector<1x64xf32>
    %529 = arith.mulf %523, %527 : vector<1x64xf32>
    %530 = arith.addf %528, %529 : vector<1x64xf32>
    %531 = math.tanh %530 : vector<1x64xf32>
    %532 = arith.mulf %525, %531 : vector<1x64xf32>
    %c3 = arith.constant 3 : index
    %c0_178 = arith.constant 0 : index
    %533 = vector.load %arg17[%c3, %c0_178] : memref<8x64xf32, #tpu.memory_space<vmem>>, vector<1x64xf32>
    tpu.vector_store %arg17[%c3, %c0_178], %532 {strides = array<i32>} : memref<8x64xf32, #tpu.memory_space<vmem>>, vector<1x64xf32>,
    %c0_179 = arith.constant 0 : index
    %c0_180 = arith.constant 0 : index
    %534 = vector.load %arg9[%c0_179, %c0_180] : memref<32x128xf32, #tpu.memory_space<vmem>>, vector<32x128xf32>
    %cst_181 = arith.constant dense<0.000000e+00> : vector<1x128xf32>
    %535 = tpu.matmul %509, %534, %cst_181 {dimension_numbers = #tpu.dot_dimension_numbers<[1], [0], [0], [1], [0, 0, 1, 1], [], []>} : vector<1x32xf32>, vector<32x128xf32>, vector<1x128xf32> -> vector<1x128xf32>
    %536 = arith.addf %357, %535 : vector<1x128xf32>
    %537 = vector.extract_strided_slice %536 {offsets = [0, 0], sizes = [1, 96], strides = [1, 1]} : vector<1x128xf32> to vector<1x96xf32>
    %538 = arith.negf %537 : vector<1x96xf32>
    %539 = math.exp %538 : vector<1x96xf32>
    %cst_182 = arith.constant 1.000000e+00 : f32
    %540 = vector.broadcast %cst_182 : f32 to vector<1x96xf32>
    %541 = arith.addf %540, %539 : vector<1x96xf32>
    %542 = arith.divf %540, %541 : vector<1x96xf32>
    %543 = vector.extract_strided_slice %542 {offsets = [0, 0], sizes = [1, 32], strides = [1, 1]} : vector<1x96xf32> to vector<1x32xf32>
    %544 = vector.extract_strided_slice %542 {offsets = [0, 32], sizes = [1, 32], strides = [1, 1]} : vector<1x96xf32> to vector<1x32xf32>
    %545 = vector.extract_strided_slice %542 {offsets = [0, 64], sizes = [1, 32], strides = [1, 1]} : vector<1x96xf32> to vector<1x32xf32>
    %546 = vector.extract_strided_slice %536 {offsets = [0, 96], sizes = [1, 32], strides = [1, 1]} : vector<1x128xf32> to vector<1x32xf32>
    %547 = math.tanh %546 : vector<1x32xf32>
    %548 = arith.mulf %544, %507 : vector<1x32xf32>
    %549 = arith.mulf %543, %547 : vector<1x32xf32>
    %550 = arith.addf %548, %549 : vector<1x32xf32>
    %551 = math.tanh %550 : vector<1x32xf32>
    %552 = arith.mulf %545, %551 : vector<1x32xf32>
    %c0_183 = arith.constant 0 : index
    %c0_184 = arith.constant 0 : index
    %553 = vector.load %arg11[%c0_183, %c0_184] : memref<32x256xf32, #tpu.memory_space<vmem>>, vector<32x256xf32>
    %cst_185 = arith.constant dense<0.000000e+00> : vector<1x256xf32>
    %554 = tpu.matmul %552, %553, %cst_185 {dimension_numbers = #tpu.dot_dimension_numbers<[1], [0], [0], [1], [0, 0, 1, 1], [], []>} : vector<1x32xf32>, vector<32x256xf32>, vector<1x256xf32> -> vector<1x256xf32>
    %c0_186 = arith.constant 0 : index
    %c0_187 = arith.constant 0 : index
    %555 = vector.load %arg13[%c0_186, %c0_187] : memref<1x256xf32, #tpu.memory_space<vmem>>, vector<1x256xf32>
    %556 = arith.addf %554, %555 : vector<1x256xf32>
    %c0_188 = arith.constant 0 : index
    %c0_189 = arith.constant 0 : index
    %557 = vector.load %arg12[%c0_188, %c0_189] : memref<64x256xf32, #tpu.memory_space<vmem>>, vector<64x256xf32>
    %cst_190 = arith.constant dense<0.000000e+00> : vector<1x256xf32>
    %558 = tpu.matmul %532, %557, %cst_190 {dimension_numbers = #tpu.dot_dimension_numbers<[1], [0], [0], [1], [0, 0, 1, 1], [], []>} : vector<1x64xf32>, vector<64x256xf32>, vector<1x256xf32> -> vector<1x256xf32>
    %559 = arith.addf %556, %558 : vector<1x256xf32>
    %560 = vector.extract_strided_slice %559 {offsets = [0, 0], sizes = [1, 192], strides = [1, 1]} : vector<1x256xf32> to vector<1x192xf32>
    %561 = arith.negf %560 : vector<1x192xf32>
    %562 = math.exp %561 : vector<1x192xf32>
    %cst_191 = arith.constant 1.000000e+00 : f32
    %563 = vector.broadcast %cst_191 : f32 to vector<1x192xf32>
    %564 = arith.addf %563, %562 : vector<1x192xf32>
    %565 = arith.divf %563, %564 : vector<1x192xf32>
    %566 = vector.extract_strided_slice %565 {offsets = [0, 0], sizes = [1, 64], strides = [1, 1]} : vector<1x192xf32> to vector<1x64xf32>
    %567 = vector.extract_strided_slice %565 {offsets = [0, 64], sizes = [1, 64], strides = [1, 1]} : vector<1x192xf32> to vector<1x64xf32>
    %568 = vector.extract_strided_slice %565 {offsets = [0, 128], sizes = [1, 64], strides = [1, 1]} : vector<1x192xf32> to vector<1x64xf32>
    %569 = vector.extract_strided_slice %559 {offsets = [0, 192], sizes = [1, 64], strides = [1, 1]} : vector<1x256xf32> to vector<1x64xf32>
    %570 = math.tanh %569 : vector<1x64xf32>
    %571 = arith.mulf %567, %530 : vector<1x64xf32>
    %572 = arith.mulf %566, %570 : vector<1x64xf32>
    %573 = arith.addf %571, %572 : vector<1x64xf32>
    %574 = math.tanh %573 : vector<1x64xf32>
    %575 = arith.mulf %568, %574 : vector<1x64xf32>
    %c4 = arith.constant 4 : index
    %c0_192 = arith.constant 0 : index
    %576 = vector.load %arg17[%c4, %c0_192] : memref<8x64xf32, #tpu.memory_space<vmem>>, vector<1x64xf32>
    tpu.vector_store %arg17[%c4, %c0_192], %575 {strides = array<i32>} : memref<8x64xf32, #tpu.memory_space<vmem>>, vector<1x64xf32>,
    %c0_193 = arith.constant 0 : index
    %c0_194 = arith.constant 0 : index
    %577 = vector.load %arg9[%c0_193, %c0_194] : memref<32x128xf32, #tpu.memory_space<vmem>>, vector<32x128xf32>
    %cst_195 = arith.constant dense<0.000000e+00> : vector<1x128xf32>
    %578 = tpu.matmul %552, %577, %cst_195 {dimension_numbers = #tpu.dot_dimension_numbers<[1], [0], [0], [1], [0, 0, 1, 1], [], []>} : vector<1x32xf32>, vector<32x128xf32>, vector<1x128xf32> -> vector<1x128xf32>
    %579 = arith.addf %357, %578 : vector<1x128xf32>
    %580 = vector.extract_strided_slice %579 {offsets = [0, 0], sizes = [1, 96], strides = [1, 1]} : vector<1x128xf32> to vector<1x96xf32>
    %581 = arith.negf %580 : vector<1x96xf32>
    %582 = math.exp %581 : vector<1x96xf32>
    %cst_196 = arith.constant 1.000000e+00 : f32
    %583 = vector.broadcast %cst_196 : f32 to vector<1x96xf32>
    %584 = arith.addf %583, %582 : vector<1x96xf32>
    %585 = arith.divf %583, %584 : vector<1x96xf32>
    %586 = vector.extract_strided_slice %585 {offsets = [0, 0], sizes = [1, 32], strides = [1, 1]} : vector<1x96xf32> to vector<1x32xf32>
    %587 = vector.extract_strided_slice %585 {offsets = [0, 32], sizes = [1, 32], strides = [1, 1]} : vector<1x96xf32> to vector<1x32xf32>
    %588 = vector.extract_strided_slice %585 {offsets = [0, 64], sizes = [1, 32], strides = [1, 1]} : vector<1x96xf32> to vector<1x32xf32>
    %589 = vector.extract_strided_slice %579 {offsets = [0, 96], sizes = [1, 32], strides = [1, 1]} : vector<1x128xf32> to vector<1x32xf32>
    %590 = math.tanh %589 : vector<1x32xf32>
    %591 = arith.mulf %587, %550 : vector<1x32xf32>
    %592 = arith.mulf %586, %590 : vector<1x32xf32>
    %593 = arith.addf %591, %592 : vector<1x32xf32>
    %594 = math.tanh %593 : vector<1x32xf32>
    %595 = arith.mulf %588, %594 : vector<1x32xf32>
    %c0_197 = arith.constant 0 : index
    %c0_198 = arith.constant 0 : index
    %596 = vector.load %arg11[%c0_197, %c0_198] : memref<32x256xf32, #tpu.memory_space<vmem>>, vector<32x256xf32>
    %cst_199 = arith.constant dense<0.000000e+00> : vector<1x256xf32>
    %597 = tpu.matmul %595, %596, %cst_199 {dimension_numbers = #tpu.dot_dimension_numbers<[1], [0], [0], [1], [0, 0, 1, 1], [], []>} : vector<1x32xf32>, vector<32x256xf32>, vector<1x256xf32> -> vector<1x256xf32>
    %c0_200 = arith.constant 0 : index
    %c0_201 = arith.constant 0 : index
    %598 = vector.load %arg13[%c0_200, %c0_201] : memref<1x256xf32, #tpu.memory_space<vmem>>, vector<1x256xf32>
    %599 = arith.addf %597, %598 : vector<1x256xf32>
    %c0_202 = arith.constant 0 : index
    %c0_203 = arith.constant 0 : index
    %600 = vector.load %arg12[%c0_202, %c0_203] : memref<64x256xf32, #tpu.memory_space<vmem>>, vector<64x256xf32>
    %cst_204 = arith.constant dense<0.000000e+00> : vector<1x256xf32>
    %601 = tpu.matmul %575, %600, %cst_204 {dimension_numbers = #tpu.dot_dimension_numbers<[1], [0], [0], [1], [0, 0, 1, 1], [], []>} : vector<1x64xf32>, vector<64x256xf32>, vector<1x256xf32> -> vector<1x256xf32>
    %602 = arith.addf %599, %601 : vector<1x256xf32>
    %603 = vector.extract_strided_slice %602 {offsets = [0, 0], sizes = [1, 192], strides = [1, 1]} : vector<1x256xf32> to vector<1x192xf32>
    %604 = arith.negf %603 : vector<1x192xf32>
    %605 = math.exp %604 : vector<1x192xf32>
    %cst_205 = arith.constant 1.000000e+00 : f32
    %606 = vector.broadcast %cst_205 : f32 to vector<1x192xf32>
    %607 = arith.addf %606, %605 : vector<1x192xf32>
    %608 = arith.divf %606, %607 : vector<1x192xf32>
    %609 = vector.extract_strided_slice %608 {offsets = [0, 0], sizes = [1, 64], strides = [1, 1]} : vector<1x192xf32> to vector<1x64xf32>
    %610 = vector.extract_strided_slice %608 {offsets = [0, 64], sizes = [1, 64], strides = [1, 1]} : vector<1x192xf32> to vector<1x64xf32>
    %611 = vector.extract_strided_slice %608 {offsets = [0, 128], sizes = [1, 64], strides = [1, 1]} : vector<1x192xf32> to vector<1x64xf32>
    %612 = vector.extract_strided_slice %602 {offsets = [0, 192], sizes = [1, 64], strides = [1, 1]} : vector<1x256xf32> to vector<1x64xf32>
    %613 = math.tanh %612 : vector<1x64xf32>
    %614 = arith.mulf %610, %573 : vector<1x64xf32>
    %615 = arith.mulf %609, %613 : vector<1x64xf32>
    %616 = arith.addf %614, %615 : vector<1x64xf32>
    %617 = math.tanh %616 : vector<1x64xf32>
    %618 = arith.mulf %611, %617 : vector<1x64xf32>
    %c5 = arith.constant 5 : index
    %c0_206 = arith.constant 0 : index
    %619 = vector.load %arg17[%c5, %c0_206] : memref<8x64xf32, #tpu.memory_space<vmem>>, vector<1x64xf32>
    tpu.vector_store %arg17[%c5, %c0_206], %618 {strides = array<i32>} : memref<8x64xf32, #tpu.memory_space<vmem>>, vector<1x64xf32>,
    %c0_207 = arith.constant 0 : index
    %c0_208 = arith.constant 0 : index
    %620 = vector.load %arg9[%c0_207, %c0_208] : memref<32x128xf32, #tpu.memory_space<vmem>>, vector<32x128xf32>
    %cst_209 = arith.constant dense<0.000000e+00> : vector<1x128xf32>
    %621 = tpu.matmul %595, %620, %cst_209 {dimension_numbers = #tpu.dot_dimension_numbers<[1], [0], [0], [1], [0, 0, 1, 1], [], []>} : vector<1x32xf32>, vector<32x128xf32>, vector<1x128xf32> -> vector<1x128xf32>
    %622 = arith.addf %357, %621 : vector<1x128xf32>
    %623 = vector.extract_strided_slice %622 {offsets = [0, 0], sizes = [1, 96], strides = [1, 1]} : vector<1x128xf32> to vector<1x96xf32>
    %624 = arith.negf %623 : vector<1x96xf32>
    %625 = math.exp %624 : vector<1x96xf32>
    %cst_210 = arith.constant 1.000000e+00 : f32
    %626 = vector.broadcast %cst_210 : f32 to vector<1x96xf32>
    %627 = arith.addf %626, %625 : vector<1x96xf32>
    %628 = arith.divf %626, %627 : vector<1x96xf32>
    %629 = vector.extract_strided_slice %628 {offsets = [0, 0], sizes = [1, 32], strides = [1, 1]} : vector<1x96xf32> to vector<1x32xf32>
    %630 = vector.extract_strided_slice %628 {offsets = [0, 32], sizes = [1, 32], strides = [1, 1]} : vector<1x96xf32> to vector<1x32xf32>
    %631 = vector.extract_strided_slice %628 {offsets = [0, 64], sizes = [1, 32], strides = [1, 1]} : vector<1x96xf32> to vector<1x32xf32>
    %632 = vector.extract_strided_slice %622 {offsets = [0, 96], sizes = [1, 32], strides = [1, 1]} : vector<1x128xf32> to vector<1x32xf32>
    %633 = math.tanh %632 : vector<1x32xf32>
    %634 = arith.mulf %630, %593 : vector<1x32xf32>
    %635 = arith.mulf %629, %633 : vector<1x32xf32>
    %636 = arith.addf %634, %635 : vector<1x32xf32>
    %637 = math.tanh %636 : vector<1x32xf32>
    %638 = arith.mulf %631, %637 : vector<1x32xf32>
    %c0_211 = arith.constant 0 : index
    %c0_212 = arith.constant 0 : index
    %639 = vector.load %arg11[%c0_211, %c0_212] : memref<32x256xf32, #tpu.memory_space<vmem>>, vector<32x256xf32>
    %cst_213 = arith.constant dense<0.000000e+00> : vector<1x256xf32>
    %640 = tpu.matmul %638, %639, %cst_213 {dimension_numbers = #tpu.dot_dimension_numbers<[1], [0], [0], [1], [0, 0, 1, 1], [], []>} : vector<1x32xf32>, vector<32x256xf32>, vector<1x256xf32> -> vector<1x256xf32>
    %c0_214 = arith.constant 0 : index
    %c0_215 = arith.constant 0 : index
    %641 = vector.load %arg13[%c0_214, %c0_215] : memref<1x256xf32, #tpu.memory_space<vmem>>, vector<1x256xf32>
    %642 = arith.addf %640, %641 : vector<1x256xf32>
    %c0_216 = arith.constant 0 : index
    %c0_217 = arith.constant 0 : index
    %643 = vector.load %arg12[%c0_216, %c0_217] : memref<64x256xf32, #tpu.memory_space<vmem>>, vector<64x256xf32>
    %cst_218 = arith.constant dense<0.000000e+00> : vector<1x256xf32>
    %644 = tpu.matmul %618, %643, %cst_218 {dimension_numbers = #tpu.dot_dimension_numbers<[1], [0], [0], [1], [0, 0, 1, 1], [], []>} : vector<1x64xf32>, vector<64x256xf32>, vector<1x256xf32> -> vector<1x256xf32>
    %645 = arith.addf %642, %644 : vector<1x256xf32>
    %646 = vector.extract_strided_slice %645 {offsets = [0, 0], sizes = [1, 192], strides = [1, 1]} : vector<1x256xf32> to vector<1x192xf32>
    %647 = arith.negf %646 : vector<1x192xf32>
    %648 = math.exp %647 : vector<1x192xf32>
    %cst_219 = arith.constant 1.000000e+00 : f32
    %649 = vector.broadcast %cst_219 : f32 to vector<1x192xf32>
    %650 = arith.addf %649, %648 : vector<1x192xf32>
    %651 = arith.divf %649, %650 : vector<1x192xf32>
    %652 = vector.extract_strided_slice %651 {offsets = [0, 0], sizes = [1, 64], strides = [1, 1]} : vector<1x192xf32> to vector<1x64xf32>
    %653 = vector.extract_strided_slice %651 {offsets = [0, 64], sizes = [1, 64], strides = [1, 1]} : vector<1x192xf32> to vector<1x64xf32>
    %654 = vector.extract_strided_slice %651 {offsets = [0, 128], sizes = [1, 64], strides = [1, 1]} : vector<1x192xf32> to vector<1x64xf32>
    %655 = vector.extract_strided_slice %645 {offsets = [0, 192], sizes = [1, 64], strides = [1, 1]} : vector<1x256xf32> to vector<1x64xf32>
    %656 = math.tanh %655 : vector<1x64xf32>
    %657 = arith.mulf %653, %616 : vector<1x64xf32>
    %658 = arith.mulf %652, %656 : vector<1x64xf32>
    %659 = arith.addf %657, %658 : vector<1x64xf32>
    %660 = math.tanh %659 : vector<1x64xf32>
    %661 = arith.mulf %654, %660 : vector<1x64xf32>
    %c6 = arith.constant 6 : index
    %c0_220 = arith.constant 0 : index
    %662 = vector.load %arg17[%c6, %c0_220] : memref<8x64xf32, #tpu.memory_space<vmem>>, vector<1x64xf32>
    tpu.vector_store %arg17[%c6, %c0_220], %661 {strides = array<i32>} : memref<8x64xf32, #tpu.memory_space<vmem>>, vector<1x64xf32>,
    %c0_221 = arith.constant 0 : index
    %c0_222 = arith.constant 0 : index
    %663 = vector.load %arg9[%c0_221, %c0_222] : memref<32x128xf32, #tpu.memory_space<vmem>>, vector<32x128xf32>
    %cst_223 = arith.constant dense<0.000000e+00> : vector<1x128xf32>
    %664 = tpu.matmul %638, %663, %cst_223 {dimension_numbers = #tpu.dot_dimension_numbers<[1], [0], [0], [1], [0, 0, 1, 1], [], []>} : vector<1x32xf32>, vector<32x128xf32>, vector<1x128xf32> -> vector<1x128xf32>
    %665 = arith.addf %357, %664 : vector<1x128xf32>
    %666 = vector.extract_strided_slice %665 {offsets = [0, 0], sizes = [1, 96], strides = [1, 1]} : vector<1x128xf32> to vector<1x96xf32>
    %667 = arith.negf %666 : vector<1x96xf32>
    %668 = math.exp %667 : vector<1x96xf32>
    %cst_224 = arith.constant 1.000000e+00 : f32
    %669 = vector.broadcast %cst_224 : f32 to vector<1x96xf32>
    %670 = arith.addf %669, %668 : vector<1x96xf32>
    %671 = arith.divf %669, %670 : vector<1x96xf32>
    %672 = vector.extract_strided_slice %671 {offsets = [0, 0], sizes = [1, 32], strides = [1, 1]} : vector<1x96xf32> to vector<1x32xf32>
    %673 = vector.extract_strided_slice %671 {offsets = [0, 32], sizes = [1, 32], strides = [1, 1]} : vector<1x96xf32> to vector<1x32xf32>
    %674 = vector.extract_strided_slice %671 {offsets = [0, 64], sizes = [1, 32], strides = [1, 1]} : vector<1x96xf32> to vector<1x32xf32>
    %675 = vector.extract_strided_slice %665 {offsets = [0, 96], sizes = [1, 32], strides = [1, 1]} : vector<1x128xf32> to vector<1x32xf32>
    %676 = math.tanh %675 : vector<1x32xf32>
    %677 = arith.mulf %673, %636 : vector<1x32xf32>
    %678 = arith.mulf %672, %676 : vector<1x32xf32>
    %679 = arith.addf %677, %678 : vector<1x32xf32>
    %680 = math.tanh %679 : vector<1x32xf32>
    %681 = arith.mulf %674, %680 : vector<1x32xf32>
    %c0_225 = arith.constant 0 : index
    %c0_226 = arith.constant 0 : index
    %682 = vector.load %arg11[%c0_225, %c0_226] : memref<32x256xf32, #tpu.memory_space<vmem>>, vector<32x256xf32>
    %cst_227 = arith.constant dense<0.000000e+00> : vector<1x256xf32>
    %683 = tpu.matmul %681, %682, %cst_227 {dimension_numbers = #tpu.dot_dimension_numbers<[1], [0], [0], [1], [0, 0, 1, 1], [], []>} : vector<1x32xf32>, vector<32x256xf32>, vector<1x256xf32> -> vector<1x256xf32>
    %c0_228 = arith.constant 0 : index
    %c0_229 = arith.constant 0 : index
    %684 = vector.load %arg13[%c0_228, %c0_229] : memref<1x256xf32, #tpu.memory_space<vmem>>, vector<1x256xf32>
    %685 = arith.addf %683, %684 : vector<1x256xf32>
    %c0_230 = arith.constant 0 : index
    %c0_231 = arith.constant 0 : index
    %686 = vector.load %arg12[%c0_230, %c0_231] : memref<64x256xf32, #tpu.memory_space<vmem>>, vector<64x256xf32>
    %cst_232 = arith.constant dense<0.000000e+00> : vector<1x256xf32>
    %687 = tpu.matmul %661, %686, %cst_232 {dimension_numbers = #tpu.dot_dimension_numbers<[1], [0], [0], [1], [0, 0, 1, 1], [], []>} : vector<1x64xf32>, vector<64x256xf32>, vector<1x256xf32> -> vector<1x256xf32>
    %688 = arith.addf %685, %687 : vector<1x256xf32>
    %689 = vector.extract_strided_slice %688 {offsets = [0, 0], sizes = [1, 192], strides = [1, 1]} : vector<1x256xf32> to vector<1x192xf32>
    %690 = arith.negf %689 : vector<1x192xf32>
    %691 = math.exp %690 : vector<1x192xf32>
    %cst_233 = arith.constant 1.000000e+00 : f32
    %692 = vector.broadcast %cst_233 : f32 to vector<1x192xf32>
    %693 = arith.addf %692, %691 : vector<1x192xf32>
    %694 = arith.divf %692, %693 : vector<1x192xf32>
    %695 = vector.extract_strided_slice %694 {offsets = [0, 0], sizes = [1, 64], strides = [1, 1]} : vector<1x192xf32> to vector<1x64xf32>
    %696 = vector.extract_strided_slice %694 {offsets = [0, 64], sizes = [1, 64], strides = [1, 1]} : vector<1x192xf32> to vector<1x64xf32>
    %697 = vector.extract_strided_slice %694 {offsets = [0, 128], sizes = [1, 64], strides = [1, 1]} : vector<1x192xf32> to vector<1x64xf32>
    %698 = vector.extract_strided_slice %688 {offsets = [0, 192], sizes = [1, 64], strides = [1, 1]} : vector<1x256xf32> to vector<1x64xf32>
    %699 = math.tanh %698 : vector<1x64xf32>
    %700 = arith.mulf %696, %659 : vector<1x64xf32>
    %701 = arith.mulf %695, %699 : vector<1x64xf32>
    %702 = arith.addf %700, %701 : vector<1x64xf32>
    %703 = math.tanh %702 : vector<1x64xf32>
    %704 = arith.mulf %697, %703 : vector<1x64xf32>
    %c7 = arith.constant 7 : index
    %c0_234 = arith.constant 0 : index
    %705 = vector.load %arg17[%c7, %c0_234] : memref<8x64xf32, #tpu.memory_space<vmem>>, vector<1x64xf32>
    tpu.vector_store %arg17[%c7, %c0_234], %704 {strides = array<i32>} : memref<8x64xf32, #tpu.memory_space<vmem>>, vector<1x64xf32>,
    %c0_235 = arith.constant 0 : index
    %c0_236 = arith.constant 0 : index
    %706 = vector.load %arg17[%c0_235, %c0_236] : memref<8x64xf32, #tpu.memory_space<vmem>>, vector<8x64xf32>
    %c0_237 = arith.constant 0 : index
    %c0_238 = arith.constant 0 : index
    %707 = vector.load %arg14[%c0_237, %c0_238] : memref<64x1xf32, #tpu.memory_space<vmem>>, vector<64x1xf32>
    %cst_239 = arith.constant dense<0.000000e+00> : vector<8x1xf32>
    %708 = tpu.matmul %706, %707, %cst_239 {dimension_numbers = #tpu.dot_dimension_numbers<[1], [0], [0], [1], [0, 0, 1, 1], [], []>} : vector<8x64xf32>, vector<64x1xf32>, vector<8x1xf32> -> vector<8x1xf32>
    %c0_240 = arith.constant 0 : index
    %c0_241 = arith.constant 0 : index
    %709 = vector.load %arg15[%c0_240, %c0_241] : memref<1x1xf32, #tpu.memory_space<vmem>>, vector<1x1xf32>
    %710 = vector.broadcast %709 : vector<1x1xf32> to vector<8x1xf32>
    %711 = arith.addf %708, %710 : vector<8x1xf32>
    %c0_242 = arith.constant 0 : index
    %c0_243 = arith.constant 0 : index
    %712 = vector.load %arg16[%c0_242, %c0_243] : memref<8x1xf32, #tpu.memory_space<vmem>>, vector<8x1xf32>
    tpu.vector_store %arg16[%c0_242, %c0_243], %711 {strides = array<i32>} : memref<8x1xf32, #tpu.memory_space<vmem>>, vector<8x1xf32>,
    return
  }
  func.func @transform_0(%arg0: i32) -> (i32, i32) {
    %c0_i32 = arith.constant 0 : i32
    %c0_i32_0 = arith.constant 0 : i32
    %c0_i32_1 = arith.constant 0 : i32
    return %c0_i32, %c0_i32_0 : i32, i32
  }
  func.func @transform_1(%arg0: i32) -> (i32, i32) {
    %c0_i32 = arith.constant 0 : i32
    %c0_i32_0 = arith.constant 0 : i32
    %c0_i32_1 = arith.constant 0 : i32
    return %c0_i32, %c0_i32_0 : i32, i32
  }
  func.func @transform_2(%arg0: i32) -> (i32, i32) {
    %c0_i32 = arith.constant 0 : i32
    %c0_i32_0 = arith.constant 0 : i32
    %c0_i32_1 = arith.constant 0 : i32
    return %c0_i32, %c0_i32_0 : i32, i32
  }
  func.func @transform_3(%arg0: i32) -> (i32, i32) {
    %c0_i32 = arith.constant 0 : i32
    %c0_i32_0 = arith.constant 0 : i32
    %c0_i32_1 = arith.constant 0 : i32
    return %c0_i32, %c0_i32_0 : i32, i32
  }
  func.func @transform_4(%arg0: i32) -> (i32, i32) {
    %c0_i32 = arith.constant 0 : i32
    %c0_i32_0 = arith.constant 0 : i32
    %c0_i32_1 = arith.constant 0 : i32
    return %c0_i32, %c0_i32_0 : i32, i32
  }
  func.func @transform_5(%arg0: i32) -> (i32, i32) {
    %c0_i32 = arith.constant 0 : i32
    %c0_i32_0 = arith.constant 0 : i32
    %c0_i32_1 = arith.constant 0 : i32
    return %c0_i32, %c0_i32_0 : i32, i32
  }
  func.func @transform_6(%arg0: i32) -> (i32, i32) {
    %c0_i32 = arith.constant 0 : i32
    %c0_i32_0 = arith.constant 0 : i32
    %c0_i32_1 = arith.constant 0 : i32
    return %c0_i32, %c0_i32_0 : i32, i32
  }
  func.func @transform_7(%arg0: i32) -> (i32, i32) {
    %c0_i32 = arith.constant 0 : i32
    %c0_i32_0 = arith.constant 0 : i32
    %c0_i32_1 = arith.constant 0 : i32
    return %c0_i32, %c0_i32_0 : i32, i32
  }
  func.func @transform_8(%arg0: i32) -> (i32, i32) {
    %c0_i32 = arith.constant 0 : i32
    %c0_i32_0 = arith.constant 0 : i32
    %c0_i32_1 = arith.constant 0 : i32
    return %c0_i32, %c0_i32_0 : i32, i32
  }
  func.func @transform_9(%arg0: i32) -> (i32, i32) {
    %c0_i32 = arith.constant 0 : i32
    %c0_i32_0 = arith.constant 0 : i32
    %c0_i32_1 = arith.constant 0 : i32
    return %c0_i32, %c0_i32_0 : i32, i32
  }
  func.func @transform_10(%arg0: i32) -> (i32, i32) {
    %c0_i32 = arith.constant 0 : i32
    %c0_i32_0 = arith.constant 0 : i32
    %c0_i32_1 = arith.constant 0 : i32
    return %c0_i32, %c0_i32_0 : i32, i32
  }
  func.func @transform_11(%arg0: i32) -> (i32, i32) {
    %c0_i32 = arith.constant 0 : i32
    %c0_i32_0 = arith.constant 0 : i32
    %c0_i32_1 = arith.constant 0 : i32
    return %c0_i32, %c0_i32_0 : i32, i32
  }
  func.func @transform_12(%arg0: i32) -> (i32, i32) {
    %c0_i32 = arith.constant 0 : i32
    %c0_i32_0 = arith.constant 0 : i32
    %c0_i32_1 = arith.constant 0 : i32
    return %c0_i32, %c0_i32_0 : i32, i32
  }
  func.func @transform_13(%arg0: i32) -> (i32, i32) {
    %c0_i32 = arith.constant 0 : i32
    %c0_i32_0 = arith.constant 0 : i32
    %c0_i32_1 = arith.constant 0 : i32
    return %c0_i32, %c0_i32_0 : i32, i32
  }
  func.func @transform_14(%arg0: i32) -> (i32, i32) {
    %c0_i32 = arith.constant 0 : i32
    %c0_i32_0 = arith.constant 0 : i32
    %c0_i32_1 = arith.constant 0 : i32
    return %c0_i32, %c0_i32_0 : i32, i32
  }
  func.func @transform_15(%arg0: i32) -> (i32, i32) {
    %c0_i32 = arith.constant 0 : i32
    %c0_i32_0 = arith.constant 0 : i32
    %c0_i32_1 = arith.constant 0 : i32
    return %c0_i32, %c0_i32_0 : i32, i32
  }
}

</mosaic_0001>

<bundles_post_ra>
// kernel: tpu_custom_call.1
= control target key start
LH: loop header
LB: loop body
LE: loop exit
PB: predicated region body
PF: predicated region fallthrough
CT: control target
= control target key end

     0   :  { %s8079_s0 = inlined_call_operand.vmem [shape: f32[8,1], index: 0, kind: input, shape index: {}]   ;;  %s8080_s1 = inlined_call_operand.hbm [shape: f32[1,256], index: 1, kind: input, shape index: {}]   ;;  %s8081_s2 = inlined_call_operand.hbm [shape: f32[64,256], index: 2, kind: input, shape index: {}]   ;;  %s8082_s3 = inlined_call_operand.hbm [shape: f32[1,256], index: 3, kind: input, shape index: {}]   ;;  %s8083_s4 = inlined_call_operand.vmem [shape: f32[64,128], index: 4, kind: input, shape index: {}]   ;;  %s8084_s5 = inlined_call_operand.vmem [shape: f32[32,128], index: 5, kind: input, shape index: {}]   ;;  %s8085_s6 = inlined_call_operand.vmem [shape: f32[1,128], index: 6, kind: input, shape index: {}]   ;;  %s8086_s7 = inlined_call_operand.hbm [shape: f32[32,128], index: 7, kind: input, shape index: {}]   ;;  %s8087_s8 = inlined_call_operand.hbm [shape: f32[32,128], index: 8, kind: input, shape index: {}]   ;;  %s8088_s9 = inlined_call_operand.vmem [shape: f32[1,128], index: 9, kind: input, shape index: {}]   ;;  %s8089_s10 = inlined_call_operand.hbm [shape: f32[32,256], index: 10, kind: input, shape index: {}]   ;;  %s8090_s11 = inlined_call_operand.hbm [shape: f32[64,256], index: 11, kind: input, shape index: {}]   ;;  %s8091_s12 = inlined_call_operand.vmem [shape: f32[1,256], index: 12, kind: input, shape index: {}]   ;;  %s8092_s13 = inlined_call_operand.vmem [shape: f32[64,1], index: 13, kind: input, shape index: {}]   ;;  %s8093_s14 = inlined_call_operand.<no memory space> [shape: f32[1,1], index: 14, kind: input, shape index: {}]   ;;  %s8094_s15 = inlined_call_operand.vmem [shape: f32[8,1], index: 15, kind: output, shape index: {}]  }
   0x1   :  { %v20_v0 = vstv %s8093_s14 }
   0x2   :  { %21 = vst [vmem:[#allocation3] sm:$0x1] %v20_v0 }
   0x3   :  { %22 = vsyncpa [#allocation5], 0 }
   0x4   :  { %23 = vsyncpa [#allocation7], 0 }
   0x5   :  { %24 = vsyncpa [#allocation10], 0 }
   0x6   :  { %25 = vsyncpa [#allocation13], 0  ;;  %s6982_s20 = smov [#allocation6]   ;;  %s6820_s24 = scalar_lea.hbm %s8081_s2, 2048 }
   0x7   :  { %s43_s21 = sshll.u32 %s6982_s20, 4  ;;  %p6821_p0 = scmp.ne.s32.totalorder %s8081_s2, %s6820_s24  ;;  %s44_s21 = int_to_ptr.vmem [resolvable:$true] %s43_s21 }
   0x8   :  { %p6824_p1 = scmp.lt.u32.totalorder %s6820_s24, %s8081_s2 }
   0xa   :  { %p6826_p2 = pnand %p6824_p1, %p6821_p0 }
   0xc   :  { %6829 = shalt.err (!%p6826_p2)
}
   0xd   :  { %s6830_s14 = scalar_lea.vmem %s44_s21, 2048  ;;  %p6835_p4 = scmp.lt.s32.totalorder %s44_s21, %s44_s21 }
   0xe   :  { %p6831_p3 = scmp.ne.s32.totalorder %s44_s21, %s6830_s14  ;;  %p6836_p5 = scmp.lt.s32.totalorder %s6830_s14, %s6830_s14 }
  0x10   :  { %p6837_p6 = por %p6836_p5, %p6835_p4 }
  0x12   :  { %p6838_p7 = pnand %p6837_p6, %p6831_p3 }
  0x14   :  { %6841 = shalt.err (!%p6838_p7)
}
  0x15   :  { %s8095_s29 = smov 256   ;;  %s6984_s30 = smov 16  }
  0x16   :  { %49 = dma.hbm_to_vmem [thread:$0]  %s8081_s2, 2048, %s44_s21, [#allocation7], %s8095_s29, %s8095_s29, %s6984_s30  }
  0x17   :  { %s6985_s18 = smov [#allocation9]   ;;  %s6842_s23 = scalar_lea.hbm %s8086_s7, 512 }
  0x18   :  { %s71_s19 = sshll.u32 %s6985_s18, 4  ;;  %p6843_p8 = scmp.ne.s32.totalorder %s8086_s7, %s6842_s23  ;;  %s72_s19 = int_to_ptr.vmem [resolvable:$true] %s71_s19 }
  0x19   :  { %p6846_p9 = scmp.lt.u32.totalorder %s6842_s23, %s8086_s7 }
  0x1b   :  { %p6848_p10 = pnand %p6846_p9, %p6843_p8 }
  0x1d   :  { %6851 = shalt.err (!%p6848_p10)
}
  0x1e   :  { %s6852_s28 = scalar_lea.vmem %s72_s19, 512  ;;  %p6857_p12 = scmp.lt.s32.totalorder %s72_s19, %s72_s19 }
  0x1f   :  { %p6853_p11 = scmp.ne.s32.totalorder %s72_s19, %s6852_s28  ;;  %p6858_p13 = scmp.lt.s32.totalorder %s6852_s28, %s6852_s28 }
  0x21   :  { %p6859_p0 = por %p6858_p13, %p6857_p12 }
  0x23   :  { %p6860_p1 = pnand %p6859_p0, %p6853_p11 }
  0x25   :  { %6863 = shalt.err (!%p6860_p1)
}
  0x26   :  { %s6986_s2 = smov 128   ;;  %s6987_s21 = smov 8  }
  0x27   :  { %77 = dma.hbm_to_vmem [thread:$0]  %s8086_s7, 512, %s72_s19, [#allocation10], %s6986_s2, %s6986_s2, %s6987_s21  }
  0x28   :  { %s6988_s17 = smov [#allocation12]   ;;  %s6989_s20 = smov [#allocation4]  }
  0x29   :  { %s97_s18 = sshll.u32 %s6988_s17, 4  ;;  %s34_s22 = sshll.u32 %s6989_s20, 4  ;;  %s98_s18 = int_to_ptr.vmem [resolvable:$true] %s97_s18  ;;  %s35_s22 = int_to_ptr.vmem [resolvable:$true] %s34_s22 }
  0x2a   :  { %s6864_s25 = scalar_lea.hbm %s8089_s10, 1024 }
  0x2b   :  { %p6865_p2 = scmp.ne.s32.totalorder %s8089_s10, %s6864_s25  ;;  %p6868_p3 = scmp.lt.u32.totalorder %s6864_s25, %s8089_s10 }
  0x2d   :  { %p6870_p4 = pnand %p6868_p3, %p6865_p2 }
  0x2f   :  { %6873 = shalt.err (!%p6870_p4)
}
  0x30   :  { %s6874_s7 = scalar_lea.vmem %s98_s18, 1024  ;;  %p6879_p6 = scmp.lt.s32.totalorder %s98_s18, %s98_s18 }
  0x31   :  { %p6875_p5 = scmp.ne.s32.totalorder %s98_s18, %s6874_s7  ;;  %p6880_p7 = scmp.lt.s32.totalorder %s6874_s7, %s6874_s7 }
  0x33   :  { %p6881_p8 = por %p6880_p7, %p6879_p6 }
  0x35   :  { %p6882_p9 = pnand %p6881_p8, %p6875_p5 }
  0x37   :  { %6885 = shalt.err (!%p6882_p9)
}
  0x38   :  { %s8097_s19 = smov 256   ;;  %s6886_s29 = scalar_lea.hbm %s8080_s1, 32 }
  0x39   :  { %103 = dma.hbm_to_vmem [thread:$0]  %s8089_s10, 1024, %s98_s18, [#allocation13], %s8097_s19, %s8097_s19, %s6984_s30  }
  0x3a   :  { %p6887_p10 = scmp.ne.s32.totalorder %s8080_s1, %s6886_s29  ;;  %p6890_p11 = scmp.lt.u32.totalorder %s6886_s29, %s8080_s1 }
  0x3c   :  { %p6892_p12 = pnand %p6890_p11, %p6887_p10 }
  0x3e   :  { %6895 = shalt.err (!%p6892_p12)
}
  0x3f   :  { %s6896_s27 = scalar_lea.vmem %s35_s22, 32  ;;  %p6901_p0 = scmp.lt.s32.totalorder %s35_s22, %s35_s22 }
  0x40   :  { %p6897_p13 = scmp.ne.s32.totalorder %s35_s22, %s6896_s27  ;;  %p6902_p1 = scmp.lt.s32.totalorder %s6896_s27, %s6896_s27 }
  0x42   :  { %p6903_p2 = por %p6902_p1, %p6901_p0 }
  0x44   :  { %p6904_p3 = pnand %p6903_p2, %p6897_p13 }
  0x46   :  { %6907 = shalt.err (!%p6904_p3)
}
  0x47   :  { %37 = dma.hbm_to_vmem [thread:$0]  %s8080_s1, 32, %s35_s22, [#allocation5]  }
  0x48   :  { %s6990_s28 = smov [#allocation8]   ;;  %s6991_s14 = smov [#allocation11]  }
  0x49   :  { %s56_s7 = sshll.u32 %s6990_s28, 4  ;;  %s83_s16 = sshll.u32 %s6991_s14, 4  ;;  %s57_s7 = int_to_ptr.vmem [resolvable:$true] %s56_s7  ;;  %s7138_s16 = int_to_ptr.vmem [resolvable:$true] %s83_s16 }
  0x4a   :  { %s6908_s29 = scalar_lea.hbm %s8082_s3, 32 }
  0x4b   :  { %p6909_p4 = scmp.ne.s32.totalorder %s8082_s3, %s6908_s29  ;;  %p6912_p5 = scmp.lt.u32.totalorder %s6908_s29, %s8082_s3 }
  0x4d   :  { %p6914_p6 = pnand %p6912_p5, %p6909_p4 }
  0x4f   :  { %6917 = shalt.err (!%p6914_p6)
}
  0x50   :  { %s6918_s1 = scalar_lea.vmem %s57_s7, 32  ;;  %p6923_p8 = scmp.lt.s32.totalorder %s57_s7, %s57_s7 }
  0x51   :  { %p6919_p7 = scmp.ne.s32.totalorder %s57_s7, %s6918_s1  ;;  %p6924_p9 = scmp.lt.s32.totalorder %s6918_s1, %s6918_s1 }
  0x53   :  { %p6925_p10 = por %p6924_p9, %p6923_p8 }
  0x55   :  { %p6926_p11 = pnand %p6925_p10, %p6919_p7 }
  0x57   :  { %6929 = shalt.err (!%p6926_p11)
}
  0x58   :  { %59 = dma.hbm_to_vmem [thread:$0]  %s8082_s3, 32, %s57_s7, [#allocation7]  }
  0x59   :  { %s6930_s28 = scalar_lea.hbm %s8087_s8, 512 }
  0x5a   :  { %p6931_p12 = scmp.ne.s32.totalorder %s8087_s8, %s6930_s28  ;;  %p6934_p13 = scmp.lt.u32.totalorder %s6930_s28, %s8087_s8 }
  0x5c   :  { %p6936_p0 = pnand %p6934_p13, %p6931_p12 }
  0x5e   :  { %6939 = shalt.err (!%p6936_p0)
}
  0x5f   :  { %s6940_s23 = scalar_lea.vmem %s7138_s16, 512  ;;  %p6945_p2 = scmp.lt.s32.totalorder %s7138_s16, %s7138_s16 }
  0x60   :  { %p6941_p1 = scmp.ne.s32.totalorder %s7138_s16, %s6940_s23  ;;  %p6946_p3 = scmp.lt.s32.totalorder %s6940_s23, %s6940_s23 }
  0x62   :  { %p6947_p4 = por %p6946_p3, %p6945_p2 }
  0x64   :  { %p6948_p5 = pnand %p6947_p4, %p6941_p1 }
  0x66   :  { %6951 = shalt.err (!%p6948_p5)
}
  0x67   :  { %89 = dma.hbm_to_vmem [thread:$0]  %s8087_s8, 512, %s7138_s16, [#allocation10], %s6986_s2, %s6986_s2, %s6987_s21  }
  0x68   :  { %s6992_s24 = smov [#allocation14]   ;;  %s6952_s22 = scalar_lea.hbm %s8090_s11, 2048 }
  0x69   :  { %s109_s25 = sshll.u32 %s6992_s24, 4  ;;  %p6953_p6 = scmp.ne.s32.totalorder %s8090_s11, %s6952_s22  ;;  %s110_s25 = int_to_ptr.vmem [resolvable:$true] %s109_s25 }
  0x6a   :  { %p6956_p7 = scmp.lt.u32.totalorder %s6952_s22, %s8090_s11 }
  0x6c   :  { %p6958_p8 = pnand %p6956_p7, %p6953_p6 }
  0x6e   :  { %6961 = shalt.err (!%p6958_p8)
}
  0x6f   :  { %s6962_s14 = scalar_lea.vmem %s110_s25, 2048  ;;  %p6967_p10 = scmp.lt.s32.totalorder %s110_s25, %s110_s25 }
  0x70   :  { %p6963_p9 = scmp.ne.s32.totalorder %s110_s25, %s6962_s14  ;;  %p6968_p11 = scmp.lt.s32.totalorder %s6962_s14, %s6962_s14 }
  0x72   :  { %p6969_p12 = por %p6968_p11, %p6967_p10 }
  0x74   :  { %p6970_p13 = pnand %p6969_p12, %p6963_p9 }
  0x76   :  { %6973 = shalt.err (!%p6970_p13)
}
  0x77   :  { %115 = dma.hbm_to_vmem [thread:$0]  %s8090_s11, 2048, %s110_s25, [#allocation13], %s8097_s19, %s8097_s19, %s6984_s30  }
  0x78   :  { %6974 = dma.done.wait [#allocation5], 32  }
  0x79   :  { %6975 = vsyncadd [#allocation5], 4294967264 }
  0x7a   :  { %6976 = dma.done.wait [#allocation7], 2080  }
  0x7b   :  { %6977 = vsyncadd [#allocation7], 4294965216 }
  0x7c   :  { %6978 = dma.done.wait [#allocation10], 1024  }
  0x7d   :  { %6979 = vsyncadd [#allocation10], 4294966272 }
  0x7e   :  { %6980 = dma.done.wait [#allocation13], 3072  }
  0x7f   :  { %6981 = vsyncadd [#allocation13], 4294964224  ;;  %v147_v1 = vlaneseq  ;;  %v6993_v2 = vmov 0.0   ;;  %v247_v4 = vld [vmem:[#allocation6 + $0x8] sm:$0xff]  ;;  %v249_v5 = vld [vmem:[#allocation6 + $0x18] sm:$0xff]  ;;  %vm170_vm0 = vcmask 1040384  }
  0x80   :  { %239 = vmatprep.mubr.f32.mxu0 %v6993_v2  ;;  %330 = vmatprep.mubr.f32.mxu1 %v6993_v2  ;;  %v246_v6 = vld [vmem:[#allocation6] sm:$0xff]  ;;  %v7189_v7 = vpack.c.bf16 %v249_v5, %v247_v4  ;;  %v248_v8 = vld [vmem:[#allocation6 + $0x10] sm:$0xff]  ;;  %v251_v9 = vld [vmem:[#allocation6 + $0x28] sm:$0xff]  ;;  %vm166_vm1 = vcmask 7168   ;;  %v6995_v55 = vmov 0.0|0.0   ;;  %vm6996_vm2 = vmmov 0  }
  0x81   :  { %v148_v3 = vshrl.u32 %v147_v1, 7  ;;  %v253_v10 = vld [vmem:[#allocation6 + $0x38] sm:$0xff]  ;;  %v7195_v13 = vpack.c.bf16 %v248_v8, %v246_v6  ;;  %v250_v15 = vld [vmem:[#allocation6 + $0x20] sm:$0xff]  ;;  %v252_v16 = vld [vmem:[#allocation6 + $0x30] sm:$0xff]  ;;  %vm262_vm3 = vcmask 523264   ;;  %s6997_s19 = smov 32  }
  0x82   :  { %v7197_v14 = vpack.c.bf16 %v253_v10, %v251_v9  ;;  %v255_v17 = vld [vmem:[#allocation6 + $0x48] sm:$0xff]  ;;  %5898 = vmatprep.subr.bf16.mxu1 %v7189_v7  ;;  %v257_v18 = vld [vmem:[#allocation6 + $0x58] sm:$0xff]  ;;  %v7201_v19 = vpack.c.bf16 %v252_v16, %v250_v15  ;;  %v254_v22 = vld [vmem:[#allocation6 + $0x40] sm:$0xff]  ;;  %vm455_vm4 = vcmask 261120   ;;  %vm2949_vm5 = vcmask 516096  }
  0x83   :  { %v7191_v11 = vsub.s32 0, %v148_v3  ;;  %v7193_v12 = vsub.s32 1, %v148_v3  ;;  %5900 = vmatpush1.bf16.msra.mxu1 %v7195_v13  ;;  %v144_v20 = vld [vmem:[#allocation4] sm:$0x3]  ;;  %v7204_v21 = vpack.c.bf16 %v257_v18, %v255_v17  ;;  %v256_v23 = vld [vmem:[#allocation6 + $0x50] sm:$0xff]  ;;  %v259_v26 = vld [vmem:[#allocation6 + $0x68] sm:$0xff] }
  0x84   :  { %5902 = vmatprep.subr.bf16.mxu1 %v7197_v14  ;;  %v261_v27 = vld [vmem:[#allocation6 + $0x78] sm:$0xff]  ;;  %v7212_v29 = vpack.c.bf16 %v256_v23, %v254_v22  ;;  %v258_v31 = vld [vmem:[#allocation6 + $0x60] sm:$0xff]  ;;  %v260_v32 = vld [vmem:[#allocation6 + $0x70] sm:$0xff] }
  0x85   :  { %v161_v24 = vrot.slane %v144_v20, %v7191_v11  ;;  %v165_v25 = vrot.slane %v144_v20, %v7193_v12  ;;  %v143_v28 = vld [vmem:[%s8079_s0] sm:$0xff]  ;;  %v7215_v30 = vpack.c.bf16 %v261_v27, %v259_v26  ;;  %v7219_v33 = vpack.c.bf16 %v260_v32, %v258_v31  ;;  %v145_v35 = vld [vmem:[#allocation8] sm:$0x3]  ;;  %s6994_s0 = smov 64   ;;  %v371_v54 = vld [vmem:[%s8083_s4 + $0x10] sm:$0xff] }
  0x86   :  { %v154_v37 = vrot.slane %v145_v35, %v7193_v12  ;;  %v150_v43 = vrot.slane %v145_v35, %v7191_v11  ;;  %v369_v52 = vld [vmem:[%s8083_s4] sm:$0xff]  ;;  %v370_v53 = vld [vmem:[%s8083_s4 + $0x8] sm:$0xff]  ;;  %v372_v57 = vld [vmem:[%s8083_s4 + $0x18] sm:$0xff] }
  0x87   :  { %5275 = vmatprep.subr.msk.mxu0 %vm170_vm0, %v165_v25  ;;  %5904 = vmatpush1.bf16.msra.mxu1 %v7201_v19  ;;  %v7254_v56 = vpack.c.bf16 %v370_v53, %v369_v52  ;;  %v7260_v58 = vpack.c.bf16 %v372_v57, %v371_v54  ;;  %v373_v59 = vld [vmem:[%s8083_s4 + $0x20] sm:$0xff]  ;;  %v374_v60 = vld [vmem:[%s8083_s4 + $0x28] sm:$0xff]  ;;  %v375_v62 = vld [vmem:[%s8083_s4 + $0x30] sm:$0xff] }
  0x88   :  { %5276 = vmatpush1.msk.msra.mxu0 %vm170_vm0, %v161_v24  ;;  %5906 = vmatprep.subr.bf16.mxu1 %v7204_v21  ;;  %v7270_v61 = vpack.c.bf16 %v374_v60, %v373_v59  ;;  %v376_v63 = vld [vmem:[%s8083_s4 + $0x38] sm:$0xff]  ;;  %v451_v10 = vld [vmem:[%s8084_s5] sm:$0xff]  ;;  %v452_v15 = vld [vmem:[%s8084_s5 + $0x8] sm:$0xff] }
  0x89   :  { %5277 = vmatmul.mubr.msk.f32.vlgmr.msra.gmra.mrb[0].mxu0 %vm166_vm1, %v143_v28  ;;  %5913 = vmatprep.subr.bf16.mxu0 %v6995_v55  ;;  %v7280_v0 = vpack.c.bf16 %v376_v63, %v375_v62  ;;  %v7297_v18 = vpack.c.bf16 %v452_v15, %v451_v10  ;;  %v453_v22 = vld [vmem:[%s8084_s5 + $0x10] sm:$0xff]  ;;  %v454_v23 = vld [vmem:[%s8084_s5 + $0x18] sm:$0xff]  ;;  %v7339_v31 = vld [vmem:[%s8085_s6] sm:$0x1] }
  0x8a   :  { %5915 = vmatpush3.bf16.msra.mxu0 %v7254_v56  ;;  %5555 = vmatprep.mubr.msk.f32.mxu0 %vm6996_vm2, %v6993_v2  ;;  %v7308_v24 = vpack.c.bf16 %v454_v23, %v453_v22 }
  0x8b   :  { %5908 = vmatpush1.bf16.msra.mxu1 %v7212_v29  ;;  %5916 = vmatprep.subr.bf16.mxu0 %v6995_v55 }
  0x8c   :  { %5910 = vmatprep.subr.bf16.mxu1 %v7215_v30 }
  0x8e   :  { %5918 = vmatpush3.bf16.msra.mxu0 %v7260_v58 }
  0x8f   :  { %5912 = vmatpush1.bf16.msra.mxu1 %v7219_v33  ;;  %5919 = vmatprep.subr.bf16.mxu0 %v6995_v55 }
  0x90   :  { %5932 = vmatprep.subr.bf16.mxu1 %v7189_v7 }
  0x92   :  { %331 = vmatmul.mubr.f32.vlgmr.msra.gmra.mrb[0].mxu1 %v6993_v2  ;;  %5921 = vmatpush3.bf16.msra.mxu0 %v7270_v61 }
  0x93   :  { %5934 = vmatpush1.bf16.msra.mxu1 %v7195_v13  ;;  %617 = vmatprep.mubr.f32.mxu1 %v6993_v2 }
  0x94   :  { %5936 = vmatprep.subr.bf16.mxu1 %v7197_v14  ;;  %5922 = vmatprep.subr.bf16.mxu0 %v6995_v55 }
  0x96   :  { %5924 = vmatpush3.bf16.msra.mxu0 %v7280_v0 }
  0x97   :  { %5938 = vmatpush1.bf16.msra.mxu1 %v7201_v19  ;;  %5925 = vmatprep.subr.bf16.mxu0 %v6995_v55 }
  0x98   :  { %5940 = vmatprep.subr.bf16.mxu1 %v7204_v21 }
  0x9b   :  { %5942 = vmatpush1.bf16.msra.mxu1 %v7212_v29 }
  0x9c   :  { %5944 = vmatprep.subr.bf16.mxu1 %v7215_v30 }
  0x9f   :  { %5946 = vmatpush1.bf16.msra.mxu1 %v7219_v33 }
  0xa0   :  { %5966 = vmatprep.subr.bf16.mxu1 %v7189_v7 }
 0x15c   :  { %v241_v34 = vpop.f32.mrb[0].mxu0 }
 0x15d   :  { %v243_v36 = vpop.f32.mrb[1].mxu0  ;;  %v7240_v44 = vadd.f32 %v241_v34, %v150_v43 }
 0x15e   :  { %v7235_v38 = vadd.f32 %v243_v36, %v154_v37 }
 0x165   :  { %v332_v39 = vpop.f32.mrb[0].mxu1 }
 0x166   :  { %v334_v40 = vpop.f32.mrb[1].mxu1  ;;  %v337_v45 = vadd.f32 %v332_v39, %v7240_v44 }
 0x167   :  { %v338_v41 = vadd.f32 %v334_v40, %v7235_v38 }
 0x168   :  { %v5278_v46 = vmul.f32 -1.442695, %v337_v45 }
 0x169   :  { %6499 = vtanh.f32 %v338_v41  ;;  %v5279_v6 = vmul.f32 -1.442695, %v338_v41 }
 0x16a   :  { %6501 = vpow2.f32 %v5278_v46 }
 0x173   :  { %v6500_v42 = vpop.eup %6499 }
 0x174   :  { %354 = vrot.lane.b32.xlu0 %v6500_v42, %s6994_s0  ;;  %v6502_v47 = vpop.eup %6501 }
 0x175   :  { %v345_v48 = vadd.f32 1.0, %v6502_v47 }
 0x177   :  { %6503 = vrcp.f32 %v345_v48 }
 0x181   :  { %v6504_v49 = vpop.eup %6503 }
 0x182   :  { %v352_v1 = vmul.f32 0.0, %v6504_v49 }
 0x1e6   :  { %v355_v50 = vpop.permute.xlu0 %354 }
 0x1e7   :  { %v357_v51 = vmul.f32 %v6504_v49, %v355_v50 }
 0x1e9   :  { %359 = vrot.lane.b32.xlu0 %v357_v51, %s6994_s0 }
 0x25b   :  { %v360_v3 = vpop.permute.xlu0 %359 }
 0x25c   :  { %v7285_v4 = vadd.f32 %v360_v3, %v352_v1 }
 0x25e   :  { %6505 = vtanh.f32 %v7285_v4  ;;  %v646_v54 = vrot.slane %v7285_v4, 7 }
 0x25f   :  { %6507 = vpow2.f32 %v5279_v6 }
 0x268   :  { %v6506_v5 = vpop.eup %6505 }
 0x269   :  { %365 = vrot.lane.b32.xlu1 %v6506_v5, %s6994_s0  ;;  %v6508_v8 = vpop.eup %6507 }
 0x26a   :  { %v346_v9 = vadd.f32 1.0, %v6508_v8 }
 0x26c   :  { %6509 = vrcp.f32 %v346_v9 }
 0x276   :  { %v6510_v16 = vpop.eup %6509 }
 0x2db   :  { %v366_v17 = vpop.permute.xlu1 %365 }
 0x2dc   :  { %v368_v20 = vmul.f32 %v6510_v16, %v366_v17 }
 0x2de   :  { %5556 = vmatmul.mubr.msk.f32.vlgmr.msra.gmra.mrb[2].mxu0 %vm262_vm3, %v368_v20  ;;  %5282 = vmatmul.mubr.msk.f32.vlgmr.msra.gmra.mrb[2].mxu1 %vm262_vm3, %v368_v20 }
 0x2df   :  { %5927 = vmatpush3.bf16.msra.mxu0 %v7297_v18  ;;  %5566 = vmatprep.mubr.msk.f32.mxu0 %vm6996_vm2, %v6993_v2 }
 0x2e0   :  { %5928 = vmatprep.subr.bf16.mxu0 %v6995_v55  ;;  %5968 = vmatpush1.bf16.msra.mxu1 %v7195_v13 }
 0x2e1   :  { %5970 = vmatprep.subr.bf16.mxu1 %v7197_v14  ;;  %903 = vmatprep.mubr.f32.mxu1 %v6993_v2 }
 0x2e3   :  { %5930 = vmatpush3.bf16.msra.mxu0 %v7308_v24 }
 0x2e4   :  { %5947 = vmatprep.subr.bf16.mxu0 %v6995_v55  ;;  %5972 = vmatpush1.bf16.msra.mxu1 %v7201_v19 }
 0x2e5   :  { %5974 = vmatprep.subr.bf16.mxu1 %v7204_v21 }
 0x2e6   :  { %5567 = vmatmul.mubr.f32.vlgmr.msra.gmra.mrb[2].mxu0 %v6993_v2 }
 0x2e7   :  { %5949 = vmatpush3.bf16.msra.mxu0 %v7254_v56  ;;  %5585 = vmatprep.mubr.msk.f32.mxu0 %vm6996_vm2, %v6993_v2 }
 0x2e8   :  { %5950 = vmatprep.subr.bf16.mxu0 %v6995_v55  ;;  %5976 = vmatpush1.bf16.msra.mxu1 %v7212_v29 }
 0x2e9   :  { %5978 = vmatprep.subr.bf16.mxu1 %v7215_v30 }
 0x2eb   :  { %5952 = vmatpush3.bf16.msra.mxu0 %v7260_v58 }
 0x2ec   :  { %5953 = vmatprep.subr.bf16.mxu0 %v6995_v55  ;;  %5980 = vmatpush1.bf16.msra.mxu1 %v7219_v33 }
 0x2ed   :  { %5981 = vmatprep.subr.bf16.mxu1 %v6995_v55 }
 0x2ef   :  { %5955 = vmatpush3.bf16.msra.mxu0 %v7270_v61 }
 0x2f0   :  { %5956 = vmatprep.subr.bf16.mxu0 %v6995_v55 }
 0x2f3   :  { %5958 = vmatpush3.bf16.msra.mxu0 %v7280_v0 }
 0x2f4   :  { %5959 = vmatprep.subr.bf16.mxu0 %v6995_v55 }
 0x3b1   :  { %v619_v25 = vpop.f32.mrb[2].mxu1 }
 0x3b2   :  { %v621_v26 = vpop.f32.mrb[3].mxu1  ;;  %v626_v39 = vrot.slane %v619_v25, 7 }
 0x3b3   :  { %v627_v27 = vrot.slane %v621_v26, 7 }
 0x3b4   :  { %v630_v40 = vadd.f32 %v626_v39, %v7240_v44 }
 0x3b5   :  { %v631_v28 = vadd.f32 %v627_v27, %v7235_v38 }
 0x3b6   :  { %v5283_v41 = vmul.f32 -1.442695, %v630_v40 }
 0x3b7   :  { %6511 = vtanh.f32 %v631_v28  ;;  %v5284_v6 = vmul.f32 -1.442695, %v631_v28 }
 0x3b9   :  { %v524_v32 = vpop.f32.mrb[2].mxu0 }
 0x3ba   :  { %v6427_v34 = vadd.f32 %v524_v32, %v7339_v31  ;;  %v5568_v35 = vpop.f32.mrb[3].mxu0 }
 0x3bc   :  { %6513 = vtanh.f32 %v6427_v34  ;;  %v5281_v42 = vmul.f32 -1.442695, %v6427_v34 }
 0x3bd   :  { %6515 = vpow2.f32 %v5283_v41 }
 0x3be   :  { %6517 = vpow2.f32 %v5281_v42 }
 0x3c1   :  { %v6512_v36 = vpop.eup %6511 }
 0x3c2   :  { %650 = vrot.lane.b32.xlu0 %v6512_v36, %s6994_s0 }
 0x3c6   :  { %v6514_v37 = vpop.eup %6513 }
 0x3c7   :  { %538 = vrot.lane.b32.xlu1 %v6514_v37, %s6997_s19  ;;  %v6516_v43 = vpop.eup %6515 }
 0x3c8   :  { %v638_v45 = vadd.f32 1.0, %v6516_v43  ;;  %v6518_v46 = vpop.eup %6517 }
 0x3c9   :  { %v532_v47 = vadd.f32 1.0, %v6518_v46 }
 0x3ca   :  { %6519 = vrcp.f32 %v638_v45 }
 0x3cb   :  { %6521 = vrcp.f32 %v532_v47 }
 0x3d4   :  { %v6520_v48 = vpop.eup %6519 }
 0x3d5   :  { %v6522_v51 = vpop.eup %6521  ;;  %v648_v57 = vmul.f32 %v6520_v48, %v646_v54 }
 0x3d6   :  { %v536_v62 = vmul.f32 0.0, %v6522_v51 }
 0x434   :  { %v651_v49 = vpop.permute.xlu0 %650 }
 0x435   :  { %v653_v50 = vmul.f32 %v6520_v48, %v651_v49 }
 0x437   :  { %655 = vrot.lane.b32.xlu0 %v653_v50, %s6994_s0 }
 0x439   :  { %v539_v52 = vpop.permute.xlu1 %538 }
 0x43a   :  { %v541_v53 = vmul.f32 %v6522_v51, %v539_v52 }
 0x43c   :  { %543 = vrot.lane.b32.xlu1 %v541_v53, %s6997_s19 }
 0x4a9   :  { %v656_v59 = vpop.permute.xlu0 %655 }
 0x4aa   :  { %v7348_v60 = vadd.f32 %v656_v59, %v648_v57 }
 0x4ac   :  { %6523 = vtanh.f32 %v7348_v60  ;;  %v932_v50 = vrot.slane %v7348_v60, 7 }
 0x4ae   :  { %v544_v63 = vpop.permute.xlu1 %543 }
 0x4af   :  { %v7351_v1 = vadd.f32 %v544_v63, %v536_v62 }
 0x4b1   :  { %6525 = vtanh.f32 %v7351_v1 }
 0x4b2   :  { %6527 = vpow2.f32 %v5284_v6 }
 0x4b6   :  { %v6524_v3 = vpop.eup %6523 }
 0x4b7   :  { %661 = vrot.lane.b32.xlu0 %v6524_v3, %s6994_s0 }
 0x4bb   :  { %v6526_v5 = vpop.eup %6525 }
 0x4bc   :  { %549 = vrot.lane.b32.xlu1 %v6526_v5, %s6997_s19  ;;  %v6528_v4 = vpop.eup %6527 }
 0x4bd   :  { %v639_v8 = vadd.f32 1.0, %v6528_v4 }
 0x4bf   :  { %6529 = vrcp.f32 %v639_v8 }
 0x4c9   :  { %v6530_v9 = vpop.eup %6529 }
 0x529   :  { %v662_v10 = vpop.permute.xlu0 %661 }
 0x52a   :  { %v664_v15 = vmul.f32 %v6530_v9, %v662_v10 }
 0x52c   :  { %v666_v16 = vrot.slane %v664_v15, 1 }
 0x52e   :  { %5586 = vmatmul.mubr.msk.f32.vlgmr.msra.gmra.mrb[4].mxu0 %vm262_vm3, %v666_v16  ;;  %5288 = vmatmul.mubr.msk.f32.vlgmr.msra.gmra.mrb[4].mxu1 %vm262_vm3, %v666_v16  ;;  %v550_v17 = vpop.permute.xlu1 %549 }
 0x52f   :  { %v552_v20 = vmul.f32 %v6522_v51, %v550_v17  ;;  %5961 = vmatpush3.bf16.msra.mxu0 %v7297_v18  ;;  %5596 = vmatprep.mubr.msk.f32.mxu0 %vm6996_vm2, %v6993_v2 }
 0x530   :  { %5962 = vmatprep.subr.bf16.mxu0 %v6995_v55  ;;  %5983 = vmatpush3.bf16.msra.mxu1 %v7254_v56 }
 0x531   :  { %740 = vrot.lane.b32.xlu1 %v552_v20, %s6994_s0  ;;  %5984 = vmatprep.subr.bf16.mxu1 %v6995_v55 }
 0x532   :  { %5615 = vmatprep.mubr.msk.f32.mxu1 %vm6996_vm2, %v6993_v2 }
 0x533   :  { %5964 = vmatpush3.bf16.msra.mxu0 %v7308_v24 }
 0x534   :  { %6000 = vmatprep.subr.bf16.mxu0 %v7189_v7  ;;  %5986 = vmatpush3.bf16.msra.mxu1 %v7260_v58 }
 0x535   :  { %5987 = vmatprep.subr.bf16.mxu1 %v6995_v55 }
 0x538   :  { %5989 = vmatpush3.bf16.msra.mxu1 %v7270_v61 }
 0x539   :  { %5990 = vmatprep.subr.bf16.mxu1 %v6995_v55 }
 0x53c   :  { %5992 = vmatpush3.bf16.msra.mxu1 %v7280_v0 }
 0x53d   :  { %5993 = vmatprep.subr.bf16.mxu1 %v6995_v55 }
 0x5a3   :  { %v741_v22 = vpop.permute.xlu1 %740 }
 0x5a4   :  { %5597 = vmatmul.mubr.msk.f32.vlgmr.msra.gmra.mrb[4].mxu0 %vm455_vm4, %v741_v22 }
 0x5a5   :  { %6002 = vmatpush1.bf16.msra.mxu0 %v7195_v13  ;;  %1189 = vmatprep.mubr.f32.mxu0 %v6993_v2 }
 0x5a6   :  { %6004 = vmatprep.subr.bf16.mxu0 %v7197_v14 }
 0x5a9   :  { %6006 = vmatpush1.bf16.msra.mxu0 %v7201_v19 }
 0x5aa   :  { %6008 = vmatprep.subr.bf16.mxu0 %v7204_v21 }
 0x5ad   :  { %6010 = vmatpush1.bf16.msra.mxu0 %v7212_v29 }
 0x5ae   :  { %6012 = vmatprep.subr.bf16.mxu0 %v7215_v30 }
 0x5b1   :  { %6014 = vmatpush1.bf16.msra.mxu0 %v7219_v33 }
 0x5b2   :  { %6015 = vmatprep.subr.bf16.mxu0 %v6995_v55 }
 0x601   :  { %v905_v23 = vpop.f32.mrb[4].mxu1 }
 0x602   :  { %v907_v25 = vpop.f32.mrb[5].mxu1  ;;  %v912_v32 = vrot.slane %v905_v23, 6 }
 0x603   :  { %v913_v26 = vrot.slane %v907_v25, 6 }
 0x604   :  { %v916_v34 = vadd.f32 %v912_v32, %v7240_v44 }
 0x605   :  { %v917_v27 = vadd.f32 %v913_v26, %v7235_v38 }
 0x606   :  { %v5289_v35 = vmul.f32 -1.442695, %v916_v34 }
 0x607   :  { %6531 = vtanh.f32 %v917_v27  ;;  %v5290_v63 = vmul.f32 -1.442695, %v917_v27 }
 0x608   :  { %6533 = vpow2.f32 %v5289_v35 }
 0x611   :  { %v6532_v28 = vpop.eup %6531 }
 0x612   :  { %936 = vrot.lane.b32.xlu1 %v6532_v28, %s6994_s0  ;;  %v6534_v36 = vpop.eup %6533 }
 0x613   :  { %v924_v37 = vadd.f32 1.0, %v6534_v36 }
 0x615   :  { %6535 = vrcp.f32 %v924_v37 }
 0x61f   :  { %v6536_v42 = vpop.eup %6535 }
 0x620   :  { %v934_v54 = vmul.f32 %v6536_v42, %v932_v50 }
 0x677   :  { %v810_v39 = vpop.f32.mrb[4].mxu0 }
 0x678   :  { %v6428_v40 = vadd.f32 %v810_v39, %v7339_v31  ;;  %v5598_v41 = vpop.f32.mrb[5].mxu0 }
 0x67a   :  { %6537 = vtanh.f32 %v6428_v40  ;;  %v5287_v47 = vmul.f32 -1.442695, %v6428_v40 }
 0x67c   :  { %6539 = vpow2.f32 %v5287_v47 }
 0x684   :  { %v6538_v43 = vpop.eup %6537  ;;  %v937_v45 = vpop.permute.xlu1 %936 }
 0x685   :  { %v939_v46 = vmul.f32 %v6536_v42, %v937_v45  ;;  %824 = vrot.lane.b32.xlu0 %v6538_v43, %s6997_s19 }
 0x686   :  { %v6540_v48 = vpop.eup %6539 }
 0x687   :  { %941 = vrot.lane.b32.xlu1 %v939_v46, %s6994_s0  ;;  %v818_v49 = vadd.f32 1.0, %v6540_v48 }
 0x689   :  { %6541 = vrcp.f32 %v818_v49 }
 0x693   :  { %v6542_v51 = vpop.eup %6541 }
 0x694   :  { %v822_v60 = vmul.f32 %v6542_v51, %v7351_v1 }
 0x6f7   :  { %v825_v52 = vpop.permute.xlu0 %824 }
 0x6f8   :  { %v827_v53 = vmul.f32 %v6542_v51, %v825_v52 }
 0x6f9   :  { %v942_v57 = vpop.permute.xlu1 %941 }
 0x6fa   :  { %v7392_v59 = vadd.f32 %v942_v57, %v934_v54  ;;  %829 = vrot.lane.b32.xlu0 %v827_v53, %s6997_s19 }
 0x6fc   :  { %6543 = vtanh.f32 %v7392_v59  ;;  %v1218_v46 = vrot.slane %v7392_v59, 7 }
 0x6fd   :  { %6545 = vpow2.f32 %v5290_v63 }
 0x706   :  { %v6544_v62 = vpop.eup %6543 }
 0x707   :  { %947 = vrot.lane.b32.xlu1 %v6544_v62, %s6994_s0  ;;  %v6546_v3 = vpop.eup %6545 }
 0x708   :  { %v925_v5 = vadd.f32 1.0, %v6546_v3 }
 0x70a   :  { %6547 = vrcp.f32 %v925_v5 }
 0x714   :  { %v6548_v8 = vpop.eup %6547 }
 0x76c   :  { %v830_v6 = vpop.permute.xlu0 %829 }
 0x76d   :  { %v7398_v4 = vadd.f32 %v830_v6, %v822_v60 }
 0x76f   :  { %6549 = vtanh.f32 %v7398_v4 }
 0x779   :  { %v6550_v9 = vpop.eup %6549  ;;  %v948_v10 = vpop.permute.xlu1 %947 }
 0x77a   :  { %v950_v15 = vmul.f32 %v6548_v8, %v948_v10  ;;  %835 = vrot.lane.b32.xlu0 %v6550_v9, %s6997_s19 }
 0x77c   :  { %v952_v16 = vrot.slane %v950_v15, 2 }
 0x77e   :  { %5616 = vmatmul.mubr.msk.f32.vlgmr.msra.gmra.mrb[6].mxu1 %vm262_vm3, %v952_v16  ;;  %5294 = vmatmul.mubr.msk.f32.vlgmr.msra.gmra.mrb[6].mxu0 %vm262_vm3, %v952_v16 }
 0x77f   :  { %5995 = vmatpush3.bf16.msra.mxu1 %v7297_v18  ;;  %5626 = vmatprep.mubr.msk.f32.mxu1 %vm6996_vm2, %v6993_v2 }
 0x780   :  { %5996 = vmatprep.subr.bf16.mxu1 %v6995_v55  ;;  %6017 = vmatpush3.bf16.msra.mxu0 %v7254_v56 }
 0x781   :  { %6018 = vmatprep.subr.bf16.mxu0 %v6995_v55  ;;  %5645 = vmatprep.mubr.msk.f32.mxu0 %vm6996_vm2, %v6993_v2 }
 0x783   :  { %5998 = vmatpush3.bf16.msra.mxu1 %v7308_v24 }
 0x784   :  { %6034 = vmatprep.subr.bf16.mxu1 %v7189_v7  ;;  %6020 = vmatpush3.bf16.msra.mxu0 %v7260_v58 }
 0x785   :  { %6021 = vmatprep.subr.bf16.mxu0 %v6995_v55 }
 0x788   :  { %6023 = vmatpush3.bf16.msra.mxu0 %v7270_v61 }
 0x789   :  { %6024 = vmatprep.subr.bf16.mxu0 %v6995_v55 }
 0x78c   :  { %6026 = vmatpush3.bf16.msra.mxu0 %v7280_v0 }
 0x78d   :  { %6027 = vmatprep.subr.bf16.mxu0 %v6995_v55 }
 0x7ec   :  { %v836_v1 = vpop.permute.xlu0 %835 }
 0x7ed   :  { %v838_v17 = vmul.f32 %v6542_v51, %v836_v1 }
 0x7ef   :  { %1026 = vrot.lane.b32.xlu0 %v838_v17, %s6994_s0 }
 0x851   :  { %v1191_v20 = vpop.f32.mrb[6].mxu0 }
 0x852   :  { %v1193_v22 = vpop.f32.mrb[7].mxu0  ;;  %v1198_v28 = vrot.slane %v1191_v20, 5 }
 0x853   :  { %v1199_v23 = vrot.slane %v1193_v22, 5 }
 0x854   :  { %v1202_v32 = vadd.f32 %v1198_v28, %v7240_v44 }
 0x855   :  { %v1203_v25 = vadd.f32 %v1199_v23, %v7235_v38 }
 0x856   :  { %v5295_v34 = vmul.f32 -1.442695, %v1202_v32 }
 0x857   :  { %6551 = vtanh.f32 %v1203_v25  ;;  %v5296_v54 = vmul.f32 -1.442695, %v1203_v25 }
 0x858   :  { %6553 = vpow2.f32 %v5295_v34 }
 0x861   :  { %v6552_v26 = vpop.eup %6551  ;;  %v1027_v27 = vpop.permute.xlu0 %1026 }
 0x862   :  { %5627 = vmatmul.mubr.msk.f32.vlgmr.msra.gmra.mrb[6].mxu1 %vm455_vm4, %v1027_v27  ;;  %1222 = vrot.lane.b32.xlu0 %v6552_v26, %s6994_s0  ;;  %v6554_v35 = vpop.eup %6553 }
 0x863   :  { %6036 = vmatpush1.bf16.msra.mxu1 %v7195_v13  ;;  %1475 = vmatprep.mubr.f32.mxu1 %v6993_v2  ;;  %v1210_v36 = vadd.f32 1.0, %v6554_v35 }
 0x864   :  { %6038 = vmatprep.subr.bf16.mxu1 %v7197_v14 }
 0x865   :  { %6555 = vrcp.f32 %v1210_v36 }
 0x867   :  { %6040 = vmatpush1.bf16.msra.mxu1 %v7201_v19 }
 0x868   :  { %6042 = vmatprep.subr.bf16.mxu1 %v7204_v21 }
 0x86b   :  { %6044 = vmatpush1.bf16.msra.mxu1 %v7212_v29 }
 0x86c   :  { %6046 = vmatprep.subr.bf16.mxu1 %v7215_v30 }
 0x86f   :  { %6048 = vmatpush1.bf16.msra.mxu1 %v7219_v33  ;;  %v6556_v37 = vpop.eup %6555 }
 0x870   :  { %6049 = vmatprep.subr.bf16.mxu1 %v6995_v55  ;;  %v1220_v47 = vmul.f32 %v6556_v37, %v1218_v46 }
 0x8d4   :  { %v1223_v39 = vpop.permute.xlu0 %1222 }
 0x8d5   :  { %v1225_v40 = vmul.f32 %v6556_v37, %v1223_v39 }
 0x8d7   :  { %1227 = vrot.lane.b32.xlu0 %v1225_v40, %s6994_s0 }
 0x935   :  { %v1096_v41 = vpop.f32.mrb[6].mxu1 }
 0x936   :  { %v6429_v42 = vadd.f32 %v1096_v41, %v7339_v31  ;;  %v5628_v43 = vpop.f32.mrb[7].mxu1 }
 0x938   :  { %6557 = vtanh.f32 %v6429_v42  ;;  %v5293_v51 = vmul.f32 -1.442695, %v6429_v42 }
 0x942   :  { %v6558_v45 = vpop.eup %6557 }
 0x943   :  { %1110 = vrot.lane.b32.xlu1 %v6558_v45, %s6997_s19 }
 0x949   :  { %v1228_v48 = vpop.permute.xlu0 %1227 }
 0x94a   :  { %v7438_v49 = vadd.f32 %v1228_v48, %v1220_v47 }
 0x94c   :  { %6559 = vtanh.f32 %v7438_v49  ;;  %v1504_v40 = vrot.slane %v7438_v49, 7 }
 0x94d   :  { %6561 = vpow2.f32 %v5293_v51 }
 0x956   :  { %v6560_v50 = vpop.eup %6559 }
 0x957   :  { %1233 = vrot.lane.b32.xlu0 %v6560_v50, %s6994_s0  ;;  %v6562_v52 = vpop.eup %6561 }
 0x958   :  { %v1104_v53 = vadd.f32 1.0, %v6562_v52 }
 0x95a   :  { %6563 = vrcp.f32 %v1104_v53 }
 0x95b   :  { %6565 = vpow2.f32 %v5296_v54 }
 0x964   :  { %v6564_v57 = vpop.eup %6563 }
 0x965   :  { %v6566_v59 = vpop.eup %6565  ;;  %v1108_v9 = vmul.f32 %v6564_v57, %v7398_v4 }
 0x966   :  { %v1211_v3 = vadd.f32 1.0, %v6566_v59 }
 0x968   :  { %6567 = vrcp.f32 %v1211_v3 }
 0x972   :  { %v6568_v5 = vpop.eup %6567 }
 0x9b5   :  { %v1111_v62 = vpop.permute.xlu1 %1110 }
 0x9b6   :  { %v1113_v63 = vmul.f32 %v6564_v57, %v1111_v62 }
 0x9b8   :  { %1115 = vrot.lane.b32.xlu1 %v1113_v63, %s6997_s19 }
 0x9c9   :  { %v1234_v60 = vpop.permute.xlu0 %1233 }
 0x9ca   :  { %v1236_v6 = vmul.f32 %v6568_v5, %v1234_v60 }
 0x9cc   :  { %v1238_v8 = vrot.slane %v1236_v6, 3 }
 0x9ce   :  { %5646 = vmatmul.mubr.msk.f32.vlgmr.msra.gmra.mrb[8].mxu0 %vm262_vm3, %v1238_v8  ;;  %5300 = vmatmul.mubr.msk.f32.vlgmr.msra.gmra.mrb[8].mxu1 %vm262_vm3, %v1238_v8 }
 0x9cf   :  { %6029 = vmatpush3.bf16.msra.mxu0 %v7297_v18  ;;  %5656 = vmatprep.mubr.msk.f32.mxu0 %vm6996_vm2, %v6993_v2 }
 0x9d0   :  { %6030 = vmatprep.subr.bf16.mxu0 %v6995_v55  ;;  %6051 = vmatpush3.bf16.msra.mxu1 %v7254_v56 }
 0x9d1   :  { %6052 = vmatprep.subr.bf16.mxu1 %v6995_v55  ;;  %5675 = vmatprep.mubr.msk.f32.mxu1 %vm6996_vm2, %v6993_v2 }
 0x9d3   :  { %6032 = vmatpush3.bf16.msra.mxu0 %v7308_v24 }
 0x9d4   :  { %6068 = vmatprep.subr.bf16.mxu0 %v7189_v7  ;;  %6054 = vmatpush3.bf16.msra.mxu1 %v7260_v58 }
 0x9d5   :  { %6055 = vmatprep.subr.bf16.mxu1 %v6995_v55 }
 0x9d8   :  { %6057 = vmatpush3.bf16.msra.mxu1 %v7270_v61 }
 0x9d9   :  { %6058 = vmatprep.subr.bf16.mxu1 %v6995_v55 }
 0x9dc   :  { %6060 = vmatpush3.bf16.msra.mxu1 %v7280_v0 }
 0x9dd   :  { %6061 = vmatprep.subr.bf16.mxu1 %v6995_v55 }
 0xa2a   :  { %v1116_v10 = vpop.permute.xlu1 %1115 }
 0xa2b   :  { %v7462_v15 = vadd.f32 %v1116_v10, %v1108_v9 }
 0xa2d   :  { %6569 = vtanh.f32 %v7462_v15 }
 0xa37   :  { %v6570_v16 = vpop.eup %6569 }
 0xa38   :  { %1121 = vrot.lane.b32.xlu1 %v6570_v16, %s6997_s19 }
 0xaa1   :  { %v1477_v1 = vpop.f32.mrb[8].mxu1 }
 0xaa2   :  { %v1479_v17 = vpop.f32.mrb[9].mxu1  ;;  %v1484_v4 = vrot.slane %v1477_v1, 4 }
 0xaa3   :  { %v1485_v20 = vrot.slane %v1479_v17, 4 }
 0xaa4   :  { %v1488_v27 = vadd.f32 %v1484_v4, %v7240_v44 }
 0xaa5   :  { %v1489_v22 = vadd.f32 %v1485_v20, %v7235_v38 }
 0xaa6   :  { %v5301_v28 = vmul.f32 -1.442695, %v1488_v27 }
 0xaa7   :  { %6571 = vtanh.f32 %v1489_v22  ;;  %v5302_v50 = vmul.f32 -1.442695, %v1489_v22 }
 0xaa8   :  { %6573 = vpow2.f32 %v5301_v28 }
 0xaaa   :  { %v1122_v23 = vpop.permute.xlu1 %1121 }
 0xaab   :  { %v1124_v25 = vmul.f32 %v6564_v57, %v1122_v23 }
 0xaad   :  { %1312 = vrot.lane.b32.xlu1 %v1124_v25, %s6994_s0 }
 0xab1   :  { %v6572_v26 = vpop.eup %6571 }
 0xab2   :  { %1508 = vrot.lane.b32.xlu1 %v6572_v26, %s6994_s0  ;;  %v6574_v32 = vpop.eup %6573 }
 0xab3   :  { %v1496_v34 = vadd.f32 1.0, %v6574_v32 }
 0xab5   :  { %6575 = vrcp.f32 %v1496_v34 }
 0xabf   :  { %v6576_v36 = vpop.eup %6575 }
 0xac0   :  { %v1506_v41 = vmul.f32 %v6576_v36, %v1504_v40 }
 0xb1f   :  { %v1313_v35 = vpop.permute.xlu1 %1312 }
 0xb20   :  { %5657 = vmatmul.mubr.msk.f32.vlgmr.msra.gmra.mrb[8].mxu0 %vm455_vm4, %v1313_v35 }
 0xb21   :  { %6070 = vmatpush1.bf16.msra.mxu0 %v7195_v13  ;;  %1761 = vmatprep.mubr.f32.mxu0 %v6993_v2 }
 0xb22   :  { %6072 = vmatprep.subr.bf16.mxu0 %v7197_v14 }
 0xb24   :  { %v1509_v37 = vpop.permute.xlu1 %1508 }
 0xb25   :  { %v1511_v39 = vmul.f32 %v6576_v36, %v1509_v37  ;;  %6074 = vmatpush1.bf16.msra.mxu0 %v7201_v19 }
 0xb26   :  { %6076 = vmatprep.subr.bf16.mxu0 %v7204_v21 }
 0xb27   :  { %1513 = vrot.lane.b32.xlu1 %v1511_v39, %s6994_s0 }
 0xb29   :  { %6078 = vmatpush1.bf16.msra.mxu0 %v7212_v29 }
 0xb2a   :  { %6080 = vmatprep.subr.bf16.mxu0 %v7215_v30 }
 0xb2d   :  { %6082 = vmatpush1.bf16.msra.mxu0 %v7219_v33 }
 0xb2e   :  { %6083 = vmatprep.subr.bf16.mxu0 %v6995_v55 }
 0xb99   :  { %v1514_v42 = vpop.permute.xlu1 %1513 }
 0xb9a   :  { %v7482_v43 = vadd.f32 %v1514_v42, %v1506_v41 }
 0xb9c   :  { %6577 = vtanh.f32 %v7482_v43  ;;  %v1790_v39 = vrot.slane %v7482_v43, 7 }
 0xba6   :  { %v6578_v45 = vpop.eup %6577 }
 0xba7   :  { %1519 = vrot.lane.b32.xlu1 %v6578_v45, %s6994_s0 }
 0xbf3   :  { %v1382_v46 = vpop.f32.mrb[8].mxu0 }
 0xbf4   :  { %v6430_v47 = vadd.f32 %v1382_v46, %v7339_v31  ;;  %v5658_v48 = vpop.f32.mrb[9].mxu0 }
 0xbf6   :  { %6579 = vtanh.f32 %v6430_v47  ;;  %v5299_v63 = vmul.f32 -1.442695, %v6430_v47 }
 0xbf7   :  { %6581 = vpow2.f32 %v5302_v50 }
 0xc00   :  { %v6580_v51 = vpop.eup %6579 }
 0xc01   :  { %1396 = vrot.lane.b32.xlu0 %v6580_v51, %s6997_s19  ;;  %v6582_v49 = vpop.eup %6581 }
 0xc02   :  { %v1497_v52 = vadd.f32 1.0, %v6582_v49 }
 0xc04   :  { %6583 = vrcp.f32 %v1497_v52 }
 0xc05   :  { %6585 = vpow2.f32 %v5299_v63 }
 0xc0e   :  { %v6584_v53 = vpop.eup %6583 }
 0xc0f   :  { %v6586_v59 = vpop.eup %6585 }
 0xc10   :  { %v1390_v3 = vadd.f32 1.0, %v6586_v59 }
 0xc12   :  { %6587 = vrcp.f32 %v1390_v3 }
 0xc19   :  { %v1520_v54 = vpop.permute.xlu1 %1519 }
 0xc1a   :  { %v1522_v57 = vmul.f32 %v6584_v53, %v1520_v54 }
 0xc1c   :  { %v1524_v62 = vrot.slane %v1522_v57, 4  ;;  %v6588_v5 = vpop.eup %6587 }
 0xc1d   :  { %v1394_v8 = vmul.f32 %v6588_v5, %v7462_v15 }
 0xc1e   :  { %5676 = vmatmul.mubr.msk.f32.vlgmr.msra.gmra.mrb[10].mxu1 %vm262_vm3, %v1524_v62  ;;  %5306 = vmatmul.mubr.msk.f32.vlgmr.msra.gmra.mrb[10].mxu0 %vm262_vm3, %v1524_v62 }
 0xc1f   :  { %6063 = vmatpush3.bf16.msra.mxu1 %v7297_v18  ;;  %5686 = vmatprep.mubr.msk.f32.mxu1 %vm6996_vm2, %v6993_v2 }
 0xc20   :  { %6064 = vmatprep.subr.bf16.mxu1 %v6995_v55  ;;  %6085 = vmatpush3.bf16.msra.mxu0 %v7254_v56 }
 0xc21   :  { %6086 = vmatprep.subr.bf16.mxu0 %v6995_v55  ;;  %5705 = vmatprep.mubr.msk.f32.mxu0 %vm6996_vm2, %v6993_v2 }
 0xc23   :  { %6066 = vmatpush3.bf16.msra.mxu1 %v7308_v24 }
 0xc24   :  { %6102 = vmatprep.subr.bf16.mxu1 %v7189_v7  ;;  %6088 = vmatpush3.bf16.msra.mxu0 %v7260_v58 }
 0xc25   :  { %6089 = vmatprep.subr.bf16.mxu0 %v6995_v55 }
 0xc28   :  { %6091 = vmatpush3.bf16.msra.mxu0 %v7270_v61 }
 0xc29   :  { %6092 = vmatprep.subr.bf16.mxu0 %v6995_v55 }
 0xc2c   :  { %6094 = vmatpush3.bf16.msra.mxu0 %v7280_v0 }
 0xc2d   :  { %6095 = vmatprep.subr.bf16.mxu0 %v6995_v55 }
 0xc73   :  { %v1397_v60 = vpop.permute.xlu0 %1396 }
 0xc74   :  { %v1399_v6 = vmul.f32 %v6588_v5, %v1397_v60 }
 0xc76   :  { %1401 = vrot.lane.b32.xlu0 %v1399_v6, %s6997_s19 }
 0xce8   :  { %v1402_v9 = vpop.permute.xlu0 %1401 }
 0xce9   :  { %v7508_v10 = vadd.f32 %v1402_v9, %v1394_v8 }
 0xceb   :  { %6589 = vtanh.f32 %v7508_v10 }
 0xcf1   :  { %v1763_v16 = vpop.f32.mrb[10].mxu0 }
 0xcf2   :  { %v1765_v1 = vpop.f32.mrb[11].mxu0  ;;  %v1770_v15 = vrot.slane %v1763_v16, 3 }
 0xcf3   :  { %v1771_v20 = vrot.slane %v1765_v1, 3 }
 0xcf4   :  { %v1774_v4 = vadd.f32 %v1770_v15, %v7240_v44 }
 0xcf5   :  { %v6590_v17 = vpop.eup %6589  ;;  %v1775_v22 = vadd.f32 %v1771_v20, %v7235_v38 }
 0xcf6   :  { %1407 = vrot.lane.b32.xlu0 %v6590_v17, %s6997_s19  ;;  %v5307_v27 = vmul.f32 -1.442695, %v1774_v4 }
 0xcf7   :  { %6591 = vtanh.f32 %v1775_v22  ;;  %v5308_v50 = vmul.f32 -1.442695, %v1775_v22 }
 0xcf8   :  { %6593 = vpow2.f32 %v5307_v27 }
 0xd01   :  { %v6592_v26 = vpop.eup %6591 }
 0xd02   :  { %v6594_v28 = vpop.eup %6593 }
 0xd03   :  { %v1782_v32 = vadd.f32 1.0, %v6594_v28 }
 0xd05   :  { %6595 = vrcp.f32 %v1782_v32 }
 0xd0f   :  { %v6596_v35 = vpop.eup %6595 }
 0xd10   :  { %v1792_v40 = vmul.f32 %v6596_v35, %v1790_v39 }
 0xd68   :  { %v1408_v23 = vpop.permute.xlu0 %1407 }
 0xd69   :  { %v1410_v25 = vmul.f32 %v6588_v5, %v1408_v23 }
 0xd6b   :  { %1598 = vrot.lane.b32.xlu0 %v1410_v25, %s6994_s0 }
 0xd6f   :  { %1794 = vrot.lane.b32.xlu0 %v6592_v26, %s6994_s0 }
 0xddd   :  { %v1599_v34 = vpop.permute.xlu0 %1598 }
 0xdde   :  { %5687 = vmatmul.mubr.msk.f32.vlgmr.msra.gmra.mrb[10].mxu1 %vm455_vm4, %v1599_v34 }
 0xddf   :  { %6104 = vmatpush1.bf16.msra.mxu1 %v7195_v13  ;;  %2047 = vmatprep.mubr.f32.mxu1 %v6993_v2 }
 0xde0   :  { %6106 = vmatprep.subr.bf16.mxu1 %v7197_v14 }
 0xde1   :  { %v1795_v36 = vpop.permute.xlu0 %1794 }
 0xde2   :  { %v1797_v37 = vmul.f32 %v6596_v35, %v1795_v36 }
 0xde3   :  { %6108 = vmatpush1.bf16.msra.mxu1 %v7201_v19 }
 0xde4   :  { %1799 = vrot.lane.b32.xlu0 %v1797_v37, %s6994_s0  ;;  %6110 = vmatprep.subr.bf16.mxu1 %v7204_v21 }
 0xde7   :  { %6112 = vmatpush1.bf16.msra.mxu1 %v7212_v29 }
 0xde8   :  { %6114 = vmatprep.subr.bf16.mxu1 %v7215_v30 }
 0xdeb   :  { %6116 = vmatpush1.bf16.msra.mxu1 %v7219_v33 }
 0xdec   :  { %6117 = vmatprep.subr.bf16.mxu1 %v6995_v55 }
 0xe56   :  { %v1800_v41 = vpop.permute.xlu0 %1799 }
 0xe57   :  { %v7528_v42 = vadd.f32 %v1800_v41, %v1792_v40 }
 0xe59   :  { %6597 = vtanh.f32 %v7528_v42 }
 0xe63   :  { %v6598_v45 = vpop.eup %6597 }
 0xe64   :  { %1805 = vrot.lane.b32.xlu0 %v6598_v45, %s6994_s0 }
 0xeb1   :  { %v1668_v46 = vpop.f32.mrb[10].mxu1 }
 0xeb2   :  { %v6431_v47 = vadd.f32 %v1668_v46, %v7339_v31  ;;  %v5688_v48 = vpop.f32.mrb[11].mxu1 }
 0xeb4   :  { %6599 = vtanh.f32 %v6431_v47  ;;  %v5305_v62 = vmul.f32 -1.442695, %v6431_v47 }
 0xeb5   :  { %6601 = vpow2.f32 %v5308_v50 }
 0xebe   :  { %v6600_v51 = vpop.eup %6599 }
 0xebf   :  { %1682 = vrot.lane.b32.xlu1 %v6600_v51, %s6997_s19  ;;  %v6602_v43 = vpop.eup %6601 }
 0xec0   :  { %v1783_v49 = vadd.f32 1.0, %v6602_v43 }
 0xec2   :  { %6603 = vrcp.f32 %v1783_v49 }
 0xec3   :  { %6605 = vpow2.f32 %v5305_v62 }
 0xecc   :  { %v6604_v52 = vpop.eup %6603 }
 0xecd   :  { %v6606_v63 = vpop.eup %6605 }
 0xece   :  { %v1676_v59 = vadd.f32 1.0, %v6606_v63 }
 0xed0   :  { %6607 = vrcp.f32 %v1676_v59 }
 0xed6   :  { %v1806_v53 = vpop.permute.xlu0 %1805 }
 0xed7   :  { %v1808_v54 = vmul.f32 %v6604_v52, %v1806_v53 }
 0xed9   :  { %v1810_v57 = vrot.slane %v1808_v54, 5 }
 0xeda   :  { %v6608_v3 = vpop.eup %6607 }
 0xedb   :  { %5706 = vmatmul.mubr.msk.f32.vlgmr.msra.gmra.mrb[12].mxu0 %vm262_vm3, %v1810_v57  ;;  %5312 = vmatmul.mubr.msk.f32.vlgmr.msra.gmra.mrb[12].mxu1 %vm262_vm3, %v1810_v57  ;;  %v1680_v60 = vmul.f32 %v6608_v3, %v7508_v10 }
 0xedc   :  { %6097 = vmatpush3.bf16.msra.mxu0 %v7297_v18  ;;  %5716 = vmatprep.mubr.msk.f32.mxu0 %vm6996_vm2, %v6993_v2 }
 0xedd   :  { %6098 = vmatprep.subr.bf16.mxu0 %v6995_v55  ;;  %6119 = vmatpush3.bf16.msra.mxu1 %v7254_v56 }
 0xede   :  { %6120 = vmatprep.subr.bf16.mxu1 %v6995_v55  ;;  %5735 = vmatprep.mubr.msk.f32.mxu1 %vm6996_vm2, %v6993_v2 }
 0xee0   :  { %6100 = vmatpush3.bf16.msra.mxu0 %v7308_v24 }
 0xee1   :  { %6136 = vmatprep.subr.bf16.mxu0 %v7189_v7  ;;  %6122 = vmatpush3.bf16.msra.mxu1 %v7260_v58 }
 0xee2   :  { %6123 = vmatprep.subr.bf16.mxu1 %v6995_v55 }
 0xee5   :  { %6125 = vmatpush3.bf16.msra.mxu1 %v7270_v61 }
 0xee6   :  { %6126 = vmatprep.subr.bf16.mxu1 %v6995_v55 }
 0xee9   :  { %6128 = vmatpush3.bf16.msra.mxu1 %v7280_v0 }
 0xeea   :  { %6129 = vmatprep.subr.bf16.mxu1 %v6995_v55 }
 0xf31   :  { %v1683_v5 = vpop.permute.xlu1 %1682 }
 0xf32   :  { %v1685_v7 = vmul.f32 %v6608_v3, %v1683_v5 }
 0xf34   :  { %1687 = vrot.lane.b32.xlu1 %v1685_v7, %s6997_s19 }
 0xfa6   :  { %v1688_v6 = vpop.permute.xlu1 %1687 }
 0xfa7   :  { %v7554_v8 = vadd.f32 %v1688_v6, %v1680_v60 }
 0xfa9   :  { %6609 = vtanh.f32 %v7554_v8 }
 0xfae   :  { %v2049_v9 = vpop.f32.mrb[12].mxu1 }
 0xfaf   :  { %v2051_v16 = vpop.f32.mrb[13].mxu1  ;;  %v2056_v10 = vrot.slane %v2049_v9, 2 }
 0xfb0   :  { %v2057_v17 = vrot.slane %v2051_v16, 2 }
 0xfb1   :  { %v2060_v26 = vadd.f32 %v2056_v10, %v7240_v44 }
 0xfb2   :  { %v2061_v20 = vadd.f32 %v2057_v17, %v7235_v38 }
 0xfb3   :  { %v6610_v1 = vpop.eup %6609  ;;  %v5313_v15 = vmul.f32 -1.442695, %v2060_v26 }
 0xfb4   :  { %1693 = vrot.lane.b32.xlu1 %v6610_v1, %s6997_s19  ;;  %6611 = vtanh.f32 %v2061_v20 }
 0xfb5   :  { %6613 = vpow2.f32 %v5313_v15 }
 0xfbe   :  { %v6612_v25 = vpop.eup %6611 }
 0xfbf   :  { %v6614_v4 = vpop.eup %6613 }
 0xfc0   :  { %v2068_v27 = vadd.f32 1.0, %v6614_v4 }
 0xfc2   :  { %6615 = vrcp.f32 %v2068_v27 }
 0xfcc   :  { %v6616_v32 = vpop.eup %6615 }
0x1026   :  { %v1694_v22 = vpop.permute.xlu1 %1693 }
0x1027   :  { %v1696_v23 = vmul.f32 %v6608_v3, %v1694_v22 }
0x1029   :  { %1884 = vrot.lane.b32.xlu1 %v1696_v23, %s6994_s0 }
0x102d   :  { %2080 = vrot.lane.b32.xlu1 %v6612_v25, %s6994_s0  ;;  %v6819_v25 = vld [vmem:[%s8085_s6] sm:$0x1] }
0x109b   :  { %v1885_v28 = vpop.permute.xlu1 %1884 }
0x109c   :  { %5717 = vmatmul.mubr.msk.f32.vlgmr.msra.gmra.mrb[12].mxu0 %vm455_vm4, %v1885_v28 }
0x109d   :  { %6138 = vmatpush1.bf16.msra.mxu0 %v7195_v13  ;;  %2333 = vmatprep.mubr.f32.mxu0 %v6993_v2  ;;  %v2076_v13 = vrot.slane %v7528_v42, 7 }
0x109e   :  { %6140 = vmatprep.subr.bf16.mxu0 %v7197_v14 }
0x109f   :  { %v2081_v34 = vpop.permute.xlu1 %2080  ;;  %v2078_v14 = vmul.f32 %v6616_v32, %v2076_v13 }
0x10a0   :  { %v2083_v35 = vmul.f32 %v6616_v32, %v2081_v34 }
0x10a1   :  { %6142 = vmatpush1.bf16.msra.mxu0 %v7201_v19 }
0x10a2   :  { %2085 = vrot.lane.b32.xlu1 %v2083_v35, %s6994_s0  ;;  %6144 = vmatprep.subr.bf16.mxu0 %v7204_v21 }
0x10a5   :  { %6146 = vmatpush1.bf16.msra.mxu0 %v7212_v29 }
0x10a6   :  { %6148 = vmatprep.subr.bf16.mxu0 %v7215_v30  ;;  %v5314_v30 = vmul.f32 -1.442695, %v2061_v20 }
0x10a9   :  { %6150 = vmatpush1.bf16.msra.mxu0 %v7219_v33 }
0x10aa   :  { %6151 = vmatprep.subr.bf16.mxu0 %v6995_v55 }
0x1114   :  { %v2086_v36 = vpop.permute.xlu1 %2085 }
0x1115   :  { %v7574_v37 = vadd.f32 %v2086_v36, %v2078_v14 }
0x1117   :  { %6617 = vtanh.f32 %v7574_v37  ;;  %v2362_v1 = vrot.slane %v7574_v37, 7 }
0x1121   :  { %v6618_v19 = vpop.eup %6617 }
0x1122   :  { %2091 = vrot.lane.b32.xlu1 %v6618_v19, %s6994_s0 }
0x116f   :  { %v1954_v21 = vpop.f32.mrb[12].mxu0 }
0x1170   :  { %v6432_v29 = vadd.f32 %v1954_v21, %v7339_v31  ;;  %v5718_v39 = vpop.f32.mrb[13].mxu0 }
0x1172   :  { %6619 = vtanh.f32 %v6432_v29 }
0x1173   :  { %6621 = vpow2.f32 %v5314_v30 }
0x117c   :  { %v6620_v33 = vpop.eup %6619 }
0x117d   :  { %1968 = vrot.lane.b32.xlu0 %v6620_v33, %s6997_s19  ;;  %v6622_v40 = vpop.eup %6621 }
0x117e   :  { %v2069_v41 = vadd.f32 1.0, %v6622_v40 }
0x1180   :  { %6623 = vrcp.f32 %v2069_v41 }
0x118a   :  { %v6624_v42 = vpop.eup %6623 }
0x1194   :  { %v2092_v45 = vpop.permute.xlu1 %2091 }
0x1195   :  { %v2094_v46 = vmul.f32 %v6624_v42, %v2092_v45 }
0x1197   :  { %v2096_v47 = vrot.slane %v2094_v46, 6 }
0x1199   :  { %5736 = vmatmul.mubr.msk.f32.vlgmr.msra.gmra.mrb[14].mxu1 %vm262_vm3, %v2096_v47  ;;  %5318 = vmatmul.mubr.msk.f32.vlgmr.msra.gmra.mrb[14].mxu0 %vm262_vm3, %v2096_v47 }
0x119a   :  { %6131 = vmatpush3.bf16.msra.mxu1 %v7297_v18  ;;  %5746 = vmatprep.mubr.msk.f32.mxu1 %vm6996_vm2, %v6993_v2 }
0x119b   :  { %6132 = vmatprep.subr.bf16.mxu1 %v6995_v55  ;;  %6153 = vmatpush3.bf16.msra.mxu0 %v7254_v56  ;;  %v5311_v56 = vmul.f32 -1.442695, %v6432_v29 }
0x119c   :  { %6154 = vmatprep.subr.bf16.mxu0 %v6995_v55  ;;  %5765 = vmatprep.mubr.msk.f32.mxu0 %vm6996_vm2, %v6993_v2 }
0x119d   :  { %6625 = vpow2.f32 %v5311_v56 }
0x119e   :  { %6134 = vmatpush3.bf16.msra.mxu1 %v7308_v24 }
0x119f   :  { %6156 = vmatpush3.bf16.msra.mxu0 %v7260_v58  ;;  %6169 = vmatprep.subr.bf16.mxu1 %v6995_v55 }
0x11a0   :  { %6157 = vmatprep.subr.bf16.mxu0 %v6995_v55 }
0x11a3   :  { %6159 = vmatpush3.bf16.msra.mxu0 %v7270_v61 }
0x11a4   :  { %6160 = vmatprep.subr.bf16.mxu0 %v6995_v55 }
0x11a7   :  { %6162 = vmatpush3.bf16.msra.mxu0 %v7280_v0  ;;  %v6626_v31 = vpop.eup %6625 }
0x11a8   :  { %6163 = vmatprep.subr.bf16.mxu0 %v6995_v55  ;;  %v1962_v48 = vadd.f32 1.0, %v6626_v31 }
0x11aa   :  { %6627 = vrcp.f32 %v1962_v48 }
0x11b4   :  { %v6628_v50 = vpop.eup %6627 }
0x11b5   :  { %v1966_v43 = vmul.f32 %v6628_v50, %v7554_v8 }
0x11ef   :  { %v1969_v51 = vpop.permute.xlu0 %1968 }
0x11f0   :  { %v1971_v58 = vmul.f32 %v6628_v50, %v1969_v51 }
0x11f2   :  { %1973 = vrot.lane.b32.xlu0 %v1971_v58, %s6997_s19 }
0x1264   :  { %v1974_v49 = vpop.permute.xlu0 %1973 }
0x1265   :  { %v7600_v61 = vadd.f32 %v1974_v49, %v1966_v43 }
0x1267   :  { %6629 = vtanh.f32 %v7600_v61 }
0x126c   :  { %v2335_v0 = vpop.f32.mrb[14].mxu0 }
0x126d   :  { %v2337_v52 = vpop.f32.mrb[15].mxu0  ;;  %v2342_v3 = vrot.slane %v2335_v0, 1  ;;  %v2555_v0 = vld [vmem:[#allocation9] sm:$0xff] }
0x126e   :  { %v2343_v54 = vrot.slane %v2337_v52, 1  ;;  %v2556_v52 = vld [vmem:[#allocation9 + $0x8] sm:$0xff] }
0x126f   :  { %v2346_v5 = vadd.f32 %v2342_v3, %v7240_v44  ;;  %v2636_v3 = vld [vmem:[#allocation11 + $0x8] sm:$0xff] }
0x1270   :  { %v2347_v57 = vadd.f32 %v2343_v54, %v7235_v38  ;;  %v6170_v54 = vpack.c.bf16 %v2556_v52, %v2555_v0  ;;  %v2839_v0 = vld [vmem:[#allocation14 + $0x48] sm:$0xff]  ;;  %v2841_v52 = vld [vmem:[#allocation14 + $0x58] sm:$0xff] }
0x1271   :  { %v6630_v53 = vpop.eup %6629  ;;  %v5319_v7 = vmul.f32 -1.442695, %v2346_v5 }
0x1272   :  { %1979 = vrot.lane.b32.xlu0 %v6630_v53, %s6997_s19  ;;  %6631 = vtanh.f32 %v2347_v57  ;;  %v5320_v15 = vmul.f32 -1.442695, %v2347_v57  ;;  %v2557_v53 = vld [vmem:[#allocation9 + $0x10] sm:$0xff]  ;;  %v2558_v57 = vld [vmem:[#allocation9 + $0x18] sm:$0xff] }
0x1273   :  { %6633 = vpow2.f32 %v5319_v7  ;;  %v2637_v7 = vld [vmem:[#allocation11 + $0x10] sm:$0xff] }
0x127c   :  { %v6632_v59 = vpop.eup %6631 }
0x127d   :  { %v6634_v60 = vpop.eup %6633 }
0x127e   :  { %v2354_v6 = vadd.f32 1.0, %v6634_v60  ;;  %v2638_v60 = vld [vmem:[#allocation11 + $0x18] sm:$0xff] }
0x1280   :  { %6635 = vrcp.f32 %v2354_v6  ;;  %v7641_v6 = vpack.c.bf16 %v2638_v60, %v2637_v7  ;;  %v2842_v60 = vld [vmem:[#allocation14 + $0x60] sm:$0xff] }
0x128a   :  { %v6636_v38 = vpop.eup %6635 }
0x128b   :  { %v2364_v17 = vmul.f32 %v6636_v38, %v2362_v1 }
0x12e4   :  { %v1980_v62 = vpop.permute.xlu0 %1979 }
0x12e5   :  { %v1982_v63 = vmul.f32 %v6628_v50, %v1980_v62  ;;  %v6173_v62 = vpack.c.bf16 %v2558_v57, %v2557_v53  ;;  %v2838_v57 = vld [vmem:[#allocation14 + $0x40] sm:$0xff] }
0x12e7   :  { %2170 = vrot.lane.b32.xlu0 %v1982_v63, %s6994_s0 }
0x12eb   :  { %2366 = vrot.lane.b32.xlu0 %v6632_v59, %s6994_s0  ;;  %v2635_v59 = vld [vmem:[#allocation11] sm:$0xff] }
0x12ec   :  { %v7637_v5 = vpack.c.bf16 %v2636_v3, %v2635_v59  ;;  %v2845_v59 = vld [vmem:[#allocation14 + $0x78] sm:$0xff] }
0x1359   :  { %v2171_v8 = vpop.permute.xlu0 %2170 }
0x135a   :  { %5747 = vmatmul.mubr.msk.f32.vlgmr.msra.gmra.mrb[14].mxu1 %vm455_vm4, %v2171_v8 }
0x135b   :  { %5787 = vmatprep.mubr.msk.f32.mxu1 %vm6996_vm2, %v6993_v2  ;;  %6171 = vmatpush3.bf16.msra.mxu1 %v6170_v54  ;;  %v7693_v54 = vpack.c.bf16 %v2841_v52, %v2839_v0 }
0x135c   :  { %6172 = vmatprep.subr.bf16.mxu1 %v6995_v55 }
0x135d   :  { %v2367_v9 = vpop.permute.xlu0 %2366 }
0x135e   :  { %v2369_v16 = vmul.f32 %v6636_v38, %v2367_v9 }
0x135f   :  { %6174 = vmatpush3.bf16.msra.mxu1 %v6173_v62  ;;  %v2840_v62 = vld [vmem:[#allocation14 + $0x50] sm:$0xff] }
0x1360   :  { %2371 = vrot.lane.b32.xlu0 %v2369_v16, %s6994_s0  ;;  %6175 = vmatprep.subr.bf16.mxu1 %v6995_v55  ;;  %v7699_v3 = vpack.c.bf16 %v2840_v62, %v2838_v57 }
0x13d2   :  { %v2372_v44 = vpop.permute.xlu0 %2371 }
0x13d3   :  { %v2374_v20 = vadd.f32 %v2372_v44, %v2364_v17  ;;  %v2559_v17 = vld [vmem:[%s8088_s9] sm:$0x1] }
0x13d5   :  { %6637 = vtanh.f32 %v2374_v20 }
0x13df   :  { %v6638_v22 = vpop.eup %6637 }
0x13e0   :  { %2377 = vrot.lane.b32.xlu0 %v6638_v22, %s6994_s0 }
0x142d   :  { %v2240_v23 = vpop.f32.mrb[14].mxu1 }
0x142e   :  { %v6433_v10 = vadd.f32 %v6819_v25, %v2240_v23  ;;  %v5748_v26 = vpop.f32.mrb[15].mxu1 }
0x1430   :  { %6639 = vtanh.f32 %v6433_v10  ;;  %v5317_v14 = vmul.f32 -1.442695, %v6433_v10 }
0x1431   :  { %6641 = vpow2.f32 %v5320_v15 }
0x143a   :  { %v6640_v4 = vpop.eup %6639 }
0x143b   :  { %2254 = vrot.lane.b32.xlu1 %v6640_v4, %s6997_s19  ;;  %v6642_v27 = vpop.eup %6641 }
0x143c   :  { %v2355_v28 = vadd.f32 1.0, %v6642_v27 }
0x143e   :  { %6643 = vrcp.f32 %v2355_v28 }
0x143f   :  { %6645 = vpow2.f32 %v5317_v14  ;;  %v2737_v14 = vld [vmem:[#allocation12 + $0x18] sm:$0xff] }
0x1448   :  { %v6644_v32 = vpop.eup %6643 }
0x1449   :  { %v6646_v36 = vpop.eup %6645 }
0x144a   :  { %v2248_v37 = vadd.f32 1.0, %v6646_v36  ;;  %v2734_v36 = vld [vmem:[#allocation12] sm:$0xff] }
0x144c   :  { %6647 = vrcp.f32 %v2248_v37 }
0x1452   :  { %v2378_v34 = vpop.permute.xlu0 %2377 }
0x1453   :  { %v2380_v35 = vmul.f32 %v6644_v32, %v2378_v34 }
0x1455   :  { %v2382_v13 = vrot.slane %v2380_v35, 7 }
0x1456   :  { %v6648_v19 = vpop.eup %6647 }
0x1457   :  { %5766 = vmatmul.mubr.msk.f32.vlgmr.msra.gmra.mrb[16].mxu0 %vm262_vm3, %v2382_v13  ;;  %v2735_v13 = vld [vmem:[#allocation12 + $0x8] sm:$0xff] }
0x1458   :  { %6165 = vmatpush3.bf16.msra.mxu0 %v7297_v18  ;;  %5776 = vmatprep.mubr.msk.f32.mxu0 %vm6996_vm2, %v6993_v2  ;;  %v2252_v18 = vmul.f32 %v6648_v19, %v7600_v61  ;;  %v7664_v37 = vpack.c.bf16 %v2737_v14, %v2735_v13 }
0x1459   :  { %6166 = vmatprep.subr.bf16.mxu0 %v6995_v55 }
0x145c   :  { %6168 = vmatpush3.bf16.msra.mxu0 %v7308_v24 }
0x145d   :  { %6205 = vmatprep.subr.bf16.mxu0 %v6995_v55 }
0x14ad   :  { %v2255_v21 = vpop.permute.xlu1 %2254 }
0x14ae   :  { %v2257_v29 = vmul.f32 %v6648_v19, %v2255_v21  ;;  %v2739_v21 = vld [vmem:[#allocation12 + $0x28] sm:$0xff] }
0x14b0   :  { %2259 = vrot.lane.b32.xlu1 %v2257_v29, %s6997_s19  ;;  %v2741_v29 = vld [vmem:[#allocation12 + $0x38] sm:$0xff] }
0x1522   :  { %v2260_v39 = vpop.permute.xlu1 %2259 }
0x1523   :  { %v2262_v30 = vadd.f32 %v2260_v39, %v2252_v18  ;;  %v7668_v39 = vpack.c.bf16 %v2741_v29, %v2739_v21 }
0x1525   :  { %6649 = vtanh.f32 %v2262_v30 }
0x152f   :  { %v6650_v33 = vpop.eup %6649 }
0x1530   :  { %2265 = vrot.lane.b32.xlu1 %v6650_v33, %s6997_s19  ;;  %v2740_v33 = vld [vmem:[#allocation12 + $0x30] sm:$0xff] }
0x15a2   :  { %v2266_v24 = vpop.permute.xlu1 %2265 }
0x15a3   :  { %v2268_v40 = vmul.f32 %v6648_v19, %v2266_v24  ;;  %v2736_v19 = vld [vmem:[#allocation12 + $0x10] sm:$0xff]  ;;  %v2831_v24 = vld [vmem:[#allocation14 + $0x8] sm:$0xff] }
0x15a4   :  { %v7666_v18 = vpack.c.bf16 %v2736_v19, %v2734_v36 }
0x15a5   :  { %2456 = vrot.lane.b32.xlu1 %v2268_v40, %s6994_s0  ;;  %v2833_v40 = vld [vmem:[#allocation14 + $0x18] sm:$0xff] }
0x1617   :  { %v2457_v41 = vpop.permute.xlu1 %2456 }
0x1618   :  { %5777 = vmatmul.mubr.msk.f32.vlgmr.msra.gmra.mrb[16].mxu0 %vm455_vm4, %v2457_v41 }
0x1619   :  { %5809 = vmatprep.mubr.msk.f32.mxu0 %vm6996_vm2, %v6993_v2  ;;  %6207 = vmatpush3.bf16.msra.mxu0 %v7637_v5 }
0x161a   :  { %6208 = vmatprep.subr.bf16.mxu0 %v6995_v55 }
0x161d   :  { %6210 = vmatpush3.bf16.msra.mxu0 %v7641_v6 }
0x161e   :  { %6212 = vmatprep.subr.bf16.mxu0 %v7664_v37 }
0x16eb   :  { %v2526_v42 = vpop.f32.mrb[16].mxu0 }
0x16ec   :  { %v6434_v45 = vadd.f32 %v6819_v25, %v2526_v42  ;;  %v5778_v46 = vpop.f32.mrb[17].mxu0  ;;  %v7676_v42 = vpack.c.bf16 %v2833_v40, %v2831_v24 }
0x16ee   :  { %6651 = vtanh.f32 %v6434_v45  ;;  %v5323_v56 = vmul.f32 -1.442695, %v6434_v45 }
0x16f0   :  { %6653 = vpow2.f32 %v5323_v56  ;;  %v2830_v56 = vld [vmem:[#allocation14] sm:$0xff] }
0x16f8   :  { %v6652_v47 = vpop.eup %6651 }
0x16f9   :  { %2540 = vrot.lane.b32.xlu0 %v6652_v47, %s6997_s19 }
0x16fa   :  { %v6654_v31 = vpop.eup %6653 }
0x16fb   :  { %v2534_v48 = vadd.f32 1.0, %v6654_v31  ;;  %v2832_v31 = vld [vmem:[#allocation14 + $0x10] sm:$0xff] }
0x16fd   :  { %6655 = vrcp.f32 %v2534_v48  ;;  %v2835_v48 = vld [vmem:[#allocation14 + $0x28] sm:$0xff] }
0x1707   :  { %v6656_v50 = vpop.eup %6655 }
0x1708   :  { %v2538_v43 = vmul.f32 %v6656_v50, %v2262_v30  ;;  %v2738_v30 = vld [vmem:[#allocation12 + $0x20] sm:$0xff] }
0x1709   :  { %v7673_v41 = vpack.c.bf16 %v2740_v33, %v2738_v30 }
0x176b   :  { %v2541_v51 = vpop.permute.xlu0 %2540 }
0x176c   :  { %v2543_v58 = vmul.f32 %v6656_v50, %v2541_v51  ;;  %v7682_v51 = vpack.c.bf16 %v2832_v31, %v2830_v56 }
0x176e   :  { %2545 = vrot.lane.b32.xlu1 %v2543_v58, %s6997_s19 }
0x17e0   :  { %v2546_v49 = vpop.permute.xlu1 %2545 }
0x17e1   :  { %v2548_v61 = vadd.f32 %v2546_v49, %v2538_v43  ;;  %v2834_v43 = vld [vmem:[#allocation14 + $0x20] sm:$0xff]  ;;  %v2836_v49 = vld [vmem:[#allocation14 + $0x30] sm:$0xff] }
0x17e2   :  { %v7689_v53 = vpack.c.bf16 %v2836_v49, %v2834_v43 }
0x17e3   :  { %6657 = vtanh.f32 %v2548_v61 }
0x17ed   :  { %v6658_v63 = vpop.eup %6657 }
0x17ee   :  { %2551 = vrot.lane.b32.xlu0 %v6658_v63, %s6997_s19  ;;  %v2843_v63 = vld [vmem:[#allocation14 + $0x68] sm:$0xff] }
0x17ef   :  { %v7702_v7 = vpack.c.bf16 %v2845_v59, %v2843_v63 }
0x1860   :  { %v2552_v8 = vpop.permute.xlu0 %2551 }
0x1861   :  { %v2554_v38 = vmul.f32 %v6656_v50, %v2552_v8  ;;  %v2837_v50 = vld [vmem:[#allocation14 + $0x38] sm:$0xff]  ;;  %v2844_v8 = vld [vmem:[#allocation14 + $0x70] sm:$0xff] }
0x1862   :  { %v7684_v58 = vpack.c.bf16 %v2837_v50, %v2835_v48 }
0x1863   :  { %2561 = vrot.lane.b32.xlu1 %v2554_v38, %s6994_s0  ;;  %v7707_v38 = vpack.c.bf16 %v2844_v8, %v2842_v60 }
0x18d5   :  { %v2562_v9 = vpop.permute.xlu1 %2561 }
0x18d6   :  { %5788 = vmatmul.mubr.msk.f32.vlgmr.msra.gmra.mrb[16].mxu1 %vm455_vm4, %v2562_v9 }
0x18d7   :  { %6177 = vmatpush3.bf16.msra.mxu1 %v7637_v5  ;;  %5798 = vmatprep.mubr.msk.f32.mxu1 %vm6996_vm2, %v6993_v2 }
0x18d8   :  { %6178 = vmatprep.subr.bf16.mxu1 %v6995_v55 }
0x18db   :  { %6180 = vmatpush3.bf16.msra.mxu1 %v7641_v6 }
0x18dc   :  { %6182 = vmatprep.subr.bf16.mxu1 %v7664_v37 }
0x18de   :  { %5799 = vmatmul.mubr.f32.vlgmr.msra.gmra.mrb[18].mxu1 %v6993_v2 }
0x18df   :  { %2823 = vmatprep.mubr.f32.mxu1 %v6993_v2  ;;  %6184 = vmatpush1.bf16.msra.mxu1 %v7666_v18 }
0x18e0   :  { %6186 = vmatprep.subr.bf16.mxu1 %v7668_v39 }
0x18e3   :  { %6188 = vmatpush1.bf16.msra.mxu1 %v7673_v41 }
0x18e4   :  { %6190 = vmatprep.subr.bf16.mxu1 %v7676_v42 }
0x19a9   :  { %v2631_v16 = vpop.f32.mrb[16].mxu1 }
0x19aa   :  { %v5789_v1 = vpop.f32.mrb[17].mxu1  ;;  %v7656_v44 = vadd.f32 %v2631_v16, %v2559_v17  ;;  %v2742_v17 = vld [vmem:[%s8091_s12] sm:$0x3] }
0x19b1   :  { %v2705_v20 = vpop.f32.mrb[18].mxu1 }
0x19b2   :  { %v2709_v22 = vadd.f32 %v2705_v20, %v7656_v44  ;;  %v5800_v23 = vpop.f32.mrb[19].mxu1 }
0x19b4   :  { %6659 = vtanh.f32 %v2709_v22  ;;  %v5325_v10 = vmul.f32 -1.442695, %v2709_v22  ;;  %v2750_v22 = vrot.slane %v2742_v17, %v7191_v11 }
0x19b6   :  { %6661 = vpow2.f32 %v5325_v10 }
0x19be   :  { %v6660_v25 = vpop.eup %6659 }
0x19bf   :  { %2719 = vrot.lane.b32.xlu0 %v6660_v25, %s6997_s19 }
0x19c0   :  { %v6662_v26 = vpop.eup %6661 }
0x19c1   :  { %v2713_v15 = vadd.f32 1.0, %v6662_v26 }
0x19c3   :  { %6663 = vrcp.f32 %v2713_v15 }
0x19cd   :  { %v6664_v4 = vpop.eup %6663 }
0x19ce   :  { %v2717_v32 = vmul.f32 0.0, %v6664_v4 }
0x1a31   :  { %v2720_v27 = vpop.permute.xlu0 %2719 }
0x1a32   :  { %v2722_v28 = vmul.f32 %v6664_v4, %v2720_v27 }
0x1a34   :  { %2724 = vrot.lane.b32.xlu1 %v2722_v28, %s6997_s19 }
0x1aa6   :  { %v2725_v34 = vpop.permute.xlu1 %2724 }
0x1aa7   :  { %v7661_v35 = vadd.f32 %v2725_v34, %v2717_v32  ;;  %v2754_v34 = vrot.slane %v2742_v17, %v7193_v12 }
0x1aa9   :  { %6665 = vtanh.f32 %v7661_v35 }
0x1ab3   :  { %v6666_v45 = vpop.eup %6665 }
0x1ab4   :  { %2730 = vrot.lane.b32.xlu0 %v6666_v45, %s6997_s19 }
0x1b26   :  { %v2731_v46 = vpop.permute.xlu0 %2730 }
0x1b27   :  { %v2733_v47 = vmul.f32 %v6664_v4, %v2731_v46 }
0x1b29   :  { %2744 = vrot.lane.b32.xlu1 %v2733_v47, %s6994_s0 }
0x1b9b   :  { %v2745_v61 = vpop.permute.xlu1 %2744 }
0x1b9c   :  { %5326 = vmatmul.mubr.msk.f32.vlgmr.msra.gmra.mrb[20].mxu1 %vm455_vm4, %v2745_v61  ;;  %5810 = vmatmul.mubr.msk.f32.vlgmr.msra.gmra.mrb[18].mxu0 %vm455_vm4, %v2745_v61 }
0x1b9d   :  { %6192 = vmatpush1.bf16.msra.mxu1 %v7682_v51  ;;  %2910 = vmatprep.mubr.f32.mxu1 %v6993_v2 }
0x1b9e   :  { %6194 = vmatprep.subr.bf16.mxu1 %v7684_v58  ;;  %6214 = vmatpush1.bf16.msra.mxu0 %v7666_v18 }
0x1b9f   :  { %6216 = vmatprep.subr.bf16.mxu0 %v7668_v39  ;;  %3139 = vmatprep.mubr.f32.mxu0 %v6993_v2 }
0x1ba1   :  { %6196 = vmatpush1.bf16.msra.mxu1 %v7689_v53 }
0x1ba2   :  { %6198 = vmatprep.subr.bf16.mxu1 %v7693_v54  ;;  %6218 = vmatpush1.bf16.msra.mxu0 %v7673_v41 }
0x1ba3   :  { %6220 = vmatprep.subr.bf16.mxu0 %v7676_v42 }
0x1ba5   :  { %6200 = vmatpush1.bf16.msra.mxu1 %v7699_v3 }
0x1ba6   :  { %6202 = vmatprep.subr.bf16.mxu1 %v7702_v7 }
0x1ba9   :  { %6204 = vmatpush1.bf16.msra.mxu1 %v7707_v38 }
0x1baa   :  { %6235 = vmatprep.subr.bf16.mxu1 %v6995_v55 }
0x1bac   :  { %2911 = vmatmul.mubr.f32.vlgmr.msra.gmra.mrb[20].mxu1 %v6993_v2 }
0x1bad   :  { %6237 = vmatpush3.bf16.msra.mxu1 %v7637_v5  ;;  %5820 = vmatprep.mubr.msk.f32.mxu1 %vm6996_vm2, %v6993_v2 }
0x1bae   :  { %6238 = vmatprep.subr.bf16.mxu1 %v6995_v55 }
0x1bb1   :  { %6240 = vmatpush3.bf16.msra.mxu1 %v7641_v6 }
0x1bb2   :  { %6242 = vmatprep.subr.bf16.mxu1 %v7664_v37 }
0x1c6f   :  { %v3021_v9 = vpop.f32.mrb[18].mxu0 }
0x1c70   :  { %v3025_v16 = vadd.f32 %v3021_v9, %v7656_v44  ;;  %v5811_v1 = vpop.f32.mrb[19].mxu0 }
0x1c72   :  { %6667 = vtanh.f32 %v3025_v16  ;;  %v5330_v26 = vmul.f32 -1.442695, %v3025_v16 }
0x1c74   :  { %6669 = vpow2.f32 %v5330_v26 }
0x1c7c   :  { %v6668_v20 = vpop.eup %6667 }
0x1c7d   :  { %3035 = vrot.lane.b32.xlu0 %v6668_v20, %s6997_s19 }
0x1c7e   :  { %v6670_v15 = vpop.eup %6669 }
0x1c7f   :  { %v2912_v23 = vpop.f32.mrb[20].mxu1  ;;  %v3029_v4 = vadd.f32 1.0, %v6670_v15 }
0x1c80   :  { %v6435_v25 = vadd.f32 %v2912_v23, %v2750_v22  ;;  %v2914_v10 = vpop.f32.mrb[21].mxu1  ;;  %v3058_v22 = vld [vmem:[%s8091_s12] sm:$0x3] }
0x1c81   :  { %6671 = vrcp.f32 %v3029_v4  ;;  %v6436_v19 = vadd.f32 %v2914_v10, %v2754_v34  ;;  %v3070_v4 = vrot.slane %v3058_v22, %v7193_v12 }
0x1c82   :  { %v5327_v30 = vmul.f32 -1.442695, %v6435_v25  ;;  %v3066_v25 = vrot.slane %v3058_v22, %v7191_v11 }
0x1c83   :  { %v5328_v49 = vmul.f32 -1.442695, %v6436_v19 }
0x1c8b   :  { %v6672_v27 = vpop.eup %6671 }
0x1c8c   :  { %v3033_v13 = vmul.f32 %v6672_v27, %v7661_v35 }
0x1cef   :  { %v3036_v28 = vpop.permute.xlu0 %3035 }
0x1cf0   :  { %v3038_v32 = vmul.f32 %v6672_v27, %v3036_v28 }
0x1cf2   :  { %3040 = vrot.lane.b32.xlu1 %v3038_v32, %s6997_s19 }
0x1d64   :  { %v3041_v14 = vpop.permute.xlu1 %3040 }
0x1d65   :  { %v7728_v36 = vadd.f32 %v3041_v14, %v3033_v13 }
0x1d67   :  { %6673 = vtanh.f32 %v7728_v36 }
0x1d68   :  { %6675 = vtanh.f32 %v6436_v19 }
0x1d69   :  { %6677 = vpow2.f32 %v5327_v30 }
0x1d71   :  { %v6674_v21 = vpop.eup %6673 }
0x1d72   :  { %3046 = vrot.lane.b32.xlu0 %v6674_v21, %s6997_s19  ;;  %v6676_v29 = vpop.eup %6675 }
0x1d73   :  { %v6678_v33 = vpop.eup %6677 }
0x1d74   :  { %v2925_v24 = vadd.f32 1.0, %v6678_v33 }
0x1d76   :  { %2934 = vrot.lane.b32.xlu0 %v6676_v29, %s6994_s0  ;;  %6679 = vrcp.f32 %v2925_v24 }
0x1d80   :  { %v6680_v45 = vpop.eup %6679 }
0x1d81   :  { %v2932_v31 = vmul.f32 0.0, %v6680_v45 }
0x1de4   :  { %v3047_v40 = vpop.permute.xlu0 %3046 }
0x1de5   :  { %v3049_v35 = vmul.f32 %v6672_v27, %v3047_v40 }
0x1de7   :  { %3060 = vrot.lane.b32.xlu1 %v3049_v35, %s6994_s0 }
0x1de8   :  { %v2935_v46 = vpop.permute.xlu0 %2934 }
0x1de9   :  { %v2937_v47 = vmul.f32 %v6680_v45, %v2935_v46 }
0x1deb   :  { %2939 = vrot.lane.b32.xlu0 %v2937_v47, %s6994_s0 }
0x1e59   :  { %v3061_v56 = vpop.permute.xlu1 %3060 }
0x1e5a   :  { %5331 = vmatmul.mubr.msk.f32.vlgmr.msra.gmra.mrb[20].mxu0 %vm455_vm4, %v3061_v56  ;;  %5821 = vmatmul.mubr.msk.f32.vlgmr.msra.gmra.mrb[22].mxu1 %vm455_vm4, %v3061_v56 }
0x1e5b   :  { %6222 = vmatpush1.bf16.msra.mxu0 %v7682_v51  ;;  %3229 = vmatprep.mubr.f32.mxu0 %v6993_v2 }
0x1e5c   :  { %6224 = vmatprep.subr.bf16.mxu0 %v7684_v58  ;;  %6244 = vmatpush1.bf16.msra.mxu1 %v7666_v18 }
0x1e5d   :  { %v2940_v48 = vpop.permute.xlu0 %2939  ;;  %6246 = vmatprep.subr.bf16.mxu1 %v7668_v39  ;;  %3457 = vmatprep.mubr.f32.mxu1 %v6993_v2 }
0x1e5e   :  { %v7743_v50 = vadd.f32 %v2940_v48, %v2932_v31 }
0x1e5f   :  { %6226 = vmatpush1.bf16.msra.mxu0 %v7689_v53 }
0x1e60   :  { %6681 = vtanh.f32 %v7743_v50  ;;  %6228 = vmatprep.subr.bf16.mxu0 %v7693_v54  ;;  %6248 = vmatpush1.bf16.msra.mxu1 %v7673_v41 }
0x1e61   :  { %6250 = vmatprep.subr.bf16.mxu1 %v7676_v42  ;;  %6683 = vpow2.f32 %v5328_v49 }
0x1e63   :  { %6230 = vmatpush1.bf16.msra.mxu0 %v7699_v3 }
0x1e64   :  { %6232 = vmatprep.subr.bf16.mxu0 %v7702_v7 }
0x1e67   :  { %6234 = vmatpush1.bf16.msra.mxu0 %v7707_v38 }
0x1e68   :  { %6265 = vmatprep.subr.bf16.mxu0 %v6995_v55 }
0x1e6a   :  { %v6682_v43 = vpop.eup %6681 }
0x1e6b   :  { %2945 = vrot.lane.b32.xlu0 %v6682_v43, %s6994_s0  ;;  %v6684_v61 = vpop.eup %6683 }
0x1e6c   :  { %v2926_v0 = vadd.f32 1.0, %v6684_v61 }
0x1e6e   :  { %6685 = vrcp.f32 %v2926_v0 }
0x1e78   :  { %v6686_v52 = vpop.eup %6685 }
0x1edd   :  { %v2946_v57 = vpop.permute.xlu0 %2945 }
0x1ede   :  { %v2948_v62 = vmul.f32 %v6686_v52, %v2946_v57 }
0x1ee0   :  { %2950 = vst.msk [vmem:[#allocation2] sm:$0x1] %vm2949_vm5, %v2948_v62  ;;  %5332 = vmatmul.mubr.msk.f32.vlgmr.msra.gmra.mrb[20].mxu0 %vm262_vm3, %v2948_v62 }
0x1ee1   :  { %6267 = vmatpush3.bf16.msra.mxu0 %v7637_v5  ;;  %5831 = vmatprep.mubr.msk.f32.mxu0 %vm6996_vm2, %v6993_v2 }
0x1ee2   :  { %6268 = vmatprep.subr.bf16.mxu0 %v6995_v55 }
0x1ee5   :  { %6270 = vmatpush3.bf16.msra.mxu0 %v7641_v6 }
0x1ee6   :  { %6272 = vmatprep.subr.bf16.mxu0 %v7664_v37 }
0x1f2d   :  { %v3339_v63 = vpop.f32.mrb[22].mxu1 }
0x1f2e   :  { %v3343_v59 = vadd.f32 %v3339_v63, %v7656_v44  ;;  %v5822_v60 = vpop.f32.mrb[23].mxu1 }
0x1f30   :  { %6687 = vtanh.f32 %v3343_v59  ;;  %v5336_v9 = vmul.f32 -1.442695, %v3343_v59 }
0x1f32   :  { %6689 = vpow2.f32 %v5336_v9 }
0x1f3a   :  { %v6688_v8 = vpop.eup %6687 }
0x1f3b   :  { %3353 = vrot.lane.b32.xlu1 %v6688_v8, %s6997_s19 }
0x1f3c   :  { %v6690_v16 = vpop.eup %6689 }
0x1f3d   :  { %v3347_v1 = vadd.f32 1.0, %v6690_v16  ;;  %v3376_v16 = vld [vmem:[%s8091_s12] sm:$0x3] }
0x1f3f   :  { %6691 = vrcp.f32 %v3347_v1  ;;  %v3384_v1 = vrot.slane %v3376_v16, %v7191_v11 }
0x1f49   :  { %v6692_v17 = vpop.eup %6691 }
0x1f4a   :  { %v3351_v27 = vmul.f32 %v6692_v17, %v7728_v36 }
0x1fad   :  { %v3354_v20 = vpop.permute.xlu1 %3353 }
0x1fae   :  { %v3356_v23 = vmul.f32 %v6692_v17, %v3354_v20 }
0x1fb0   :  { %3358 = vrot.lane.b32.xlu1 %v3356_v23, %s6997_s19  ;;  %v3388_v23 = vrot.slane %v3376_v16, %v7193_v12 }
0x1fb3   :  { %v3231_v10 = vpop.f32.mrb[20].mxu0 }
0x1fb4   :  { %v6437_v26 = vadd.f32 %v3231_v10, %v3066_v25  ;;  %v3233_v15 = vpop.f32.mrb[21].mxu0 }
0x1fb5   :  { %v6438_v34 = vadd.f32 %v3233_v15, %v3070_v4 }
0x1fb6   :  { %v5333_v19 = vmul.f32 -1.442695, %v6437_v26 }
0x1fb7   :  { %v5334_v31 = vmul.f32 -1.442695, %v6438_v34 }
0x2022   :  { %v3359_v28 = vpop.permute.xlu1 %3358 }
0x2023   :  { %v7772_v32 = vadd.f32 %v3359_v28, %v3351_v27 }
0x2025   :  { %6693 = vtanh.f32 %v7772_v32 }
0x2026   :  { %6695 = vtanh.f32 %v6438_v34 }
0x2027   :  { %6697 = vpow2.f32 %v5333_v19 }
0x202f   :  { %v6694_v13 = vpop.eup %6693 }
0x2030   :  { %3364 = vrot.lane.b32.xlu1 %v6694_v13, %s6997_s19  ;;  %v6696_v14 = vpop.eup %6695 }
0x2031   :  { %v6698_v21 = vpop.eup %6697 }
0x2032   :  { %v3244_v29 = vadd.f32 1.0, %v6698_v21 }
0x2034   :  { %3253 = vrot.lane.b32.xlu1 %v6696_v14, %s6994_s0  ;;  %6699 = vrcp.f32 %v3244_v29 }
0x203e   :  { %v6700_v33 = vpop.eup %6699 }
0x203f   :  { %v3251_v45 = vmul.f32 %v6700_v33, %v7743_v50 }
0x20a2   :  { %v3365_v30 = vpop.permute.xlu1 %3364 }
0x20a3   :  { %v3367_v36 = vmul.f32 %v6692_v17, %v3365_v30 }
0x20a5   :  { %3378 = vrot.lane.b32.xlu0 %v3367_v36, %s6994_s0 }
0x20a6   :  { %v3254_v24 = vpop.permute.xlu1 %3253 }
0x20a7   :  { %v3256_v40 = vmul.f32 %v6700_v33, %v3254_v24 }
0x20a9   :  { %3258 = vrot.lane.b32.xlu0 %v3256_v40, %s6994_s0 }
0x2117   :  { %v3379_v35 = vpop.permute.xlu0 %3378 }
0x2118   :  { %5337 = vmatmul.mubr.msk.f32.vlgmr.msra.gmra.mrb[24].mxu1 %vm455_vm4, %v3379_v35  ;;  %5832 = vmatmul.mubr.msk.f32.vlgmr.msra.gmra.mrb[22].mxu0 %vm455_vm4, %v3379_v35 }
0x2119   :  { %6252 = vmatpush1.bf16.msra.mxu1 %v7682_v51  ;;  %3547 = vmatprep.mubr.f32.mxu1 %v6993_v2 }
0x211a   :  { %6254 = vmatprep.subr.bf16.mxu1 %v7684_v58  ;;  %6274 = vmatpush1.bf16.msra.mxu0 %v7666_v18 }
0x211b   :  { %v3259_v46 = vpop.permute.xlu0 %3258  ;;  %6276 = vmatprep.subr.bf16.mxu0 %v7668_v39  ;;  %3775 = vmatprep.mubr.f32.mxu0 %v6993_v2 }
0x211c   :  { %v7788_v47 = vadd.f32 %v3259_v46, %v3251_v45 }
0x211d   :  { %6256 = vmatpush1.bf16.msra.mxu1 %v7689_v53 }
0x211e   :  { %6701 = vtanh.f32 %v7788_v47  ;;  %6258 = vmatprep.subr.bf16.mxu1 %v7693_v54  ;;  %6278 = vmatpush1.bf16.msra.mxu0 %v7673_v41 }
0x211f   :  { %6280 = vmatprep.subr.bf16.mxu0 %v7676_v42  ;;  %6703 = vpow2.f32 %v5334_v31 }
0x2121   :  { %6260 = vmatpush1.bf16.msra.mxu1 %v7699_v3 }
0x2122   :  { %6262 = vmatprep.subr.bf16.mxu1 %v7702_v7 }
0x2125   :  { %6264 = vmatpush1.bf16.msra.mxu1 %v7707_v38 }
0x2126   :  { %6295 = vmatprep.subr.bf16.mxu1 %v6995_v55 }
0x2128   :  { %v6702_v56 = vpop.eup %6701 }
0x2129   :  { %3264 = vrot.lane.b32.xlu0 %v6702_v56, %s6994_s0  ;;  %v6704_v48 = vpop.eup %6703 }
0x212a   :  { %v3245_v50 = vadd.f32 1.0, %v6704_v48 }
0x212c   :  { %6705 = vrcp.f32 %v3245_v50 }
0x2136   :  { %v6706_v43 = vpop.eup %6705 }
0x219b   :  { %v3265_v49 = vpop.permute.xlu0 %3264 }
0x219c   :  { %v3267_v61 = vmul.f32 %v6706_v43, %v3265_v49 }
0x219e   :  { %3268 = vst.msk [vmem:[#allocation2 + $0x1] sm:$0x1] %vm2949_vm5, %v3267_v61  ;;  %5338 = vmatmul.mubr.msk.f32.vlgmr.msra.gmra.mrb[24].mxu1 %vm262_vm3, %v3267_v61  ;;  %v3694_v61 = vld [vmem:[%s8091_s12] sm:$0x3] }
0x219f   :  { %6297 = vmatpush3.bf16.msra.mxu1 %v7637_v5  ;;  %5842 = vmatprep.mubr.msk.f32.mxu1 %vm6996_vm2, %v6993_v2 }
0x21a0   :  { %6298 = vmatprep.subr.bf16.mxu1 %v6995_v55 }
0x21a3   :  { %6300 = vmatpush3.bf16.msra.mxu1 %v7641_v6 }
0x21a4   :  { %6302 = vmatprep.subr.bf16.mxu1 %v7664_v37 }
0x21eb   :  { %v3657_v0 = vpop.f32.mrb[22].mxu0 }
0x21ec   :  { %v3661_v52 = vadd.f32 %v3657_v0, %v7656_v44  ;;  %v5833_v57 = vpop.f32.mrb[23].mxu0  ;;  %v3702_v0 = vrot.slane %v3694_v61, %v7191_v11 }
0x21ee   :  { %6707 = vtanh.f32 %v3661_v52  ;;  %v5342_v63 = vmul.f32 -1.442695, %v3661_v52 }
0x21f0   :  { %6709 = vpow2.f32 %v5342_v63  ;;  %v3706_v63 = vrot.slane %v3694_v61, %v7193_v12 }
0x21f8   :  { %v6708_v62 = vpop.eup %6707 }
0x21f9   :  { %3671 = vrot.lane.b32.xlu1 %v6708_v62, %s6997_s19 }
0x21fa   :  { %v6710_v59 = vpop.eup %6709 }
0x21fb   :  { %v3665_v60 = vadd.f32 1.0, %v6710_v59 }
0x21fd   :  { %6711 = vrcp.f32 %v3665_v60 }
0x2207   :  { %v6712_v8 = vpop.eup %6711 }
0x2208   :  { %v3669_v25 = vmul.f32 %v6712_v8, %v7772_v32 }
0x226b   :  { %v3672_v9 = vpop.permute.xlu1 %3671 }
0x226c   :  { %v3674_v37 = vmul.f32 %v6712_v8, %v3672_v9 }
0x226e   :  { %3676 = vrot.lane.b32.xlu1 %v3674_v37, %s6997_s19 }
0x2271   :  { %v3549_v17 = vpop.f32.mrb[24].mxu1 }
0x2272   :  { %v6439_v20 = vadd.f32 %v3549_v17, %v3384_v1  ;;  %v3551_v22 = vpop.f32.mrb[25].mxu1 }
0x2273   :  { %v6440_v15 = vadd.f32 %v3551_v22, %v3388_v23 }
0x2274   :  { %v5339_v28 = vmul.f32 -1.442695, %v6439_v20 }
0x22e0   :  { %v3677_v10 = vpop.permute.xlu1 %3676 }
0x22e1   :  { %v7817_v26 = vadd.f32 %v3677_v10, %v3669_v25 }
0x22e3   :  { %6713 = vtanh.f32 %v7817_v26 }
0x22e4   :  { %6715 = vtanh.f32 %v6440_v15 }
0x22e5   :  { %6717 = vpow2.f32 %v5339_v28 }
0x22ed   :  { %v6714_v4 = vpop.eup %6713 }
0x22ee   :  { %3682 = vrot.lane.b32.xlu0 %v6714_v4, %s6997_s19  ;;  %v6716_v27 = vpop.eup %6715 }
0x22ef   :  { %v6718_v34 = vpop.eup %6717 }
0x22f0   :  { %v3562_v13 = vadd.f32 1.0, %v6718_v34 }
0x22f2   :  { %3571 = vrot.lane.b32.xlu0 %v6716_v27, %s6994_s0  ;;  %6719 = vrcp.f32 %v3562_v13 }
0x22fc   :  { %v6720_v19 = vpop.eup %6719 }
0x22fd   :  { %v3569_v36 = vmul.f32 %v6720_v19, %v7788_v47 }
0x2360   :  { %v3683_v14 = vpop.permute.xlu0 %3682 }
0x2361   :  { %v3685_v32 = vmul.f32 %v6712_v8, %v3683_v14 }
0x2363   :  { %3696 = vrot.lane.b32.xlu1 %v3685_v32, %s6994_s0 }
0x2364   :  { %v3572_v21 = vpop.permute.xlu0 %3571 }
0x2365   :  { %v3574_v29 = vmul.f32 %v6720_v19, %v3572_v21 }
0x2367   :  { %3576 = vrot.lane.b32.xlu1 %v3574_v29, %s6994_s0 }
0x23d5   :  { %v3697_v30 = vpop.permute.xlu1 %3696 }
0x23d6   :  { %5343 = vmatmul.mubr.msk.f32.vlgmr.msra.gmra.mrb[24].mxu0 %vm455_vm4, %v3697_v30  ;;  %5843 = vmatmul.mubr.msk.f32.vlgmr.msra.gmra.mrb[26].mxu1 %vm455_vm4, %v3697_v30 }
0x23d7   :  { %6282 = vmatpush1.bf16.msra.mxu0 %v7682_v51  ;;  %3865 = vmatprep.mubr.f32.mxu0 %v6993_v2 }
0x23d8   :  { %6284 = vmatprep.subr.bf16.mxu0 %v7684_v58  ;;  %6304 = vmatpush1.bf16.msra.mxu1 %v7666_v18 }
0x23d9   :  { %v3577_v33 = vpop.permute.xlu1 %3576  ;;  %6306 = vmatprep.subr.bf16.mxu1 %v7668_v39  ;;  %4093 = vmatprep.mubr.f32.mxu1 %v6993_v2  ;;  %v5340_v39 = vmul.f32 -1.442695, %v6440_v15 }
0x23da   :  { %v7833_v24 = vadd.f32 %v3577_v33, %v3569_v36  ;;  %v4012_v33 = vld [vmem:[%s8091_s12] sm:$0x3] }
0x23db   :  { %6286 = vmatpush1.bf16.msra.mxu0 %v7689_v53 }
0x23dc   :  { %6721 = vtanh.f32 %v7833_v24  ;;  %6288 = vmatprep.subr.bf16.mxu0 %v7693_v54  ;;  %6308 = vmatpush1.bf16.msra.mxu1 %v7673_v41 }
0x23dd   :  { %6310 = vmatprep.subr.bf16.mxu1 %v7676_v42  ;;  %6723 = vpow2.f32 %v5340_v39  ;;  %v4024_v39 = vrot.slane %v4012_v33, %v7193_v12 }
0x23df   :  { %6290 = vmatpush1.bf16.msra.mxu0 %v7699_v3 }
0x23e0   :  { %6292 = vmatprep.subr.bf16.mxu0 %v7702_v7 }
0x23e3   :  { %6294 = vmatpush1.bf16.msra.mxu0 %v7707_v38 }
0x23e4   :  { %6325 = vmatprep.subr.bf16.mxu0 %v6995_v55 }
0x23e6   :  { %v6722_v18 = vpop.eup %6721 }
0x23e7   :  { %3582 = vrot.lane.b32.xlu0 %v6722_v18, %s6994_s0  ;;  %v6724_v40 = vpop.eup %6723  ;;  %v4020_v18 = vrot.slane %v4012_v33, %v7191_v11 }
0x23e8   :  { %v3563_v35 = vadd.f32 1.0, %v6724_v40 }
0x23ea   :  { %6725 = vrcp.f32 %v3563_v35 }
0x23f4   :  { %v6726_v45 = vpop.eup %6725 }
0x2459   :  { %v3583_v41 = vpop.permute.xlu0 %3582 }
0x245a   :  { %v3585_v46 = vmul.f32 %v6726_v45, %v3583_v41 }
0x245c   :  { %3586 = vst.msk [vmem:[#allocation2 + $0x2] sm:$0x1] %vm2949_vm5, %v3585_v46  ;;  %5344 = vmatmul.mubr.msk.f32.vlgmr.msra.gmra.mrb[24].mxu0 %vm262_vm3, %v3585_v46 }
0x245d   :  { %6327 = vmatpush3.bf16.msra.mxu0 %v7637_v5  ;;  %5853 = vmatprep.mubr.msk.f32.mxu0 %vm6996_vm2, %v6993_v2 }
0x245e   :  { %6328 = vmatprep.subr.bf16.mxu0 %v6995_v55 }
0x2461   :  { %6330 = vmatpush3.bf16.msra.mxu0 %v7641_v6 }
0x24a9   :  { %v3975_v42 = vpop.f32.mrb[26].mxu1 }
0x24aa   :  { %v3979_v47 = vadd.f32 %v3975_v42, %v7656_v44  ;;  %v5844_v56 = vpop.f32.mrb[27].mxu1 }
0x24ac   :  { %6727 = vtanh.f32 %v3979_v47  ;;  %v5348_v48 = vmul.f32 -1.442695, %v3979_v47 }
0x24ae   :  { %6729 = vpow2.f32 %v5348_v48 }
0x24b6   :  { %v6728_v31 = vpop.eup %6727 }
0x24b7   :  { %3989 = vrot.lane.b32.xlu1 %v6728_v31, %s6997_s19 }
0x24b8   :  { %v6730_v50 = vpop.eup %6729 }
0x24b9   :  { %v3983_v43 = vadd.f32 1.0, %v6730_v50 }
0x24bb   :  { %6731 = vrcp.f32 %v3983_v43 }
0x24c5   :  { %v6732_v5 = vpop.eup %6731 }
0x24c6   :  { %v3987_v59 = vmul.f32 %v6732_v5, %v7817_v26 }
0x2529   :  { %v3990_v49 = vpop.permute.xlu1 %3989 }
0x252a   :  { %v3992_v6 = vmul.f32 %v6732_v5, %v3990_v49 }
0x252c   :  { %3994 = vrot.lane.b32.xlu0 %v3992_v6, %s6997_s19  ;;  %v4323_v6 = vld [vmem:[#allocation12 + $0x8] sm:$0xff] }
0x252f   :  { %v3867_v52 = vpop.f32.mrb[24].mxu0 }
0x2530   :  { %v6441_v57 = vadd.f32 %v3867_v52, %v3702_v0  ;;  %v3869_v62 = vpop.f32.mrb[25].mxu0  ;;  %v4325_v0 = vld [vmem:[#allocation12 + $0x18] sm:$0xff]  ;;  %v4322_v52 = vld [vmem:[#allocation12] sm:$0xff] }
0x2531   :  { %v6442_v9 = vadd.f32 %v3869_v62, %v3706_v63  ;;  %v4324_v62 = vld [vmem:[#allocation12 + $0x10] sm:$0xff]  ;;  %v4541_v63 = vld [vmem:[#allocation11] sm:$0xff] }
0x2532   :  { %v5345_v1 = vmul.f32 -1.442695, %v6441_v57  ;;  %v7904_v57 = vpack.c.bf16 %v4325_v0, %v4323_v6  ;;  %v4330_v0 = vld [vmem:[%s8091_s12] sm:$0x3] }
0x2534   :  { %6332 = vmatprep.subr.bf16.mxu0 %v7904_v57 }
0x259e   :  { %v3995_v60 = vpop.permute.xlu0 %3994 }
0x259f   :  { %v7861_v8 = vadd.f32 %v3995_v60, %v3987_v59  ;;  %v4542_v59 = vld [vmem:[#allocation11 + $0x8] sm:$0xff]  ;;  %v7906_v60 = vpack.c.bf16 %v4324_v62, %v4322_v52  ;;  %v4338_v52 = vrot.slane %v4330_v0, %v7191_v11  ;;  %v4342_v62 = vrot.slane %v4330_v0, %v7193_v12 }
0x25a1   :  { %6733 = vtanh.f32 %v7861_v8 }
0x25a2   :  { %6735 = vtanh.f32 %v6442_v9 }
0x25a3   :  { %6737 = vpow2.f32 %v5345_v1 }
0x25ab   :  { %v6734_v16 = vpop.eup %6733 }
0x25ac   :  { %4000 = vrot.lane.b32.xlu1 %v6734_v16, %s6997_s19  ;;  %v6736_v37 = vpop.eup %6735  ;;  %v4329_v16 = vld [vmem:[#allocation12 + $0x38] sm:$0xff] }
0x25ad   :  { %v6738_v17 = vpop.eup %6737 }
0x25ae   :  { %v3880_v20 = vadd.f32 1.0, %v6738_v17  ;;  %v4328_v17 = vld [vmem:[#allocation12 + $0x30] sm:$0xff] }
0x25b0   :  { %3889 = vrot.lane.b32.xlu1 %v6736_v37, %s6994_s0  ;;  %6739 = vrcp.f32 %v3880_v20  ;;  %v4326_v37 = vld [vmem:[#allocation12 + $0x20] sm:$0xff]  ;;  %v4543_v20 = vld [vmem:[#allocation11 + $0x10] sm:$0xff] }
0x25ba   :  { %v6740_v25 = vpop.eup %6739 }
0x25bb   :  { %v3887_v4 = vmul.f32 %v6740_v25, %v7833_v24 }
0x261e   :  { %v4001_v22 = vpop.permute.xlu1 %4000 }
0x261f   :  { %v4003_v23 = vmul.f32 %v6732_v5, %v4001_v22  ;;  %v4544_v22 = vld [vmem:[#allocation11 + $0x18] sm:$0xff] }
0x2621   :  { %4014 = vrot.lane.b32.xlu0 %v4003_v23, %s6994_s0  ;;  %v7915_v23 = vpack.c.bf16 %v4328_v17, %v4326_v37 }
0x2622   :  { %v3890_v10 = vpop.permute.xlu1 %3889 }
0x2623   :  { %v3892_v26 = vmul.f32 %v6740_v25, %v3890_v10  ;;  %v7917_v25 = vpack.c.bf16 %v4544_v22, %v4543_v20  ;;  %v4419_v10 = vld [vmem:[#allocation14 + $0x8] sm:$0xff] }
0x2625   :  { %3894 = vrot.lane.b32.xlu0 %v3892_v26, %s6994_s0  ;;  %v4421_v26 = vld [vmem:[#allocation14 + $0x18] sm:$0xff] }
0x2693   :  { %v4015_v15 = vpop.permute.xlu0 %4014 }
0x2694   :  { %5349 = vmatmul.mubr.msk.f32.vlgmr.msra.gmra.mrb[28].mxu1 %vm455_vm4, %v4015_v15  ;;  %5854 = vmatmul.mubr.msk.f32.vlgmr.msra.gmra.mrb[26].mxu0 %vm455_vm4, %v4015_v15  ;;  %v7924_v15 = vpack.c.bf16 %v4421_v26, %v4419_v10 }
0x2695   :  { %6312 = vmatpush1.bf16.msra.mxu1 %v7682_v51  ;;  %4183 = vmatprep.mubr.f32.mxu1 %v6993_v2 }
0x2696   :  { %6314 = vmatprep.subr.bf16.mxu1 %v7684_v58  ;;  %4411 = vmatprep.mubr.f32.mxu0 %v6993_v2  ;;  %v5346_v58 = vmul.f32 -1.442695, %v6442_v9  ;;  %v4327_v9 = vld [vmem:[#allocation12 + $0x28] sm:$0xff] }
0x2697   :  { %v3895_v27 = vpop.permute.xlu0 %3894  ;;  %v7911_v1 = vpack.c.bf16 %v4329_v16, %v4327_v9  ;;  %6334 = vmatpush1.bf16.msra.mxu0 %v7906_v60 }
0x2698   :  { %v7875_v28 = vadd.f32 %v3895_v27, %v3887_v4 }
0x2699   :  { %6316 = vmatpush1.bf16.msra.mxu1 %v7689_v53  ;;  %6336 = vmatprep.subr.bf16.mxu0 %v7911_v1 }
0x269a   :  { %6741 = vtanh.f32 %v7875_v28  ;;  %6318 = vmatprep.subr.bf16.mxu1 %v7693_v54 }
0x269b   :  { %6743 = vpow2.f32 %v5346_v58  ;;  %6338 = vmatpush1.bf16.msra.mxu0 %v7915_v23 }
0x269c   :  { %6340 = vmatprep.subr.bf16.mxu0 %v7924_v15 }
0x269d   :  { %6320 = vmatpush1.bf16.msra.mxu1 %v7699_v3 }
0x269e   :  { %6322 = vmatprep.subr.bf16.mxu1 %v7702_v7 }
0x26a1   :  { %6324 = vmatpush1.bf16.msra.mxu1 %v7707_v38 }
0x26a2   :  { %6355 = vmatprep.subr.bf16.mxu1 %v6995_v55 }
0x26a4   :  { %v6742_v51 = vpop.eup %6741 }
0x26a5   :  { %3900 = vrot.lane.b32.xlu1 %v6742_v51, %s6994_s0  ;;  %v6744_v34 = vpop.eup %6743 }
0x26a6   :  { %v3881_v13 = vadd.f32 1.0, %v6744_v34 }
0x26a8   :  { %6745 = vrcp.f32 %v3881_v13 }
0x26b2   :  { %v6746_v53 = vpop.eup %6745 }
0x2717   :  { %v3901_v14 = vpop.permute.xlu1 %3900 }
0x2718   :  { %v3903_v32 = vmul.f32 %v6746_v53, %v3901_v14  ;;  %v4418_v14 = vld [vmem:[#allocation14] sm:$0xff] }
0x271a   :  { %3904 = vst.msk [vmem:[#allocation2 + $0x3] sm:$0x1] %vm2949_vm5, %v3903_v32  ;;  %5350 = vmatmul.mubr.msk.f32.vlgmr.msra.gmra.mrb[28].mxu1 %vm262_vm3, %v3903_v32  ;;  %v4420_v32 = vld [vmem:[#allocation14 + $0x10] sm:$0xff] }
0x271b   :  { %5864 = vmatprep.mubr.msk.f32.mxu1 %vm6996_vm2, %v6993_v2 }
0x2767   :  { %v4293_v54 = vpop.f32.mrb[26].mxu0 }
0x2768   :  { %v4297_v3 = vadd.f32 %v4293_v54, %v7656_v44  ;;  %v5855_v7 = vpop.f32.mrb[27].mxu0  ;;  %v4423_v54 = vld [vmem:[#allocation14 + $0x28] sm:$0xff] }
0x2769   :  { %v7933_v7 = vpack.c.bf16 %v4420_v32, %v4418_v14 }
0x276a   :  { %6747 = vtanh.f32 %v4297_v3  ;;  %v5354_v19 = vmul.f32 -1.442695, %v4297_v3  ;;  %v4425_v3 = vld [vmem:[#allocation14 + $0x38] sm:$0xff] }
0x276c   :  { %6749 = vpow2.f32 %v5354_v19  ;;  %v4422_v19 = vld [vmem:[#allocation14 + $0x20] sm:$0xff] }
0x2774   :  { %v6748_v38 = vpop.eup %6747 }
0x2775   :  { %4307 = vrot.lane.b32.xlu0 %v6748_v38, %s6997_s19  ;;  %v7935_v38 = vpack.c.bf16 %v4425_v3, %v4423_v54 }
0x2776   :  { %v6750_v21 = vpop.eup %6749 }
0x2777   :  { %v4301_v29 = vadd.f32 1.0, %v6750_v21 }
0x2779   :  { %6751 = vrcp.f32 %v4301_v29  ;;  %v4427_v29 = vld [vmem:[#allocation14 + $0x48] sm:$0xff] }
0x2783   :  { %v6752_v30 = vpop.eup %6751 }
0x2784   :  { %v4305_v47 = vmul.f32 %v6752_v30, %v7861_v8  ;;  %v7908_v8 = vpack.c.bf16 %v4542_v59, %v4541_v63 }
0x2786   :  { %6357 = vmatpush3.bf16.msra.mxu1 %v7908_v8 }
0x2787   :  { %6358 = vmatprep.subr.bf16.mxu1 %v6995_v55 }
0x278a   :  { %6360 = vmatpush3.bf16.msra.mxu1 %v7917_v25 }
0x278b   :  { %6362 = vmatprep.subr.bf16.mxu1 %v7904_v57 }
0x27e7   :  { %v4308_v36 = vpop.permute.xlu0 %4307 }
0x27e8   :  { %v4310_v24 = vmul.f32 %v6752_v30, %v4308_v36 }
0x27ea   :  { %4312 = vrot.lane.b32.xlu1 %v4310_v24, %s6997_s19 }
0x27ed   :  { %v4185_v40 = vpop.f32.mrb[28].mxu1 }
0x27ee   :  { %v6443_v35 = vadd.f32 %v4185_v40, %v4020_v18  ;;  %v4187_v45 = vpop.f32.mrb[29].mxu1  ;;  %v4426_v18 = vld [vmem:[#allocation14 + $0x40] sm:$0xff] }
0x27ef   :  { %v6444_v41 = vadd.f32 %v4187_v45, %v4024_v39  ;;  %v4428_v39 = vld [vmem:[#allocation14 + $0x50] sm:$0xff]  ;;  %v4433_v45 = vld [vmem:[#allocation14 + $0x78] sm:$0xff] }
0x27f0   :  { %v5351_v42 = vmul.f32 -1.442695, %v6443_v35  ;;  %v4431_v35 = vld [vmem:[#allocation14 + $0x68] sm:$0xff] }
0x27f1   :  { %6753 = vtanh.f32 %v6444_v41  ;;  %v5352_v53 = vmul.f32 -1.442695, %v6444_v41  ;;  %v7950_v41 = vpack.c.bf16 %v4428_v39, %v4426_v18 }
0x27f2   :  { %6755 = vpow2.f32 %v5351_v42  ;;  %v4430_v42 = vld [vmem:[#allocation14 + $0x60] sm:$0xff] }
0x27fb   :  { %v6754_v46 = vpop.eup %6753 }
0x27fc   :  { %4207 = vrot.lane.b32.xlu1 %v6754_v46, %s6994_s0  ;;  %v6756_v31 = vpop.eup %6755  ;;  %v7953_v46 = vpack.c.bf16 %v4433_v45, %v4431_v35 }
0x27fd   :  { %v4198_v50 = vadd.f32 1.0, %v6756_v31 }
0x285c   :  { %v4313_v56 = vpop.permute.xlu1 %4312 }
0x285d   :  { %v7899_v48 = vadd.f32 %v4313_v56, %v4305_v47  ;;  %v4432_v47 = vld [vmem:[#allocation14 + $0x70] sm:$0xff] }
0x285e   :  { %v7958_v56 = vpack.c.bf16 %v4432_v47, %v4430_v42 }
0x285f   :  { %6757 = vtanh.f32 %v7899_v48 }
0x2860   :  { %6759 = vrcp.f32 %v4198_v50 }
0x2869   :  { %v6758_v43 = vpop.eup %6757 }
0x286a   :  { %4318 = vrot.lane.b32.xlu0 %v6758_v43, %s6997_s19  ;;  %v6760_v5 = vpop.eup %6759 }
0x286b   :  { %v4205_v51 = vmul.f32 %v6760_v5, %v7875_v28  ;;  %v4424_v28 = vld [vmem:[#allocation14 + $0x30] sm:$0xff] }
0x286c   :  { %v7940_v33 = vpack.c.bf16 %v4424_v28, %v4422_v19 }
0x286e   :  { %v4208_v49 = vpop.permute.xlu1 %4207 }
0x286f   :  { %v4210_v61 = vmul.f32 %v6760_v5, %v4208_v49 }
0x2871   :  { %4212 = vrot.lane.b32.xlu1 %v4210_v61, %s6994_s0 }
0x28dc   :  { %v4319_v4 = vpop.permute.xlu0 %4318 }
0x28dd   :  { %v4321_v27 = vmul.f32 %v6752_v30, %v4319_v4  ;;  %v4429_v30 = vld [vmem:[#allocation14 + $0x58] sm:$0xff] }
0x28de   :  { %v7944_v24 = vpack.c.bf16 %v4429_v30, %v4427_v29 }
0x28df   :  { %4332 = vrot.lane.b32.xlu0 %v4321_v27, %s6994_s0 }
0x28e3   :  { %v4213_v58 = vpop.permute.xlu1 %4212 }
0x28e4   :  { %v7929_v34 = vadd.f32 %v4213_v58, %v4205_v51 }
0x28e6   :  { %6761 = vtanh.f32 %v7929_v34 }
0x28e7   :  { %6763 = vpow2.f32 %v5352_v53 }
0x28f0   :  { %v6762_v13 = vpop.eup %6761 }
0x28f1   :  { %4218 = vrot.lane.b32.xlu0 %v6762_v13, %s6994_s0  ;;  %v6764_v36 = vpop.eup %6763 }
0x28f2   :  { %v4199_v40 = vadd.f32 1.0, %v6764_v36 }
0x28f4   :  { %6765 = vrcp.f32 %v4199_v40 }
0x28fe   :  { %v6766_v31 = vpop.eup %6765 }
0x2951   :  { %v4333_v21 = vpop.permute.xlu0 %4332 }
0x2952   :  { %5355 = vmatmul.mubr.msk.f32.vlgmr.msra.gmra.mrb[28].mxu0 %vm455_vm4, %v4333_v21  ;;  %5865 = vmatmul.mubr.msk.f32.vlgmr.msra.gmra.mrb[30].mxu1 %vm455_vm4, %v4333_v21 }
0x2953   :  { %6342 = vmatpush1.bf16.msra.mxu0 %v7933_v7  ;;  %4501 = vmatprep.mubr.f32.mxu0 %v6993_v2 }
0x2954   :  { %6344 = vmatprep.subr.bf16.mxu0 %v7935_v38  ;;  %6364 = vmatpush1.bf16.msra.mxu1 %v7906_v60 }
0x2955   :  { %6366 = vmatprep.subr.bf16.mxu1 %v7911_v1  ;;  %4729 = vmatprep.mubr.f32.mxu1 %v6993_v2 }
0x2957   :  { %6346 = vmatpush1.bf16.msra.mxu0 %v7940_v33 }
0x2958   :  { %6348 = vmatprep.subr.bf16.mxu0 %v7944_v24  ;;  %6368 = vmatpush1.bf16.msra.mxu1 %v7915_v23 }
0x2959   :  { %6370 = vmatprep.subr.bf16.mxu1 %v7924_v15 }
0x295b   :  { %6350 = vmatpush1.bf16.msra.mxu0 %v7950_v41 }
0x295c   :  { %6352 = vmatprep.subr.bf16.mxu0 %v7953_v46 }
0x295f   :  { %6354 = vmatpush1.bf16.msra.mxu0 %v7958_v56 }
0x2960   :  { %6385 = vmatprep.subr.bf16.mxu0 %v6995_v55 }
0x2963   :  { %v4219_v50 = vpop.permute.xlu0 %4218 }
0x2964   :  { %v4221_v43 = vmul.f32 %v6766_v31, %v4219_v50 }
0x2966   :  { %4222 = vst.msk [vmem:[#allocation2 + $0x4] sm:$0x1] %vm2949_vm5, %v4221_v43  ;;  %5356 = vmatmul.mubr.msk.f32.vlgmr.msra.gmra.mrb[28].mxu0 %vm262_vm3, %v4221_v43 }
0x2967   :  { %6387 = vmatpush3.bf16.msra.mxu0 %v7908_v8  ;;  %5875 = vmatprep.mubr.msk.f32.mxu0 %vm6996_vm2, %v6993_v2 }
0x2968   :  { %6388 = vmatprep.subr.bf16.mxu0 %v6995_v55 }
0x296b   :  { %6390 = vmatpush3.bf16.msra.mxu0 %v7917_v25 }
0x296c   :  { %6392 = vmatprep.subr.bf16.mxu0 %v7904_v57 }
0x2a25   :  { %v4611_v5 = vpop.f32.mrb[30].mxu1 }
0x2a26   :  { %v4615_v49 = vadd.f32 %v4611_v5, %v7656_v44  ;;  %v5866_v61 = vpop.f32.mrb[31].mxu1 }
0x2a28   :  { %6767 = vtanh.f32 %v4615_v49  ;;  %v5360_v16 = vmul.f32 -1.442695, %v4615_v49 }
0x2a32   :  { %v6768_v6 = vpop.eup %6767 }
0x2a33   :  { %4625 = vrot.lane.b32.xlu1 %v6768_v6, %s6997_s19 }
0x2a39   :  { %v4503_v63 = vpop.f32.mrb[28].mxu0 }
0x2a3a   :  { %v6445_v59 = vadd.f32 %v4503_v63, %v4338_v52  ;;  %v4505_v8 = vpop.f32.mrb[29].mxu0 }
0x2a3b   :  { %v6446_v57 = vadd.f32 %v4505_v8, %v4342_v62 }
0x2a3c   :  { %v5357_v20 = vmul.f32 -1.442695, %v6445_v59 }
0x2a3d   :  { %6769 = vtanh.f32 %v6446_v57  ;;  %v5358_v21 = vmul.f32 -1.442695, %v6446_v57 }
0x2a3e   :  { %6771 = vpow2.f32 %v5360_v16 }
0x2a47   :  { %v6770_v9 = vpop.eup %6769 }
0x2a48   :  { %4525 = vrot.lane.b32.xlu1 %v6770_v9, %s6994_s0  ;;  %v6772_v37 = vpop.eup %6771 }
0x2a49   :  { %v4619_v17 = vadd.f32 1.0, %v6772_v37 }
0x2a4b   :  { %6773 = vrcp.f32 %v4619_v17 }
0x2a4c   :  { %6775 = vpow2.f32 %v5357_v20 }
0x2a55   :  { %v6774_v22 = vpop.eup %6773 }
0x2a56   :  { %v6776_v26 = vpop.eup %6775  ;;  %v4623_v13 = vmul.f32 %v6774_v22, %v7899_v48 }
0x2a57   :  { %v4516_v4 = vadd.f32 1.0, %v6776_v26 }
0x2a59   :  { %6777 = vrcp.f32 %v4516_v4 }
0x2a63   :  { %v6778_v27 = vpop.eup %6777 }
0x2a64   :  { %v4523_v54 = vmul.f32 %v6778_v27, %v7929_v34 }
0x2aa5   :  { %v4626_v25 = vpop.permute.xlu1 %4625 }
0x2aa6   :  { %v4628_v10 = vmul.f32 %v6774_v22, %v4626_v25 }
0x2aa8   :  { %4630 = vrot.lane.b32.xlu0 %v4628_v10, %s6997_s19 }
0x2aba   :  { %v4526_v51 = vpop.permute.xlu1 %4525 }
0x2abb   :  { %v4528_v58 = vmul.f32 %v6778_v27, %v4526_v51 }
0x2abd   :  { %4530 = vrot.lane.b32.xlu1 %v4528_v58, %s6994_s0 }
0x2b1a   :  { %v4631_v53 = vpop.permute.xlu0 %4630 }
0x2b1b   :  { %v7982_v14 = vadd.f32 %v4631_v53, %v4623_v13 }
0x2b1d   :  { %6779 = vtanh.f32 %v7982_v14 }
0x2b27   :  { %v6780_v32 = vpop.eup %6779 }
0x2b28   :  { %4636 = vrot.lane.b32.xlu0 %v6780_v32, %s6997_s19 }
0x2b2f   :  { %v4531_v3 = vpop.permute.xlu1 %4530 }
0x2b30   :  { %v7987_v19 = vadd.f32 %v4531_v3, %v4523_v54 }
0x2b32   :  { %6781 = vtanh.f32 %v7987_v19 }
0x2b33   :  { %6783 = vpow2.f32 %v5358_v21 }
0x2b3c   :  { %v6782_v28 = vpop.eup %6781 }
0x2b3d   :  { %4536 = vrot.lane.b32.xlu1 %v6782_v28, %s6994_s0  ;;  %v6784_v30 = vpop.eup %6783 }
0x2b3e   :  { %v4517_v36 = vadd.f32 1.0, %v6784_v30  ;;  %v5179_v30 = vld [vmem:[%s8092_s13 + $0x8] sm:$0xff] }
0x2b40   :  { %6785 = vrcp.f32 %v4517_v36 }
0x2b4a   :  { %v6786_v18 = vpop.eup %6785 }
0x2b9a   :  { %v4637_v48 = vpop.permute.xlu0 %4636 }
0x2b9b   :  { %v4639_v29 = vmul.f32 %v6774_v22, %v4637_v48 }
0x2b9d   :  { %4650 = vrot.lane.b32.xlu0 %v4639_v29, %s6994_s0 }
0x2baf   :  { %v4537_v39 = vpop.permute.xlu1 %4536 }
0x2bb0   :  { %v4539_v34 = vmul.f32 %v6786_v18, %v4537_v39  ;;  %v5181_v18 = vld [vmem:[%s8092_s13 + $0x18] sm:$0xff] }
0x2bb2   :  { %4540 = vst.msk [vmem:[#allocation2 + $0x5] sm:$0x1] %vm2949_vm5, %v4539_v34 }
0x2c0f   :  { %v4651_v40 = vpop.permute.xlu0 %4650 }
0x2c10   :  { %5361 = vmatmul.mubr.msk.f32.vlgmr.msra.gmra.mrb[32].mxu1 %vm455_vm4, %v4651_v40  ;;  %5876 = vmatmul.mubr.msk.f32.vlgmr.msra.gmra.mrb[30].mxu0 %vm455_vm4, %v4651_v40 }
0x2c11   :  { %6372 = vmatpush1.bf16.msra.mxu1 %v7933_v7  ;;  %4819 = vmatprep.mubr.f32.mxu1 %v6993_v2 }
0x2c12   :  { %6374 = vmatprep.subr.bf16.mxu1 %v7935_v38  ;;  %6394 = vmatpush1.bf16.msra.mxu0 %v7906_v60 }
0x2c13   :  { %6396 = vmatprep.subr.bf16.mxu0 %v7911_v1  ;;  %5047 = vmatprep.mubr.f32.mxu0 %v6993_v2 }
0x2c15   :  { %6376 = vmatpush1.bf16.msra.mxu1 %v7940_v33 }
0x2c16   :  { %6378 = vmatprep.subr.bf16.mxu1 %v7944_v24  ;;  %6398 = vmatpush1.bf16.msra.mxu0 %v7915_v23  ;;  %v4648_v23 = vld [vmem:[%s8091_s12] sm:$0x3] }
0x2c17   :  { %6400 = vmatprep.subr.bf16.mxu0 %v7924_v15  ;;  %v4656_v45 = vrot.slane %v4648_v23, %v7191_v11  ;;  %v4660_v42 = vrot.slane %v4648_v23, %v7193_v12 }
0x2c19   :  { %6380 = vmatpush1.bf16.msra.mxu1 %v7950_v41 }
0x2c1a   :  { %6382 = vmatprep.subr.bf16.mxu1 %v7953_v46 }
0x2c1d   :  { %6384 = vmatpush1.bf16.msra.mxu1 %v7958_v56 }
0x2c1e   :  { %6415 = vmatprep.subr.bf16.mxu1 %v6995_v55 }
0x2c20   :  { %5362 = vmatmul.mubr.msk.f32.vlgmr.msra.gmra.mrb[32].mxu1 %vm262_vm3, %v4539_v34 }
0x2c21   :  { %5894 = vmatprep.mubr.msk.f32.mxu1 %vm6996_vm2, %v6993_v2 }
0x2ce3   :  { %v4929_v60 = vpop.f32.mrb[30].mxu0 }
0x2ce4   :  { %v4933_v1 = vadd.f32 %v4929_v60, %v7656_v44  ;;  %v5877_v35 = vpop.f32.mrb[31].mxu0 }
0x2ce5   :  { %v5183_v35 = vld [vmem:[%s8092_s13 + $0x28] sm:$0xff] }
0x2ce6   :  { %6787 = vtanh.f32 %v4933_v1  ;;  %v5366_v44 = vmul.f32 -1.442695, %v4933_v1  ;;  %v5182_v1 = vld [vmem:[%s8092_s13 + $0x20] sm:$0xff] }
0x2ce7   :  { %v6422_v23 = vpack.c.bf16 %v5183_v35, %v5182_v1 }
0x2cf0   :  { %v6788_v15 = vpop.eup %6787 }
0x2cf1   :  { %4943 = vrot.lane.b32.xlu0 %v6788_v15, %s6997_s19  ;;  %v5184_v15 = vld [vmem:[%s8092_s13 + $0x30] sm:$0xff] }
0x2cf3   :  { %v4821_v47 = vpop.f32.mrb[32].mxu1 }
0x2cf4   :  { %v6447_v31 = vadd.f32 %v4821_v47, %v4656_v45  ;;  %v4823_v50 = vpop.f32.mrb[33].mxu1  ;;  %v5185_v45 = vld [vmem:[%s8092_s13 + $0x38] sm:$0xff] }
0x2cf5   :  { %v6448_v43 = vadd.f32 %v4823_v50, %v4660_v42  ;;  %v6425_v42 = vpack.c.bf16 %v5185_v45, %v5184_v15 }
0x2cf6   :  { %v5363_v6 = vmul.f32 -1.442695, %v6447_v31 }
0x2cf7   :  { %6789 = vtanh.f32 %v6448_v43  ;;  %v5364_v4 = vmul.f32 -1.442695, %v6448_v43 }
0x2cf8   :  { %6791 = vpow2.f32 %v5366_v44 }
0x2d01   :  { %v6790_v5 = vpop.eup %6789 }
0x2d02   :  { %4843 = vrot.lane.b32.xlu0 %v6790_v5, %s6994_s0  ;;  %v6792_v49 = vpop.eup %6791 }
0x2d03   :  { %v4937_v61 = vadd.f32 1.0, %v6792_v49 }
0x2d05   :  { %6793 = vrcp.f32 %v4937_v61 }
0x2d06   :  { %6795 = vpow2.f32 %v5363_v6  ;;  %v5371_v6 = vld [vmem:[#allocation3] ss:$0 sm:$0xff] }
0x2d0f   :  { %v6794_v0 = vpop.eup %6793 }
0x2d10   :  { %v6796_v52 = vpop.eup %6795  ;;  %v4941_v16 = vmul.f32 %v6794_v0, %v7982_v14 }
0x2d11   :  { %v4834_v59 = vadd.f32 1.0, %v6796_v52 }
0x2d13   :  { %6797 = vrcp.f32 %v4834_v59 }
0x2d1d   :  { %v6798_v8 = vpop.eup %6797 }
0x2d1e   :  { %v4841_v22 = vmul.f32 %v6798_v8, %v7987_v19 }
0x2d63   :  { %v4944_v62 = vpop.permute.xlu0 %4943 }
0x2d64   :  { %v4946_v63 = vmul.f32 %v6794_v0, %v4944_v62 }
0x2d66   :  { %4948 = vrot.lane.b32.xlu1 %v4946_v63, %s6997_s19 }
0x2d74   :  { %v4844_v57 = vpop.permute.xlu0 %4843 }
0x2d75   :  { %v4846_v9 = vmul.f32 %v6798_v8, %v4844_v57 }
0x2d77   :  { %4848 = vrot.lane.b32.xlu0 %v4846_v9, %s6994_s0 }
0x2dd8   :  { %v4949_v37 = vpop.permute.xlu1 %4948 }
0x2dd9   :  { %v4951_v17 = vadd.f32 %v4949_v37, %v4941_v16 }
0x2ddb   :  { %6799 = vtanh.f32 %v4951_v17 }
0x2de5   :  { %v6800_v20 = vpop.eup %6799 }
0x2de6   :  { %4954 = vrot.lane.b32.xlu1 %v6800_v20, %s6997_s19 }
0x2de9   :  { %v4849_v25 = vpop.permute.xlu0 %4848 }
0x2dea   :  { %v4851_v10 = vadd.f32 %v4849_v25, %v4841_v22 }
0x2dec   :  { %6801 = vtanh.f32 %v4851_v10 }
0x2ded   :  { %6803 = vpow2.f32 %v5364_v4 }
0x2df6   :  { %v6802_v26 = vpop.eup %6801 }
0x2df7   :  { %4854 = vrot.lane.b32.xlu0 %v6802_v26, %s6994_s0  ;;  %v6804_v27 = vpop.eup %6803 }
0x2df8   :  { %v4835_v13 = vadd.f32 1.0, %v6804_v27 }
0x2dfa   :  { %6805 = vrcp.f32 %v4835_v13 }
0x2e04   :  { %v6806_v53 = vpop.eup %6805 }
0x2e58   :  { %v4955_v51 = vpop.permute.xlu1 %4954 }
0x2e59   :  { %v4957_v58 = vmul.f32 %v6794_v0, %v4955_v51 }
0x2e5b   :  { %4968 = vrot.lane.b32.xlu1 %v4957_v58, %s6994_s0 }
0x2e69   :  { %v4855_v14 = vpop.permute.xlu0 %4854 }
0x2e6a   :  { %v4857_v32 = vmul.f32 %v6806_v53, %v4855_v14 }
0x2e6c   :  { %4858 = vst.msk [vmem:[#allocation2 + $0x6] sm:$0x1] %vm2949_vm5, %v4857_v32 }
0x2ecd   :  { %v4969_v54 = vpop.permute.xlu1 %4968 }
0x2ece   :  { %5367 = vmatmul.mubr.msk.f32.vlgmr.msra.gmra.mrb[32].mxu0 %vm455_vm4, %v4969_v54 }
0x2ecf   :  { %6402 = vmatpush1.bf16.msra.mxu0 %v7933_v7  ;;  %5137 = vmatprep.mubr.f32.mxu0 %v6993_v2  ;;  %v4966_v7 = vld [vmem:[%s8091_s12] sm:$0x3] }
0x2ed0   :  { %6404 = vmatprep.subr.bf16.mxu0 %v7935_v38  ;;  %v4978_v2 = vrot.slane %v4966_v7, %v7193_v12  ;;  %v5178_v12 = vld [vmem:[%s8092_s13] sm:$0xff] }
0x2ed1   :  { %v6416_v36 = vpack.c.bf16 %v5179_v30, %v5178_v12 }
0x2ed3   :  { %6406 = vmatpush1.bf16.msra.mxu0 %v7940_v33  ;;  %6417 = vmatpush3.bf16.msra.mxu1 %v6416_v36 }
0x2ed4   :  { %6408 = vmatprep.subr.bf16.mxu0 %v7944_v24  ;;  %v4974_v24 = vrot.slane %v4966_v7, %v7191_v11  ;;  %v5180_v11 = vld [vmem:[%s8092_s13 + $0x10] sm:$0xff]  ;;  %6418 = vmatprep.subr.bf16.mxu1 %v6995_v55 }
0x2ed5   :  { %v6419_v39 = vpack.c.bf16 %v5181_v18, %v5180_v11 }
0x2ed7   :  { %6410 = vmatpush1.bf16.msra.mxu0 %v7950_v41  ;;  %6420 = vmatpush3.bf16.msra.mxu1 %v6419_v39 }
0x2ed8   :  { %6412 = vmatprep.subr.bf16.mxu0 %v7953_v46  ;;  %6421 = vmatprep.subr.bf16.mxu1 %v6995_v55 }
0x2edb   :  { %6414 = vmatpush1.bf16.msra.mxu0 %v7958_v56  ;;  %6423 = vmatpush3.bf16.msra.mxu1 %v6422_v23 }
0x2edc   :  { %6424 = vmatprep.subr.bf16.mxu1 %v6995_v55 }
0x2ede   :  { %5368 = vmatmul.mubr.msk.f32.vlgmr.msra.gmra.mrb[32].mxu0 %vm262_vm3, %v4857_v32 }
0x2edf   :  { %6426 = vmatpush3.bf16.msra.mxu1 %v6425_v42 }
0x2fb1   :  { %v5139_v3 = vpop.f32.mrb[32].mxu0 }
0x2fb2   :  { %v5141_v38 = vpop.f32.mrb[33].mxu0  ;;  %v6449_v41 = vadd.f32 %v5139_v3, %v4974_v24 }
0x2fb3   :  { %v6450_v19 = vadd.f32 %v5141_v38, %v4978_v2 }
0x2fb4   :  { %v5369_v46 = vmul.f32 -1.442695, %v6449_v41 }
0x2fb5   :  { %6807 = vtanh.f32 %v6450_v19  ;;  %v5370_v31 = vmul.f32 -1.442695, %v6450_v19 }
0x2fb6   :  { %6809 = vpow2.f32 %v5369_v46 }
0x2fbf   :  { %v6808_v33 = vpop.eup %6807 }
0x2fc0   :  { %5161 = vrot.lane.b32.xlu1 %v6808_v33, %s6994_s0  ;;  %v6810_v56 = vpop.eup %6809 }
0x2fc1   :  { %v5152_v28 = vadd.f32 1.0, %v6810_v56 }
0x2fc3   :  { %6811 = vrcp.f32 %v5152_v28 }
0x2fcd   :  { %v6812_v21 = vpop.eup %6811 }
0x2fce   :  { %v5159_v34 = vmul.f32 %v6812_v21, %v4851_v10 }
0x3032   :  { %v5162_v48 = vpop.permute.xlu1 %5161 }
0x3033   :  { %v5164_v29 = vmul.f32 %v6812_v21, %v5162_v48 }
0x3035   :  { %5166 = vrot.lane.b32.xlu0 %v5164_v29, %s6994_s0 }
0x30a7   :  { %v5167_v40 = vpop.permute.xlu0 %5166 }
0x30a8   :  { %v5169_v60 = vadd.f32 %v5167_v40, %v5159_v34 }
0x30aa   :  { %6813 = vtanh.f32 %v5169_v60 }
0x30ab   :  { %6815 = vpow2.f32 %v5370_v31 }
0x30b4   :  { %v6814_v47 = vpop.eup %6813 }
0x30b5   :  { %5172 = vrot.lane.b32.xlu1 %v6814_v47, %s6994_s0  ;;  %v6816_v50 = vpop.eup %6815 }
0x30b6   :  { %v5153_v43 = vadd.f32 1.0, %v6816_v50 }
0x30b8   :  { %6817 = vrcp.f32 %v5153_v43 }
0x30c2   :  { %v6818_v5 = vpop.eup %6817 }
0x3127   :  { %v5173_v44 = vpop.permute.xlu1 %5172 }
0x3128   :  { %v5175_v49 = vmul.f32 %v6818_v5, %v5173_v44 }
0x312a   :  { %5176 = vst.msk [vmem:[#allocation2 + $0x7] sm:$0x1] %vm2949_vm5, %v5175_v49 }
0x3131   :  { %v5177_v61 = vld [vmem:[#allocation2] sm:$0xff] }
0x3132   :  { %5895 = vmatmul.mubr.msk.f32.vlgmr.msra.gmra.mrb[34].mxu1 %vm262_vm3, %v5177_v61 }
0x3205   :  { %v5262_v0 = vpop.f32.mrb[34].mxu1 }
0x3206   :  { %v5263_v55 = vadd.f32 %v5371_v6, %v5262_v0  ;;  %v5896_v52 = vpop.f32.mrb[35].mxu1 }
0x3208   :  { %5266 = vst.msk [vmem:[%s8094_s15] sm:$0xff] %vm166_vm1, %v5263_v55 }
0x3209   :  { %5271 = vsyncpa [#allocation5], 1 }
0x320a   :  { %5272 = vsyncpa [#allocation7], 1 }
0x320b   :  { %5273 = vsyncpa [#allocation10], 1 }
0x320c   :  { %5274 = vsyncpa [#allocation13], 1 }

</bundles_post_ra>
